<compile_context>
chip_gen: v7x
topology: tpu7x:2x2x1
jax: 0.10.0
libtpu: 0.0.40
codegen_flags: <defaults>
</compile_context>

<pallas_src>
import jax
import jax.numpy as jnp
import numpy as np
from jax import lax
from jax.experimental import pallas as pl
from jax.experimental.pallas import tpu as pltpu

BN_EPS = 1e-5
BLOCK_B = 16          # images per grid step; multiple of 8 keeps every slice sublane-aligned


# ------------------------------ Pallas kernel ------------------------------ #

def _make_kernel(B):
    RB = 14 * B

    def kernel(x_ref, a_ref, s1_ref, m_ref, s2_ref, wfc_ref, fcb_ref,
               y_ref, out_ref, h1p_scr):
        """One sub-batch of B images, entirely in VMEM.

        x_ref   : (1, 2, 15*B, 30) bf16; [0, p, r*B+b, :] = zero-padded row 2r+p of image b
        a_ref   : (6, 30, 224)   bf16 conv1 banded matrices  [3*width_parity + kh]
        s1_ref  : (1, 224)       f32  conv1 bias + BN shift (cols 16*w + c)
        m_ref   : (3, 224, 224)  bf16 conv2 banded matrices  [kh]
        s2_ref  : (1, 224)       f32  conv2 bias + BN shift (cols 14*c + w)
        wfc_ref : (14, 224, 14)  bf16 classifier weights regrouped per feature row h
        fcb_ref : (1, 14)        f32  classifier bias
        y_ref   : (1, 14*B, 224) f32  lane-dense feature map (rows h*B+b, cols 14*c+w)
        out_ref : (B, 14)        f32  classifier output
        h1p_scr : (16*B, 224)    bf16 height-zero-padded pooled map
        """
        f32 = jnp.float32
        bf16 = jnp.bfloat16

        def slab(p, s):                          # (14B, 30), rows ordered (row j, image b)
            return x_ref[0, p, s * B:(s + 14) * B, :]

        # padded-row slabs feeding kh = 0,1,2 for even / odd conv1 output rows
        row_plan = (((0, 0), (1, 0), (0, 1)),    # conv rows 2j   -> padded rows 2j, 2j+1, 2j+2
                    ((1, 0), (0, 1), (1, 1)))    # conv rows 2j+1 -> padded rows 2j+1, 2j+2, 2j+3

        shift1 = s1_ref[...]                     # (1, 224)
        pooled = None
        for q in range(2):                       # conv1 output-row parity
            sl = [slab(p, s) for (p, s) in row_plan[q]]
            for wp in range(2):                  # conv1 output-column (width) parity
                acc = jnp.dot(sl[0], a_ref[3 * wp + 0], preferred_element_type=f32)
                acc = acc + jnp.dot(sl[1], a_ref[3 * wp + 1], preferred_element_type=f32)
                acc = acc + jnp.dot(sl[2], a_ref[3 * wp + 2], preferred_element_type=f32)
                v = jnp.maximum(acc + shift1, 0.0)          # Conv1 + BN + ReLU  (14B, 224)
                pooled = v if pooled is None else jnp.maximum(pooled, v)   # MaxPool 2x2

        # Height-zero-padded pooled map (one pooled row = B block rows) for conv2.
        # The pad rows are re-zeroed every step: with a "parallel" grid each megacore TC
        # owns a private scratch, so a program_id==0 one-time init would leave one core
        # with garbage pad rows.  Cost: two tiny (B,224) bf16 stores per step.
        zpad = jnp.zeros((B, 224), bf16)
        h1p_scr[0:B, :] = zpad
        h1p_scr[15 * B:16 * B, :] = zpad
        h1p_scr[B:15 * B, :] = pooled.astype(bf16)

        acc2 = jnp.dot(h1p_scr[0:RB, :], m_ref[0], preferred_element_type=f32)
        acc2 = acc2 + jnp.dot(h1p_scr[B:B + RB, :], m_ref[1], preferred_element_type=f32)
        acc2 = acc2 + jnp.dot(h1p_scr[2 * B:2 * B + RB, :], m_ref[2], preferred_element_type=f32)
        v2 = jnp.maximum(acc2 + s2_ref[...], 0.0)           # Conv2 + BN + ReLU (14B, 224)
        # TODO(synk): training-mode Dropout (random masking) not implemented; eval identity.
        #             AvgPool2d(kernel=1, stride=1) is an identity.

        y_ref[0, :, :] = v2                                  # single lane-dense store

        # classifier: Linear(3136, 14); one (B,224)@(224,14) matmul per feature row h
        v2b = v2.astype(bf16)
        acc_fc = jnp.zeros((B, 14), f32)
        for h in range(14):
            acc_fc = acc_fc + jnp.dot(v2b[h * B:(h + 1) * B, :], wfc_ref[h],
                                      preferred_element_type=f32)
        out_ref[...] = acc_fc + fcb_ref[...]

    return kernel


def emnist_forward(x_nchw, D, block_b=BLOCK_B):
    B = block_b
    N = x_nchw.shape[0]
    G = -(-N // B)                # number of grid steps (sub-batches)
    Npad = G * B

    x = x_nchw.reshape(N, 28, 28).astype(jnp.float32)
    x = jnp.pad(x, ((0, Npad - N), (1, 1), (1, 1)))              # (Npad, 30, 30)
    x = x.reshape(Npad, 15, 2, 30)                               # [n, r, p, :] = padded row 2r+p
    x_blk = (x.reshape(G, B, 15, 2, 30)
              .transpose(0, 3, 2, 1, 4)                          # [g, p, r, b, :]
              .reshape(G, 2, 15 * B, 30)
              .astype(jnp.bfloat16))

    kernel = _make_kernel(B)
    y_lane, out = pl.pallas_call(
        kernel,
        out_shape=(jax.ShapeDtypeStruct((G, 14 * B, 224), jnp.float32),
                   jax.ShapeDtypeStruct((Npad, 14), jnp.float32)),
        grid=(G,),
        in_specs=[
            pl.BlockSpec((1, 2, 15 * B, 30), lambda g: (g, 0, 0, 0)),
            pl.BlockSpec((6, 30, 224), lambda g: (0, 0, 0)),
            pl.BlockSpec((1, 224), lambda g: (0, 0)),
            pl.BlockSpec((3, 224, 224), lambda g: (0, 0, 0)),
            pl.BlockSpec((1, 224), lambda g: (0, 0)),
            pl.BlockSpec((14, 224, 14), lambda g: (0, 0, 0)),
            pl.BlockSpec((1, 14), lambda g: (0, 0)),
        ],
        out_specs=(
            pl.BlockSpec((1, 14 * B, 224), lambda g: (g, 0, 0)),
            pl.BlockSpec((B, 14), lambda g: (g, 0)),
        ),
        scratch_shapes=[pltpu.VMEM((16 * B, 224), jnp.bfloat16)],
        compiler_params=pltpu.CompilerParams(dimension_semantics=("parallel",)),
    )(x_blk, D['A'], D['shift1'], D['M'], D['shift2'], D['Wfc'], D['fcb'])

    # (G, 14B, 224) rows (h, b), cols (c, w)  ->  NCHW (N, 16, 14, 14); one fused XLA permute.
    y = (y_lane.reshape(G, 14, B, 16, 14)
               .transpose(0, 2, 3, 1, 4)
               .reshape(Npad, 16, 14, 14)[:N])
    return y, out[:N]


# --------------------- host-side parameter preparation --------------------- #

def init_params(key):
    ks = jax.random.split(key, 6)
    P = {
        'conv1_w': jax.random.normal(ks[0], (16, 1, 3, 3), jnp.float32) * 0.2,
        'conv1_b': jax.random.normal(ks[1], (16,), jnp.float32) * 0.1,
        'conv2_w': jax.random.normal(ks[2], (16, 16, 3, 3), jnp.float32) * 0.1,
        'conv2_b': jax.random.normal(ks[3], (16,), jnp.float32) * 0.1,
        'fc_w': jax.random.normal(ks[4], (14, 16 * 14 * 14), jnp.float32) * 0.02,
        'fc_b': jax.random.normal(ks[5], (14,), jnp.float32) * 0.01,
    }
    # BatchNorm2d parameters / running stats at nn.Module defaults (eval mode)
    for i in (1, 2):
        P[f'bn{i}_gamma'] = jnp.ones((16,), jnp.float32)
        P[f'bn{i}_beta'] = jnp.zeros((16,), jnp.float32)
        P[f'bn{i}_mean'] = jnp.zeros((16,), jnp.float32)
        P[f'bn{i}_var'] = jnp.ones((16,), jnp.float32)
    return P


def derive_kernel_params(P):
    """Fold conv-bias + BN into scale/shift, fold scale into the weights, and build the
    banded/Toeplitz matmul matrices (bf16) that implement the 3x3 convs lane-dense."""
    Pn = {k: np.asarray(v) for k, v in P.items()}

    def fold(i):
        scale = Pn[f'bn{i}_gamma'] / np.sqrt(Pn[f'bn{i}_var'] + BN_EPS)
        shift = Pn[f'bn{i}_beta'] - Pn[f'bn{i}_mean'] * scale + Pn[f'conv{i}_b'] * scale
        return scale.astype(np.float32), shift.astype(np.float32)

    scale1, shift1 = fold(1)
    scale2, shift2 = fold(2)
    w1s = Pn['conv1_w'][:, 0] * scale1[:, None, None]            # (16co, 3, 3)
    w2s = Pn['conv2_w'] * scale2[:, None, None, None]            # (16co, 16ci, 3, 3)

    # Conv1: 3 banded matmuls per output-column parity p; columns are 16*w_pool + co.
    A = np.zeros((2, 3, 30, 224), np.float32)
    for p in range(2):
        for kh in range(3):
            for kw in range(3):
                for wp in range(14):
                    A[p, kh, 2 * wp + p + kw, wp * 16:(wp + 1) * 16] = w1s[:, kh, kw]
    A = A.reshape(6, 30, 224)

    # Conv2: 3 banded matmuls over the pooled map (cols 16*w_in + ci);
    # output columns 14*co + w  (matches the NCHW flatten order of y).
    M = np.zeros((3, 224, 224), np.float32)
    for kh in range(3):
        for kw in range(3):
            for w in range(14):
                w_in = w + kw - 1
                if 0 <= w_in < 14:
                    M[kh, w_in * 16:(w_in + 1) * 16, w:224:14] = w2s[:, :, kh, kw].T

    # Classifier weights regrouped per feature row h: Wfc[h, 14*co + w, k]
    Gw = Pn['fc_w'].reshape(14, 16, 14, 14)                      # (k, co, h, w)
    Wfc = np.transpose(Gw, (2, 1, 3, 0)).reshape(14, 224, 14)

    return {
        'A': jnp.asarray(A, dtype=jnp.bfloat16),
        'M': jnp.asarray(M, dtype=jnp.bfloat16),
        'Wfc': jnp.asarray(Wfc, dtype=jnp.bfloat16),
        'shift1': jnp.asarray(np.tile(shift1, 14).reshape(1, 224)),    # cols 16*w + c
        'shift2': jnp.asarray(np.repeat(shift2, 14).reshape(1, 224)),  # cols 14*c + w
        'fcb': jnp.asarray(Pn['fc_b'].astype(np.float32).reshape(1, 14)),
    }


# --------------------------- pure-JAX reference ----------------------------- #

def reference_forward(x_nchw, P):
    hp = lax.Precision.HIGHEST

    def cbr(x, w, b, g, bt, mu, var):
        y = lax.conv_general_dilated(x, w, (1, 1), ((1, 1), (1, 1)),
                                     dimension_numbers=('NCHW', 'OIHW', 'NCHW'),
                                     precision=hp)
        y = y + b[None, :, None, None]
        y = (y - mu[None, :, None, None]) * (g / jnp.sqrt(var + BN_EPS))[None, :, None, None]
        y = y + bt[None, :, None, None]
        return jnp.maximum(y, 0.0)

    h = cbr(x_nchw, P['conv1_w'], P['conv1_b'], P['bn1_gamma'], P['bn1_beta'],
            P['bn1_mean'], P['bn1_var'])
    h = lax.reduce_window(h, -jnp.inf, lax.max, (1, 1, 2, 2), (1, 1, 2, 2), 'VALID')
    y = cbr(h, P['conv2_w'], P['conv2_b'], P['bn2_gamma'], P['bn2_beta'],
            P['bn2_mean'], P['bn2_var'])
    out = jnp.dot(y.reshape(x_nchw.shape[0], -1), P['fc_w'].T, precision=hp) + P['fc_b']
    return y, out


if __name__ == "__main__":
    key = jax.random.PRNGKey(0)
    kx, kp = jax.random.split(key)
    N = 18                                   # exercises batch padding (-> 32) and a 2-step grid
    x = jax.random.normal(kx, (N, 1, 28, 28), jnp.float32)   # EMNIST-style input
    P = init_params(kp)
    D = derive_kernel_params(P)

    fwd = jax.jit(emnist_forward)
    y, out = fwd(x, D)
    y, out = jax.block_until_ready((y, out))

    ry, rout = reference_forward(x, P)
    assert y.shape == (N, 16, 14, 14) and out.shape == (N, 14)
    # bf16 MXU operands with f32 accumulation -> loosened tolerances vs the f32 reference
    assert jnp.allclose(y, ry, atol=7e-2, rtol=5e-2), \
        f"feature map mismatch: max|dy|={jnp.max(jnp.abs(y - ry))}"
    assert jnp.allclose(out, rout, atol=7e-2, rtol=5e-2), \
        f"classifier output mismatch: max|do|={jnp.max(jnp.abs(out - rout))}"
    print("KERNEL_OK")
</pallas_src>

<mosaic_0001>
module attributes {stable_mosaic.version = 11 : i64} {
  func.func @kernel(%arg0: i32, %arg1: memref<1x2x240x30xbf16, #tpu.memory_space<vmem>>, %arg2: memref<6x30x224xbf16, #tpu.memory_space<vmem>>, %arg3: memref<1x224xf32, #tpu.memory_space<vmem>>, %arg4: memref<3x224x224xbf16, #tpu.memory_space<vmem>>, %arg5: memref<1x224xf32, #tpu.memory_space<vmem>>, %arg6: memref<14x224x14xbf16, #tpu.memory_space<vmem>>, %arg7: memref<1x14xf32, #tpu.memory_space<vmem>>, %arg8: memref<1x224x224xf32, #tpu.memory_space<vmem>>, %arg9: memref<16x14xf32, #tpu.memory_space<vmem>>, %arg10: memref<256x224xbf16, #tpu.memory_space<vmem>>) attributes {dimension_semantics = [#tpu.dimension_semantics<parallel>], iteration_bounds = array<i64: 2>, scalar_prefetch = 0 : i64, scratch_operands = 1 : i64, tpu.core_type = #tpu.core_type<tc>, window_params = [{transform_indices = @transform_0, window_bounds = array<i64: 1, 2, 240, 30>}, {pipeline_mode = #tpu.pipeline_mode<synchronous>, transform_indices = @transform_1, window_bounds = array<i64: 6, 30, 224>}, {pipeline_mode = #tpu.pipeline_mode<synchronous>, transform_indices = @transform_2, window_bounds = array<i64: 1, 224>}, {pipeline_mode = #tpu.pipeline_mode<synchronous>, transform_indices = @transform_3, window_bounds = array<i64: 3, 224, 224>}, {pipeline_mode = #tpu.pipeline_mode<synchronous>, transform_indices = @transform_4, window_bounds = array<i64: 1, 224>}, {pipeline_mode = #tpu.pipeline_mode<synchronous>, transform_indices = @transform_5, window_bounds = array<i64: 14, 224, 14>}, {pipeline_mode = #tpu.pipeline_mode<synchronous>, transform_indices = @transform_6, window_bounds = array<i64: 1, 14>}, {transform_indices = @transform_7, window_bounds = array<i64: 1, 224, 224>}, {transform_indices = @transform_8, window_bounds = array<i64: 16, 14>}]} {
    %c0 = arith.constant 0 : index
    %c0_0 = arith.constant 0 : index
    %0 = vector.load %arg3[%c0, %c0_0] : memref<1x224xf32, #tpu.memory_space<vmem>>, vector<1x224xf32>
    %c0_1 = arith.constant 0 : index
    %c0_2 = arith.constant 0 : index
    %c0_3 = arith.constant 0 : index
    %c0_4 = arith.constant 0 : index
    %1 = vector.load %arg1[%c0_1, %c0_2, %c0_3, %c0_4] : memref<1x2x240x30xbf16, #tpu.memory_space<vmem>>, vector<1x1x224x30xbf16>
    %2 = vector.shape_cast %1 : vector<1x1x224x30xbf16> to vector<224x30xbf16>
    %c0_5 = arith.constant 0 : index
    %c1 = arith.constant 1 : index
    %c0_6 = arith.constant 0 : index
    %c0_7 = arith.constant 0 : index
    %3 = vector.load %arg1[%c0_5, %c1, %c0_6, %c0_7] : memref<1x2x240x30xbf16, #tpu.memory_space<vmem>>, vector<1x1x224x30xbf16>
    %4 = vector.shape_cast %3 : vector<1x1x224x30xbf16> to vector<224x30xbf16>
    %c0_8 = arith.constant 0 : index
    %c0_9 = arith.constant 0 : index
    %c16 = arith.constant 16 : index
    %c0_10 = arith.constant 0 : index
    %5 = vector.load %arg1[%c0_8, %c0_9, %c16, %c0_10] : memref<1x2x240x30xbf16, #tpu.memory_space<vmem>>, vector<1x1x224x30xbf16>
    %6 = vector.shape_cast %5 : vector<1x1x224x30xbf16> to vector<224x30xbf16>
    %c0_11 = arith.constant 0 : index
    %c0_12 = arith.constant 0 : index
    %c0_13 = arith.constant 0 : index
    %7 = vector.load %arg2[%c0_11, %c0_12, %c0_13] : memref<6x30x224xbf16, #tpu.memory_space<vmem>>, vector<1x30x224xbf16>
    %8 = vector.shape_cast %7 : vector<1x30x224xbf16> to vector<30x224xbf16>
    %cst = arith.constant dense<0.000000e+00> : vector<224x224xf32>
    %9 = tpu.matmul %2, %8, %cst {dimension_numbers = #tpu.dot_dimension_numbers<[1], [0], [0], [1], [0, 0, 1, 1], [], []>} : vector<224x30xbf16>, vector<30x224xbf16>, vector<224x224xf32> -> vector<224x224xf32>
    %c1_14 = arith.constant 1 : index
    %c0_15 = arith.constant 0 : index
    %c0_16 = arith.constant 0 : index
    %10 = vector.load %arg2[%c1_14, %c0_15, %c0_16] : memref<6x30x224xbf16, #tpu.memory_space<vmem>>, vector<1x30x224xbf16>
    %11 = vector.shape_cast %10 : vector<1x30x224xbf16> to vector<30x224xbf16>
    %cst_17 = arith.constant dense<0.000000e+00> : vector<224x224xf32>
    %12 = tpu.matmul %4, %11, %cst_17 {dimension_numbers = #tpu.dot_dimension_numbers<[1], [0], [0], [1], [0, 0, 1, 1], [], []>} : vector<224x30xbf16>, vector<30x224xbf16>, vector<224x224xf32> -> vector<224x224xf32>
    %13 = arith.addf %9, %12 : vector<224x224xf32>
    %c2 = arith.constant 2 : index
    %c0_18 = arith.constant 0 : index
    %c0_19 = arith.constant 0 : index
    %14 = vector.load %arg2[%c2, %c0_18, %c0_19] : memref<6x30x224xbf16, #tpu.memory_space<vmem>>, vector<1x30x224xbf16>
    %15 = vector.shape_cast %14 : vector<1x30x224xbf16> to vector<30x224xbf16>
    %cst_20 = arith.constant dense<0.000000e+00> : vector<224x224xf32>
    %16 = tpu.matmul %6, %15, %cst_20 {dimension_numbers = #tpu.dot_dimension_numbers<[1], [0], [0], [1], [0, 0, 1, 1], [], []>} : vector<224x30xbf16>, vector<30x224xbf16>, vector<224x224xf32> -> vector<224x224xf32>
    %17 = arith.addf %13, %16 : vector<224x224xf32>
    %18 = vector.broadcast %0 : vector<1x224xf32> to vector<224x224xf32>
    %19 = arith.addf %17, %18 : vector<224x224xf32>
    %cst_21 = arith.constant 0.000000e+00 : f32
    %20 = vector.broadcast %cst_21 : f32 to vector<224x224xf32>
    %21 = arith.maximumf %19, %20 : vector<224x224xf32>
    %c3 = arith.constant 3 : index
    %c0_22 = arith.constant 0 : index
    %c0_23 = arith.constant 0 : index
    %22 = vector.load %arg2[%c3, %c0_22, %c0_23] : memref<6x30x224xbf16, #tpu.memory_space<vmem>>, vector<1x30x224xbf16>
    %23 = vector.shape_cast %22 : vector<1x30x224xbf16> to vector<30x224xbf16>
    %cst_24 = arith.constant dense<0.000000e+00> : vector<224x224xf32>
    %24 = tpu.matmul %2, %23, %cst_24 {dimension_numbers = #tpu.dot_dimension_numbers<[1], [0], [0], [1], [0, 0, 1, 1], [], []>} : vector<224x30xbf16>, vector<30x224xbf16>, vector<224x224xf32> -> vector<224x224xf32>
    %c4 = arith.constant 4 : index
    %c0_25 = arith.constant 0 : index
    %c0_26 = arith.constant 0 : index
    %25 = vector.load %arg2[%c4, %c0_25, %c0_26] : memref<6x30x224xbf16, #tpu.memory_space<vmem>>, vector<1x30x224xbf16>
    %26 = vector.shape_cast %25 : vector<1x30x224xbf16> to vector<30x224xbf16>
    %cst_27 = arith.constant dense<0.000000e+00> : vector<224x224xf32>
    %27 = tpu.matmul %4, %26, %cst_27 {dimension_numbers = #tpu.dot_dimension_numbers<[1], [0], [0], [1], [0, 0, 1, 1], [], []>} : vector<224x30xbf16>, vector<30x224xbf16>, vector<224x224xf32> -> vector<224x224xf32>
    %28 = arith.addf %24, %27 : vector<224x224xf32>
    %c5 = arith.constant 5 : index
    %c0_28 = arith.constant 0 : index
    %c0_29 = arith.constant 0 : index
    %29 = vector.load %arg2[%c5, %c0_28, %c0_29] : memref<6x30x224xbf16, #tpu.memory_space<vmem>>, vector<1x30x224xbf16>
    %30 = vector.shape_cast %29 : vector<1x30x224xbf16> to vector<30x224xbf16>
    %cst_30 = arith.constant dense<0.000000e+00> : vector<224x224xf32>
    %31 = tpu.matmul %6, %30, %cst_30 {dimension_numbers = #tpu.dot_dimension_numbers<[1], [0], [0], [1], [0, 0, 1, 1], [], []>} : vector<224x30xbf16>, vector<30x224xbf16>, vector<224x224xf32> -> vector<224x224xf32>
    %32 = arith.addf %28, %31 : vector<224x224xf32>
    %33 = vector.broadcast %0 : vector<1x224xf32> to vector<224x224xf32>
    %34 = arith.addf %32, %33 : vector<224x224xf32>
    %cst_31 = arith.constant 0.000000e+00 : f32
    %35 = vector.broadcast %cst_31 : f32 to vector<224x224xf32>
    %36 = arith.maximumf %34, %35 : vector<224x224xf32>
    %37 = arith.maximumf %21, %36 : vector<224x224xf32>
    %c0_32 = arith.constant 0 : index
    %c1_33 = arith.constant 1 : index
    %c0_34 = arith.constant 0 : index
    %c0_35 = arith.constant 0 : index
    %38 = vector.load %arg1[%c0_32, %c1_33, %c0_34, %c0_35] : memref<1x2x240x30xbf16, #tpu.memory_space<vmem>>, vector<1x1x224x30xbf16>
    %39 = vector.shape_cast %38 : vector<1x1x224x30xbf16> to vector<224x30xbf16>
    %c0_36 = arith.constant 0 : index
    %c0_37 = arith.constant 0 : index
    %c16_38 = arith.constant 16 : index
    %c0_39 = arith.constant 0 : index
    %40 = vector.load %arg1[%c0_36, %c0_37, %c16_38, %c0_39] : memref<1x2x240x30xbf16, #tpu.memory_space<vmem>>, vector<1x1x224x30xbf16>
    %41 = vector.shape_cast %40 : vector<1x1x224x30xbf16> to vector<224x30xbf16>
    %c0_40 = arith.constant 0 : index
    %c1_41 = arith.constant 1 : index
    %c16_42 = arith.constant 16 : index
    %c0_43 = arith.constant 0 : index
    %42 = vector.load %arg1[%c0_40, %c1_41, %c16_42, %c0_43] : memref<1x2x240x30xbf16, #tpu.memory_space<vmem>>, vector<1x1x224x30xbf16>
    %43 = vector.shape_cast %42 : vector<1x1x224x30xbf16> to vector<224x30xbf16>
    %c0_44 = arith.constant 0 : index
    %c0_45 = arith.constant 0 : index
    %c0_46 = arith.constant 0 : index
    %44 = vector.load %arg2[%c0_44, %c0_45, %c0_46] : memref<6x30x224xbf16, #tpu.memory_space<vmem>>, vector<1x30x224xbf16>
    %45 = vector.shape_cast %44 : vector<1x30x224xbf16> to vector<30x224xbf16>
    %cst_47 = arith.constant dense<0.000000e+00> : vector<224x224xf32>
    %46 = tpu.matmul %39, %45, %cst_47 {dimension_numbers = #tpu.dot_dimension_numbers<[1], [0], [0], [1], [0, 0, 1, 1], [], []>} : vector<224x30xbf16>, vector<30x224xbf16>, vector<224x224xf32> -> vector<224x224xf32>
    %c1_48 = arith.constant 1 : index
    %c0_49 = arith.constant 0 : index
    %c0_50 = arith.constant 0 : index
    %47 = vector.load %arg2[%c1_48, %c0_49, %c0_50] : memref<6x30x224xbf16, #tpu.memory_space<vmem>>, vector<1x30x224xbf16>
    %48 = vector.shape_cast %47 : vector<1x30x224xbf16> to vector<30x224xbf16>
    %cst_51 = arith.constant dense<0.000000e+00> : vector<224x224xf32>
    %49 = tpu.matmul %41, %48, %cst_51 {dimension_numbers = #tpu.dot_dimension_numbers<[1], [0], [0], [1], [0, 0, 1, 1], [], []>} : vector<224x30xbf16>, vector<30x224xbf16>, vector<224x224xf32> -> vector<224x224xf32>
    %50 = arith.addf %46, %49 : vector<224x224xf32>
    %c2_52 = arith.constant 2 : index
    %c0_53 = arith.constant 0 : index
    %c0_54 = arith.constant 0 : index
    %51 = vector.load %arg2[%c2_52, %c0_53, %c0_54] : memref<6x30x224xbf16, #tpu.memory_space<vmem>>, vector<1x30x224xbf16>
    %52 = vector.shape_cast %51 : vector<1x30x224xbf16> to vector<30x224xbf16>
    %cst_55 = arith.constant dense<0.000000e+00> : vector<224x224xf32>
    %53 = tpu.matmul %43, %52, %cst_55 {dimension_numbers = #tpu.dot_dimension_numbers<[1], [0], [0], [1], [0, 0, 1, 1], [], []>} : vector<224x30xbf16>, vector<30x224xbf16>, vector<224x224xf32> -> vector<224x224xf32>
    %54 = arith.addf %50, %53 : vector<224x224xf32>
    %55 = vector.broadcast %0 : vector<1x224xf32> to vector<224x224xf32>
    %56 = arith.addf %54, %55 : vector<224x224xf32>
    %cst_56 = arith.constant 0.000000e+00 : f32
    %57 = vector.broadcast %cst_56 : f32 to vector<224x224xf32>
    %58 = arith.maximumf %56, %57 : vector<224x224xf32>
    %59 = arith.maximumf %37, %58 : vector<224x224xf32>
    %c3_57 = arith.constant 3 : index
    %c0_58 = arith.constant 0 : index
    %c0_59 = arith.constant 0 : index
    %60 = vector.load %arg2[%c3_57, %c0_58, %c0_59] : memref<6x30x224xbf16, #tpu.memory_space<vmem>>, vector<1x30x224xbf16>
    %61 = vector.shape_cast %60 : vector<1x30x224xbf16> to vector<30x224xbf16>
    %cst_60 = arith.constant dense<0.000000e+00> : vector<224x224xf32>
    %62 = tpu.matmul %39, %61, %cst_60 {dimension_numbers = #tpu.dot_dimension_numbers<[1], [0], [0], [1], [0, 0, 1, 1], [], []>} : vector<224x30xbf16>, vector<30x224xbf16>, vector<224x224xf32> -> vector<224x224xf32>
    %c4_61 = arith.constant 4 : index
    %c0_62 = arith.constant 0 : index
    %c0_63 = arith.constant 0 : index
    %63 = vector.load %arg2[%c4_61, %c0_62, %c0_63] : memref<6x30x224xbf16, #tpu.memory_space<vmem>>, vector<1x30x224xbf16>
    %64 = vector.shape_cast %63 : vector<1x30x224xbf16> to vector<30x224xbf16>
    %cst_64 = arith.constant dense<0.000000e+00> : vector<224x224xf32>
    %65 = tpu.matmul %41, %64, %cst_64 {dimension_numbers = #tpu.dot_dimension_numbers<[1], [0], [0], [1], [0, 0, 1, 1], [], []>} : vector<224x30xbf16>, vector<30x224xbf16>, vector<224x224xf32> -> vector<224x224xf32>
    %66 = arith.addf %62, %65 : vector<224x224xf32>
    %c5_65 = arith.constant 5 : index
    %c0_66 = arith.constant 0 : index
    %c0_67 = arith.constant 0 : index
    %67 = vector.load %arg2[%c5_65, %c0_66, %c0_67] : memref<6x30x224xbf16, #tpu.memory_space<vmem>>, vector<1x30x224xbf16>
    %68 = vector.shape_cast %67 : vector<1x30x224xbf16> to vector<30x224xbf16>
    %cst_68 = arith.constant dense<0.000000e+00> : vector<224x224xf32>
    %69 = tpu.matmul %43, %68, %cst_68 {dimension_numbers = #tpu.dot_dimension_numbers<[1], [0], [0], [1], [0, 0, 1, 1], [], []>} : vector<224x30xbf16>, vector<30x224xbf16>, vector<224x224xf32> -> vector<224x224xf32>
    %70 = arith.addf %66, %69 : vector<224x224xf32>
    %71 = vector.broadcast %0 : vector<1x224xf32> to vector<224x224xf32>
    %72 = arith.addf %70, %71 : vector<224x224xf32>
    %cst_69 = arith.constant 0.000000e+00 : f32
    %73 = vector.broadcast %cst_69 : f32 to vector<224x224xf32>
    %74 = arith.maximumf %72, %73 : vector<224x224xf32>
    %75 = arith.maximumf %59, %74 : vector<224x224xf32>
    %cst_70 = arith.constant 0.000000e+00 : bf16
    %76 = vector.broadcast %cst_70 : bf16 to vector<16x224xbf16>
    %c0_71 = arith.constant 0 : index
    %c0_72 = arith.constant 0 : index
    %77 = vector.load %arg10[%c0_71, %c0_72] : memref<256x224xbf16, #tpu.memory_space<vmem>>, vector<16x224xbf16>
    tpu.vector_store %arg10[%c0_71, %c0_72], %76 {strides = array<i32>} : memref<256x224xbf16, #tpu.memory_space<vmem>>, vector<16x224xbf16>,
    %c240 = arith.constant 240 : index
    %c0_73 = arith.constant 0 : index
    %78 = vector.load %arg10[%c240, %c0_73] : memref<256x224xbf16, #tpu.memory_space<vmem>>, vector<16x224xbf16>
    tpu.vector_store %arg10[%c240, %c0_73], %76 {strides = array<i32>} : memref<256x224xbf16, #tpu.memory_space<vmem>>, vector<16x224xbf16>,
    %79 = arith.truncf %75 : vector<224x224xf32> to vector<224x224xbf16>
    %c16_74 = arith.constant 16 : index
    %c0_75 = arith.constant 0 : index
    %80 = vector.load %arg10[%c16_74, %c0_75] : memref<256x224xbf16, #tpu.memory_space<vmem>>, vector<224x224xbf16>
    tpu.vector_store %arg10[%c16_74, %c0_75], %79 {strides = array<i32>} : memref<256x224xbf16, #tpu.memory_space<vmem>>, vector<224x224xbf16>,
    %c0_76 = arith.constant 0 : index
    %c0_77 = arith.constant 0 : index
    %81 = vector.load %arg10[%c0_76, %c0_77] : memref<256x224xbf16, #tpu.memory_space<vmem>>, vector<224x224xbf16>
    %c0_78 = arith.constant 0 : index
    %c0_79 = arith.constant 0 : index
    %c0_80 = arith.constant 0 : index
    %82 = vector.load %arg4[%c0_78, %c0_79, %c0_80] : memref<3x224x224xbf16, #tpu.memory_space<vmem>>, vector<1x224x224xbf16>
    %83 = vector.shape_cast %82 : vector<1x224x224xbf16> to vector<224x224xbf16>
    %cst_81 = arith.constant dense<0.000000e+00> : vector<224x224xf32>
    %84 = tpu.matmul %81, %83, %cst_81 {dimension_numbers = #tpu.dot_dimension_numbers<[1], [0], [0], [1], [0, 0, 1, 1], [], []>} : vector<224x224xbf16>, vector<224x224xbf16>, vector<224x224xf32> -> vector<224x224xf32>
    %c16_82 = arith.constant 16 : index
    %c0_83 = arith.constant 0 : index
    %85 = vector.load %arg10[%c16_82, %c0_83] : memref<256x224xbf16, #tpu.memory_space<vmem>>, vector<224x224xbf16>
    %c1_84 = arith.constant 1 : index
    %c0_85 = arith.constant 0 : index
    %c0_86 = arith.constant 0 : index
    %86 = vector.load %arg4[%c1_84, %c0_85, %c0_86] : memref<3x224x224xbf16, #tpu.memory_space<vmem>>, vector<1x224x224xbf16>
    %87 = vector.shape_cast %86 : vector<1x224x224xbf16> to vector<224x224xbf16>
    %cst_87 = arith.constant dense<0.000000e+00> : vector<224x224xf32>
    %88 = tpu.matmul %85, %87, %cst_87 {dimension_numbers = #tpu.dot_dimension_numbers<[1], [0], [0], [1], [0, 0, 1, 1], [], []>} : vector<224x224xbf16>, vector<224x224xbf16>, vector<224x224xf32> -> vector<224x224xf32>
    %89 = arith.addf %84, %88 : vector<224x224xf32>
    %c32 = arith.constant 32 : index
    %c0_88 = arith.constant 0 : index
    %90 = vector.load %arg10[%c32, %c0_88] : memref<256x224xbf16, #tpu.memory_space<vmem>>, vector<224x224xbf16>
    %c2_89 = arith.constant 2 : index
    %c0_90 = arith.constant 0 : index
    %c0_91 = arith.constant 0 : index
    %91 = vector.load %arg4[%c2_89, %c0_90, %c0_91] : memref<3x224x224xbf16, #tpu.memory_space<vmem>>, vector<1x224x224xbf16>
    %92 = vector.shape_cast %91 : vector<1x224x224xbf16> to vector<224x224xbf16>
    %cst_92 = arith.constant dense<0.000000e+00> : vector<224x224xf32>
    %93 = tpu.matmul %90, %92, %cst_92 {dimension_numbers = #tpu.dot_dimension_numbers<[1], [0], [0], [1], [0, 0, 1, 1], [], []>} : vector<224x224xbf16>, vector<224x224xbf16>, vector<224x224xf32> -> vector<224x224xf32>
    %94 = arith.addf %89, %93 : vector<224x224xf32>
    %c0_93 = arith.constant 0 : index
    %c0_94 = arith.constant 0 : index
    %95 = vector.load %arg5[%c0_93, %c0_94] : memref<1x224xf32, #tpu.memory_space<vmem>>, vector<1x224xf32>
    %96 = vector.broadcast %95 : vector<1x224xf32> to vector<224x224xf32>
    %97 = arith.addf %94, %96 : vector<224x224xf32>
    %cst_95 = arith.constant 0.000000e+00 : f32
    %98 = vector.broadcast %cst_95 : f32 to vector<224x224xf32>
    %99 = arith.maximumf %97, %98 : vector<224x224xf32>
    %c0_96 = arith.constant 0 : index
    %c0_97 = arith.constant 0 : index
    %c0_98 = arith.constant 0 : index
    %100 = vector.load %arg8[%c0_96, %c0_97, %c0_98] : memref<1x224x224xf32, #tpu.memory_space<vmem>>, vector<1x224x224xf32>
    %101 = vector.shape_cast %100 : vector<1x224x224xf32> to vector<224x224xf32>
    %102 = vector.shape_cast %99 : vector<224x224xf32> to vector<1x224x224xf32>
    tpu.vector_store %arg8[%c0_96, %c0_97, %c0_98], %102 {strides = array<i32>} : memref<1x224x224xf32, #tpu.memory_space<vmem>>, vector<1x224x224xf32>,
    %103 = arith.truncf %99 : vector<224x224xf32> to vector<224x224xbf16>
    %cst_99 = arith.constant 0.000000e+00 : f32
    %104 = vector.broadcast %cst_99 : f32 to vector<16x14xf32>
    %105 = vector.extract_strided_slice %103 {offsets = [0, 0], sizes = [16, 224], strides = [1, 1]} : vector<224x224xbf16> to vector<16x224xbf16>
    %c0_100 = arith.constant 0 : index
    %c0_101 = arith.constant 0 : index
    %c0_102 = arith.constant 0 : index
    %106 = vector.load %arg6[%c0_100, %c0_101, %c0_102] : memref<14x224x14xbf16, #tpu.memory_space<vmem>>, vector<1x224x14xbf16>
    %107 = vector.shape_cast %106 : vector<1x224x14xbf16> to vector<224x14xbf16>
    %cst_103 = arith.constant dense<0.000000e+00> : vector<16x14xf32>
    %108 = tpu.matmul %105, %107, %cst_103 {dimension_numbers = #tpu.dot_dimension_numbers<[1], [0], [0], [1], [0, 0, 1, 1], [], []>} : vector<16x224xbf16>, vector<224x14xbf16>, vector<16x14xf32> -> vector<16x14xf32>
    %109 = arith.addf %104, %108 : vector<16x14xf32>
    %110 = vector.extract_strided_slice %103 {offsets = [16, 0], sizes = [16, 224], strides = [1, 1]} : vector<224x224xbf16> to vector<16x224xbf16>
    %c1_104 = arith.constant 1 : index
    %c0_105 = arith.constant 0 : index
    %c0_106 = arith.constant 0 : index
    %111 = vector.load %arg6[%c1_104, %c0_105, %c0_106] : memref<14x224x14xbf16, #tpu.memory_space<vmem>>, vector<1x224x14xbf16>
    %112 = vector.shape_cast %111 : vector<1x224x14xbf16> to vector<224x14xbf16>
    %cst_107 = arith.constant dense<0.000000e+00> : vector<16x14xf32>
    %113 = tpu.matmul %110, %112, %cst_107 {dimension_numbers = #tpu.dot_dimension_numbers<[1], [0], [0], [1], [0, 0, 1, 1], [], []>} : vector<16x224xbf16>, vector<224x14xbf16>, vector<16x14xf32> -> vector<16x14xf32>
    %114 = arith.addf %109, %113 : vector<16x14xf32>
    %115 = vector.extract_strided_slice %103 {offsets = [32, 0], sizes = [16, 224], strides = [1, 1]} : vector<224x224xbf16> to vector<16x224xbf16>
    %c2_108 = arith.constant 2 : index
    %c0_109 = arith.constant 0 : index
    %c0_110 = arith.constant 0 : index
    %116 = vector.load %arg6[%c2_108, %c0_109, %c0_110] : memref<14x224x14xbf16, #tpu.memory_space<vmem>>, vector<1x224x14xbf16>
    %117 = vector.shape_cast %116 : vector<1x224x14xbf16> to vector<224x14xbf16>
    %cst_111 = arith.constant dense<0.000000e+00> : vector<16x14xf32>
    %118 = tpu.matmul %115, %117, %cst_111 {dimension_numbers = #tpu.dot_dimension_numbers<[1], [0], [0], [1], [0, 0, 1, 1], [], []>} : vector<16x224xbf16>, vector<224x14xbf16>, vector<16x14xf32> -> vector<16x14xf32>
    %119 = arith.addf %114, %118 : vector<16x14xf32>
    %120 = vector.extract_strided_slice %103 {offsets = [48, 0], sizes = [16, 224], strides = [1, 1]} : vector<224x224xbf16> to vector<16x224xbf16>
    %c3_112 = arith.constant 3 : index
    %c0_113 = arith.constant 0 : index
    %c0_114 = arith.constant 0 : index
    %121 = vector.load %arg6[%c3_112, %c0_113, %c0_114] : memref<14x224x14xbf16, #tpu.memory_space<vmem>>, vector<1x224x14xbf16>
    %122 = vector.shape_cast %121 : vector<1x224x14xbf16> to vector<224x14xbf16>
    %cst_115 = arith.constant dense<0.000000e+00> : vector<16x14xf32>
    %123 = tpu.matmul %120, %122, %cst_115 {dimension_numbers = #tpu.dot_dimension_numbers<[1], [0], [0], [1], [0, 0, 1, 1], [], []>} : vector<16x224xbf16>, vector<224x14xbf16>, vector<16x14xf32> -> vector<16x14xf32>
    %124 = arith.addf %119, %123 : vector<16x14xf32>
    %125 = vector.extract_strided_slice %103 {offsets = [64, 0], sizes = [16, 224], strides = [1, 1]} : vector<224x224xbf16> to vector<16x224xbf16>
    %c4_116 = arith.constant 4 : index
    %c0_117 = arith.constant 0 : index
    %c0_118 = arith.constant 0 : index
    %126 = vector.load %arg6[%c4_116, %c0_117, %c0_118] : memref<14x224x14xbf16, #tpu.memory_space<vmem>>, vector<1x224x14xbf16>
    %127 = vector.shape_cast %126 : vector<1x224x14xbf16> to vector<224x14xbf16>
    %cst_119 = arith.constant dense<0.000000e+00> : vector<16x14xf32>
    %128 = tpu.matmul %125, %127, %cst_119 {dimension_numbers = #tpu.dot_dimension_numbers<[1], [0], [0], [1], [0, 0, 1, 1], [], []>} : vector<16x224xbf16>, vector<224x14xbf16>, vector<16x14xf32> -> vector<16x14xf32>
    %129 = arith.addf %124, %128 : vector<16x14xf32>
    %130 = vector.extract_strided_slice %103 {offsets = [80, 0], sizes = [16, 224], strides = [1, 1]} : vector<224x224xbf16> to vector<16x224xbf16>
    %c5_120 = arith.constant 5 : index
    %c0_121 = arith.constant 0 : index
    %c0_122 = arith.constant 0 : index
    %131 = vector.load %arg6[%c5_120, %c0_121, %c0_122] : memref<14x224x14xbf16, #tpu.memory_space<vmem>>, vector<1x224x14xbf16>
    %132 = vector.shape_cast %131 : vector<1x224x14xbf16> to vector<224x14xbf16>
    %cst_123 = arith.constant dense<0.000000e+00> : vector<16x14xf32>
    %133 = tpu.matmul %130, %132, %cst_123 {dimension_numbers = #tpu.dot_dimension_numbers<[1], [0], [0], [1], [0, 0, 1, 1], [], []>} : vector<16x224xbf16>, vector<224x14xbf16>, vector<16x14xf32> -> vector<16x14xf32>
    %134 = arith.addf %129, %133 : vector<16x14xf32>
    %135 = vector.extract_strided_slice %103 {offsets = [96, 0], sizes = [16, 224], strides = [1, 1]} : vector<224x224xbf16> to vector<16x224xbf16>
    %c6 = arith.constant 6 : index
    %c0_124 = arith.constant 0 : index
    %c0_125 = arith.constant 0 : index
    %136 = vector.load %arg6[%c6, %c0_124, %c0_125] : memref<14x224x14xbf16, #tpu.memory_space<vmem>>, vector<1x224x14xbf16>
    %137 = vector.shape_cast %136 : vector<1x224x14xbf16> to vector<224x14xbf16>
    %cst_126 = arith.constant dense<0.000000e+00> : vector<16x14xf32>
    %138 = tpu.matmul %135, %137, %cst_126 {dimension_numbers = #tpu.dot_dimension_numbers<[1], [0], [0], [1], [0, 0, 1, 1], [], []>} : vector<16x224xbf16>, vector<224x14xbf16>, vector<16x14xf32> -> vector<16x14xf32>
    %139 = arith.addf %134, %138 : vector<16x14xf32>
    %140 = vector.extract_strided_slice %103 {offsets = [112, 0], sizes = [16, 224], strides = [1, 1]} : vector<224x224xbf16> to vector<16x224xbf16>
    %c7 = arith.constant 7 : index
    %c0_127 = arith.constant 0 : index
    %c0_128 = arith.constant 0 : index
    %141 = vector.load %arg6[%c7, %c0_127, %c0_128] : memref<14x224x14xbf16, #tpu.memory_space<vmem>>, vector<1x224x14xbf16>
    %142 = vector.shape_cast %141 : vector<1x224x14xbf16> to vector<224x14xbf16>
    %cst_129 = arith.constant dense<0.000000e+00> : vector<16x14xf32>
    %143 = tpu.matmul %140, %142, %cst_129 {dimension_numbers = #tpu.dot_dimension_numbers<[1], [0], [0], [1], [0, 0, 1, 1], [], []>} : vector<16x224xbf16>, vector<224x14xbf16>, vector<16x14xf32> -> vector<16x14xf32>
    %144 = arith.addf %139, %143 : vector<16x14xf32>
    %145 = vector.extract_strided_slice %103 {offsets = [128, 0], sizes = [16, 224], strides = [1, 1]} : vector<224x224xbf16> to vector<16x224xbf16>
    %c8 = arith.constant 8 : index
    %c0_130 = arith.constant 0 : index
    %c0_131 = arith.constant 0 : index
    %146 = vector.load %arg6[%c8, %c0_130, %c0_131] : memref<14x224x14xbf16, #tpu.memory_space<vmem>>, vector<1x224x14xbf16>
    %147 = vector.shape_cast %146 : vector<1x224x14xbf16> to vector<224x14xbf16>
    %cst_132 = arith.constant dense<0.000000e+00> : vector<16x14xf32>
    %148 = tpu.matmul %145, %147, %cst_132 {dimension_numbers = #tpu.dot_dimension_numbers<[1], [0], [0], [1], [0, 0, 1, 1], [], []>} : vector<16x224xbf16>, vector<224x14xbf16>, vector<16x14xf32> -> vector<16x14xf32>
    %149 = arith.addf %144, %148 : vector<16x14xf32>
    %150 = vector.extract_strided_slice %103 {offsets = [144, 0], sizes = [16, 224], strides = [1, 1]} : vector<224x224xbf16> to vector<16x224xbf16>
    %c9 = arith.constant 9 : index
    %c0_133 = arith.constant 0 : index
    %c0_134 = arith.constant 0 : index
    %151 = vector.load %arg6[%c9, %c0_133, %c0_134] : memref<14x224x14xbf16, #tpu.memory_space<vmem>>, vector<1x224x14xbf16>
    %152 = vector.shape_cast %151 : vector<1x224x14xbf16> to vector<224x14xbf16>
    %cst_135 = arith.constant dense<0.000000e+00> : vector<16x14xf32>
    %153 = tpu.matmul %150, %152, %cst_135 {dimension_numbers = #tpu.dot_dimension_numbers<[1], [0], [0], [1], [0, 0, 1, 1], [], []>} : vector<16x224xbf16>, vector<224x14xbf16>, vector<16x14xf32> -> vector<16x14xf32>
    %154 = arith.addf %149, %153 : vector<16x14xf32>
    %155 = vector.extract_strided_slice %103 {offsets = [160, 0], sizes = [16, 224], strides = [1, 1]} : vector<224x224xbf16> to vector<16x224xbf16>
    %c10 = arith.constant 10 : index
    %c0_136 = arith.constant 0 : index
    %c0_137 = arith.constant 0 : index
    %156 = vector.load %arg6[%c10, %c0_136, %c0_137] : memref<14x224x14xbf16, #tpu.memory_space<vmem>>, vector<1x224x14xbf16>
    %157 = vector.shape_cast %156 : vector<1x224x14xbf16> to vector<224x14xbf16>
    %cst_138 = arith.constant dense<0.000000e+00> : vector<16x14xf32>
    %158 = tpu.matmul %155, %157, %cst_138 {dimension_numbers = #tpu.dot_dimension_numbers<[1], [0], [0], [1], [0, 0, 1, 1], [], []>} : vector<16x224xbf16>, vector<224x14xbf16>, vector<16x14xf32> -> vector<16x14xf32>
    %159 = arith.addf %154, %158 : vector<16x14xf32>
    %160 = vector.extract_strided_slice %103 {offsets = [176, 0], sizes = [16, 224], strides = [1, 1]} : vector<224x224xbf16> to vector<16x224xbf16>
    %c11 = arith.constant 11 : index
    %c0_139 = arith.constant 0 : index
    %c0_140 = arith.constant 0 : index
    %161 = vector.load %arg6[%c11, %c0_139, %c0_140] : memref<14x224x14xbf16, #tpu.memory_space<vmem>>, vector<1x224x14xbf16>
    %162 = vector.shape_cast %161 : vector<1x224x14xbf16> to vector<224x14xbf16>
    %cst_141 = arith.constant dense<0.000000e+00> : vector<16x14xf32>
    %163 = tpu.matmul %160, %162, %cst_141 {dimension_numbers = #tpu.dot_dimension_numbers<[1], [0], [0], [1], [0, 0, 1, 1], [], []>} : vector<16x224xbf16>, vector<224x14xbf16>, vector<16x14xf32> -> vector<16x14xf32>
    %164 = arith.addf %159, %163 : vector<16x14xf32>
    %165 = vector.extract_strided_slice %103 {offsets = [192, 0], sizes = [16, 224], strides = [1, 1]} : vector<224x224xbf16> to vector<16x224xbf16>
    %c12 = arith.constant 12 : index
    %c0_142 = arith.constant 0 : index
    %c0_143 = arith.constant 0 : index
    %166 = vector.load %arg6[%c12, %c0_142, %c0_143] : memref<14x224x14xbf16, #tpu.memory_space<vmem>>, vector<1x224x14xbf16>
    %167 = vector.shape_cast %166 : vector<1x224x14xbf16> to vector<224x14xbf16>
    %cst_144 = arith.constant dense<0.000000e+00> : vector<16x14xf32>
    %168 = tpu.matmul %165, %167, %cst_144 {dimension_numbers = #tpu.dot_dimension_numbers<[1], [0], [0], [1], [0, 0, 1, 1], [], []>} : vector<16x224xbf16>, vector<224x14xbf16>, vector<16x14xf32> -> vector<16x14xf32>
    %169 = arith.addf %164, %168 : vector<16x14xf32>
    %170 = vector.extract_strided_slice %103 {offsets = [208, 0], sizes = [16, 224], strides = [1, 1]} : vector<224x224xbf16> to vector<16x224xbf16>
    %c13 = arith.constant 13 : index
    %c0_145 = arith.constant 0 : index
    %c0_146 = arith.constant 0 : index
    %171 = vector.load %arg6[%c13, %c0_145, %c0_146] : memref<14x224x14xbf16, #tpu.memory_space<vmem>>, vector<1x224x14xbf16>
    %172 = vector.shape_cast %171 : vector<1x224x14xbf16> to vector<224x14xbf16>
    %cst_147 = arith.constant dense<0.000000e+00> : vector<16x14xf32>
    %173 = tpu.matmul %170, %172, %cst_147 {dimension_numbers = #tpu.dot_dimension_numbers<[1], [0], [0], [1], [0, 0, 1, 1], [], []>} : vector<16x224xbf16>, vector<224x14xbf16>, vector<16x14xf32> -> vector<16x14xf32>
    %174 = arith.addf %169, %173 : vector<16x14xf32>
    %c0_148 = arith.constant 0 : index
    %c0_149 = arith.constant 0 : index
    %175 = vector.load %arg7[%c0_148, %c0_149] : memref<1x14xf32, #tpu.memory_space<vmem>>, vector<1x14xf32>
    %176 = vector.broadcast %175 : vector<1x14xf32> to vector<16x14xf32>
    %177 = arith.addf %174, %176 : vector<16x14xf32>
    %c0_150 = arith.constant 0 : index
    %c0_151 = arith.constant 0 : index
    %178 = vector.load %arg9[%c0_150, %c0_151] : memref<16x14xf32, #tpu.memory_space<vmem>>, vector<16x14xf32>
    tpu.vector_store %arg9[%c0_150, %c0_151], %177 {strides = array<i32>} : memref<16x14xf32, #tpu.memory_space<vmem>>, vector<16x14xf32>,
    return
  }
  func.func @transform_0(%arg0: i32) -> (i32, i32, i32, i32) {
    %c0_i32 = arith.constant 0 : i32
    %c0_i32_0 = arith.constant 0 : i32
    %c0_i32_1 = arith.constant 0 : i32
    %c0_i32_2 = arith.constant 0 : i32
    return %arg0, %c0_i32, %c0_i32_0, %c0_i32_1 : i32, i32, i32, i32
  }
  func.func @transform_1(%arg0: i32) -> (i32, i32, i32) {
    %c0_i32 = arith.constant 0 : i32
    %c0_i32_0 = arith.constant 0 : i32
    %c0_i32_1 = arith.constant 0 : i32
    %c0_i32_2 = arith.constant 0 : i32
    return %c0_i32, %c0_i32_0, %c0_i32_1 : i32, i32, i32
  }
  func.func @transform_2(%arg0: i32) -> (i32, i32) {
    %c0_i32 = arith.constant 0 : i32
    %c0_i32_0 = arith.constant 0 : i32
    %c0_i32_1 = arith.constant 0 : i32
    return %c0_i32, %c0_i32_0 : i32, i32
  }
  func.func @transform_3(%arg0: i32) -> (i32, i32, i32) {
    %c0_i32 = arith.constant 0 : i32
    %c0_i32_0 = arith.constant 0 : i32
    %c0_i32_1 = arith.constant 0 : i32
    %c0_i32_2 = arith.constant 0 : i32
    return %c0_i32, %c0_i32_0, %c0_i32_1 : i32, i32, i32
  }
  func.func @transform_4(%arg0: i32) -> (i32, i32) {
    %c0_i32 = arith.constant 0 : i32
    %c0_i32_0 = arith.constant 0 : i32
    %c0_i32_1 = arith.constant 0 : i32
    return %c0_i32, %c0_i32_0 : i32, i32
  }
  func.func @transform_5(%arg0: i32) -> (i32, i32, i32) {
    %c0_i32 = arith.constant 0 : i32
    %c0_i32_0 = arith.constant 0 : i32
    %c0_i32_1 = arith.constant 0 : i32
    %c0_i32_2 = arith.constant 0 : i32
    return %c0_i32, %c0_i32_0, %c0_i32_1 : i32, i32, i32
  }
  func.func @transform_6(%arg0: i32) -> (i32, i32) {
    %c0_i32 = arith.constant 0 : i32
    %c0_i32_0 = arith.constant 0 : i32
    %c0_i32_1 = arith.constant 0 : i32
    return %c0_i32, %c0_i32_0 : i32, i32
  }
  func.func @transform_7(%arg0: i32) -> (i32, i32, i32) {
    %c0_i32 = arith.constant 0 : i32
    %c0_i32_0 = arith.constant 0 : i32
    %c0_i32_1 = arith.constant 0 : i32
    return %arg0, %c0_i32, %c0_i32_0 : i32, i32, i32
  }
  func.func @transform_8(%arg0: i32) -> (i32, i32) {
    %c0_i32 = arith.constant 0 : i32
    %c0_i32_0 = arith.constant 0 : i32
    return %arg0, %c0_i32 : i32, i32
  }
}

</mosaic_0001>

<bundles_post_ra>
// kernel: emnist_forward.1
= control target key start
LH: loop header
LB: loop body
LE: loop exit
PB: predicated region body
PF: predicated region fallthrough
CT: control target
= control target key end

     0   :  { %14 = vsyncpa [#allocation4], 0  ;;  %s12457_s0 = inlined_call_operand.vmem [shape: bf16[2,2,240,30], index: 0, kind: input, shape index: {}]   ;;  %s12458_s1 = inlined_call_operand.hbm [shape: bf16[6,30,224], index: 1, kind: input, shape index: {}]   ;;  %s12459_s2 = inlined_call_operand.hbm [shape: f32[1,224], index: 2, kind: input, shape index: {}]   ;;  %s12460_s3 = inlined_call_operand.hbm [shape: bf16[3,224,224], index: 3, kind: input, shape index: {}]   ;;  %s12461_s4 = inlined_call_operand.hbm [shape: f32[1,224], index: 4, kind: input, shape index: {}]   ;;  %s12462_s5 = inlined_call_operand.vmem [shape: bf16[14,224,14], index: 5, kind: input, shape index: {}]   ;;  %s12463_s6 = inlined_call_operand.hbm [shape: f32[1,14], index: 6, kind: input, shape index: {}]   ;;  %s12464_s7 = inlined_call_operand.vmem [shape: f32[2,224,224], index: 7, kind: output, shape index: {0}]   ;;  %s12465_s8 = inlined_call_operand.vmem [shape: f32[32,14], index: 8, kind: output, shape index: {1}]  }
   0x1   :  { %15 = vsyncpa [#allocation6], 0 }
   0x2   :  { %16 = vsyncpa [#allocation9], 0  ;;  %s10090_s27 = smov 0  }
   0x3 LB: > { %s10037_s28 = smov [#allocation5]   ;;  %s10096_s30 = sadd.s32 4294967295, %s10035_s27   ;;  %s10035_s27 = sphi %s10090_s27, %s22_s27  }
   0x4   : > { %s257_s29 = sshll.u32 %s10037_s28, 4  ;;  %p7791_p0 = scmp.ge.s32.totalorder %s10035_s27, 1  ;;  %s10101_s29 = int_to_ptr.vmem [resolvable:$true] %s257_s29 }
   0x5   : > { %p231_p1 = scmp.lt.s32.totalorder %s10035_s27, 3  ;;  %p12466_p2 = scmp.eq.s32.totalorder %s10096_s30, 0 }
   0x6   : > { %s10038_s10 = smov [#allocation8]   ;;  %s10039_s12 = smov [#allocation3]  }
   0x7   : > { %p10103_p3 = pnand %p7791_p0, %p231_p1  ;;  %s281_s11 = sshll.u32 %s10038_s10, 4  ;;  %s10109_s11 = int_to_ptr.vmem [resolvable:$true] %s281_s11 }
   0x8   : > { %s243_s13 = sshll.u32 %s10039_s12, 4  ;;  %s10040_s15 = smov [#allocation7]   ;;  %s10117_s13 = int_to_ptr.vmem [resolvable:$true] %s243_s13 }
   0x9   : > { %s12472_s9 = scalar_select %p10103_p3, 1, 0 }
   0xa   : > { %p9396_p4 = pneg %p10103_p3  ;;  %s10119_s16 = sshll.u32 %s10040_s15, 4  ;;  %s268_s16 = int_to_ptr.vmem [resolvable:$true] %s10119_s16 }
   0xb   : > { %s9877_s19 = scalar_lea.hbm %s12459_s2, 32 }
   0xc   : > { %p10113_p5 = pnand %p12466_p2, %p9396_p4  ;;  %p9878_p6 = scmp.ne.s32.totalorder %s12459_s2, %s9877_s19 }
   0xd   : > { %p9884_p10 = scmp.lt.u32.totalorder %s9877_s19, %s12459_s2 }
   0xe   : > { %p10129_p7 = pneg %p10113_p5 }
  0x10   : > { %p9880_p8 = pnand %p10129_p7, %p9878_p6 }
  0x12   : > { %p9881_p9 = pneg %p9880_p8 }
  0x14   : > { %p9886_p11 = pnand %p9884_p10, %p9881_p9 }
  0x16   : > { %9889 = shalt.err (!%p9886_p11)
}
  0x17   : > { %s9890_s25 = scalar_lea.vmem %s10101_s29, 32  ;;  %p9898_p1 = scmp.lt.s32.totalorder %s10101_s29, %s10101_s29 }
  0x18   : > { %p9891_p12 = scmp.ne.s32.totalorder %s10101_s29, %s9890_s25  ;;  %p9899_p4 = scmp.lt.s32.totalorder %s9890_s25, %s9890_s25 }
  0x1a   : > { %p9893_p13 = pnand %p9891_p12, %p10129_p7  ;;  %p9900_p6 = por %p9899_p4, %p9898_p1 }
  0x1c   : > { %p9894_p0 = pneg %p9893_p13 }
  0x1e   : > { %p9901_p8 = pnand %p9900_p6, %p9894_p0 }
  0x20   : > { %9904 = shalt.err (!%p9901_p8)
}
  0x21   : > { %9402 = dma.hbm_to_vmem [thread:$0]  (!%p10113_p5), %s12459_s2, 32, %s10101_s29, [#allocation6]  }
  0x22   : > { %s9905_s15 = scalar_lea.hbm %s12461_s4, 32 }
  0x23   : > { %p9906_p9 = scmp.ne.s32.totalorder %s12461_s4, %s9905_s15  ;;  %p9912_p12 = scmp.lt.u32.totalorder %s9905_s15, %s12461_s4 }
  0x25   : > { %p9908_p10 = pnand %p9906_p9, %p10129_p7 }
  0x27   : > { %p9909_p11 = pneg %p9908_p10 }
  0x29   : > { %p9914_p13 = pnand %p9912_p12, %p9909_p11 }
  0x2b   : > { %9917 = shalt.err (!%p9914_p13)
}
  0x2c   : > { %s9918_s29 = scalar_lea.vmem %s10109_s11, 32  ;;  %p9926_p6 = scmp.lt.s32.totalorder %s10109_s11, %s10109_s11 }
  0x2d   : > { %p9919_p0 = scmp.ne.s32.totalorder %s10109_s11, %s9918_s29  ;;  %p9927_p8 = scmp.lt.s32.totalorder %s9918_s29, %s9918_s29 }
  0x2f   : > { %p9921_p1 = pnand %p9919_p0, %p10129_p7  ;;  %p9928_p9 = por %p9927_p8, %p9926_p6 }
  0x31   : > { %p9922_p4 = pneg %p9921_p1 }
  0x33   : > { %p9929_p10 = pnand %p9928_p9, %p9922_p4 }
  0x35   : > { %9932 = shalt.err (!%p9929_p10)
}
  0x36   : > { %9408 = dma.hbm_to_vmem [thread:$0]  (!%p10113_p5), %s12461_s4, 32, %s10109_s11, [#allocation9]  }
  0x37   : > { %s9933_s26 = scalar_lea.hbm %s12458_s1, 3072 }
  0x38   : > { %p9934_p11 = scmp.ne.s32.totalorder %s12458_s1, %s9933_s26  ;;  %p9940_p0 = scmp.lt.u32.totalorder %s9933_s26, %s12458_s1 }
  0x3a   : > { %p9936_p12 = pnand %p9934_p11, %p10129_p7 }
  0x3c   : > { %p9937_p13 = pneg %p9936_p12 }
  0x3e   : > { %p9942_p1 = pnand %p9940_p0, %p9937_p13 }
  0x40   : > { %9945 = shalt.err (!%p9942_p1)
}
  0x41   : > { %s9946_s11 = scalar_lea.vmem %s10117_s13, 3072  ;;  %p9954_p9 = scmp.lt.s32.totalorder %s10117_s13, %s10117_s13 }
  0x42   : > { %p9947_p4 = scmp.ne.s32.totalorder %s10117_s13, %s9946_s11  ;;  %p9955_p10 = scmp.lt.s32.totalorder %s9946_s11, %s9946_s11 }
  0x44   : > { %p9949_p6 = pnand %p9947_p4, %p10129_p7  ;;  %p9956_p11 = por %p9955_p10, %p9954_p9 }
  0x46   : > { %p9950_p8 = pneg %p9949_p6 }
  0x48   : > { %p9957_p12 = pnand %p9956_p11, %p9950_p8 }
  0x4a   : > { %9960 = shalt.err (!%p9957_p12)
}
  0x4b   : > { %s10041_s17 = smov 128   ;;  %s10042_s18 = smov 8  }
  0x4c   : > { %9399 = dma.hbm_to_vmem [thread:$0]  (!%p10113_p5), %s12458_s1, 3072, %s10117_s13, [#allocation4], %s10041_s17, %s10041_s17, %s10042_s18  }
  0x4d   : > { %s9961_s23 = scalar_lea.hbm %s12460_s3, 10752 }
  0x4e   : > { %p9962_p13 = scmp.ne.s32.totalorder %s12460_s3, %s9961_s23  ;;  %p9968_p4 = scmp.lt.u32.totalorder %s9961_s23, %s12460_s3 }
  0x50   : > { %p9964_p0 = pnand %p9962_p13, %p10129_p7 }
  0x52   : > { %p9965_p1 = pneg %p9964_p0 }
  0x54   : > { %p9970_p6 = pnand %p9968_p4, %p9965_p1 }
  0x56   : > { %9973 = shalt.err (!%p9970_p6)
}
  0x57   : > { %s9974_s10 = scalar_lea.vmem %s268_s16, 10752  ;;  %p9982_p11 = scmp.lt.s32.totalorder %s268_s16, %s268_s16 }
  0x58   : > { %p9975_p8 = scmp.ne.s32.totalorder %s268_s16, %s9974_s10  ;;  %p9983_p12 = scmp.lt.s32.totalorder %s9974_s10, %s9974_s10 }
  0x5a   : > { %p9977_p9 = pnand %p9975_p8, %p10129_p7  ;;  %p9984_p2 = por %p9983_p12, %p9982_p11 }
  0x5c   : > { %p9978_p10 = pneg %p9977_p9 }
  0x5e   : > { %p9985_p3 = pnand %p9984_p2, %p9978_p10 }
  0x60   : > { %9988 = shalt.err (!%p9985_p3)
}
  0x61   : > { %9405 = dma.hbm_to_vmem [thread:$0]  (!%p10113_p5), %s12460_s3, 10752, %s268_s16, [#allocation6], %s10041_s17, %s10041_s17, %s10042_s18  }
  0x62   : > { %s10043_s15 = smov [#allocation10]   ;;  %s9989_s29 = scalar_lea.hbm %s12463_s6, 16 }
  0x63   : > { %s295_s11 = sshll.u32 %s10043_s15, 4  ;;  %p9990_p13 = scmp.ne.s32.totalorder %s12463_s6, %s9989_s29  ;;  %s296_s11 = int_to_ptr.vmem [resolvable:$true] %s295_s11 }
  0x64   : > { %p9996_p0 = scmp.lt.u32.totalorder %s9989_s29, %s12463_s6 }
  0x65   : > { %p9992_p2 = pnand %p9990_p13, %p10129_p7 }
  0x67   : > { %p9993_p3 = pneg %p9992_p2 }
  0x69   : > { %p9998_p1 = pnand %p9996_p0, %p9993_p3 }
  0x6b   : > { %10001 = shalt.err (!%p9998_p1)
}
  0x6c   : > { %s10002_s16 = scalar_lea.vmem %s296_s11, 16  ;;  %s10009_s17 = scalar_lea.vmem %s296_s11, 32 }
  0x6d   : > { %p10003_p4 = scmp.ne.s32.totalorder %s296_s11, %s10002_s16  ;;  %p10010_p9 = scmp.lt.s32.totalorder %s296_s11, %s296_s11 }
  0x6e   : > { %p10011_p10 = scmp.lt.s32.totalorder %s10009_s17, %s10002_s16 }
  0x6f   : > { %p10005_p6 = pnand %p10003_p4, %p10129_p7 }
  0x70   : > { %p10012_p11 = por %p10011_p10, %p10010_p9 }
  0x71   : > { %p10006_p8 = pneg %p10005_p6 }
  0x73   : > { %p10013_p12 = pnand %p10012_p11, %p10006_p8 }
  0x75   : > { %10016 = shalt.err (!%p10013_p12)
}
  0x76   : > { %9411 = dma.hbm_to_vmem [thread:$0]  (!%p10113_p5), %s12463_s6, 16, %s296_s11, [#allocation9]  }
  0x77   : > { %p12475_p13 = scmp.ne.s32.totalorder %s12472_s9, 0 }
  0x79   : > { %316 = sbr.rel (%p12475_p13) target bundleno = 2119 (0x847), region = 48 }
  0x80   : > { %p12476_p2 = scmp.eq.s32.totalorder %s10096_s30, 0 }
  0x82   : > { %10022 = dma.done.wait (%p12476_p2), [#allocation4], 3072   ;;  %p12477_p7 = pmov %p12476_p2 }
  0x83   : > { %p12478_p3 = pmov %p12476_p2 }
  0x84   : > { %10024 = vsyncadd (%p12477_p7), [#allocation4], 4294964224 }
  0x85   : > { %10026 = dma.done.wait (%p12478_p3), [#allocation6], 10784   ;;  %p12479_p0 = pmov %p12476_p2 }
  0x87   : > { %10028 = vsyncadd (%p12479_p0), [#allocation6], 4294956512  ;;  %p12480_p1 = pmov %p12479_p0 }
  0x88   : > { %p12481_p5 = pmov %p12479_p0 }
  0x89   : > { %10030 = dma.done.wait (%p12480_p1), [#allocation9], 48  }
  0x8a   : > { %10032 = vsyncadd (%p12481_p5), [#allocation9], 4294967248  ;;  %p371_p4 = scmp.lt.s32.totalorder %s10096_s30, 1  ;;  %v10044_v0 = vmov 0   ;;  %v10255_v1 = vld [vmem:[#allocation3 + $0x24] ss:$8 sps:$4 sm:$0xff]  }
  0x8b   : > { %627 = vmatprep.mubr.bf16.mxu0 %v10044_v0  ;;  %3922 = vst [vmem:[#allocation2] sm:$0xff] %v10044_v0  ;;  %1532 = vmatprep.mubr.bf16.mxu1 %v10044_v0  ;;  %v10257_v2 = vld [vmem:[#allocation3 + $0x84] ss:$8 sps:$4 sm:$0xff]   ;;  %v9442_v3 = vld [vmem:[#allocation3 + $0x20] ss:$8 sps:$4 sm:$0xff]   ;;  %vm588_vm0 = vcmask 1046528  }
  0x8c   : > { %s10252_s9 = scalar_select %p371_p4, %s10096_s30, 1  ;;  %595 = vmatprep.subr.bf16.mxu0 %v10255_v1  ;;  %v9443_v4 = vld [vmem:[#allocation3 + $0x80] ss:$8 sps:$4 sm:$0xff]   ;;  %1500 = vmatprep.subr.bf16.mxu1 %v10257_v2  ;;  %v9444_v5 = vld [vmem:[#allocation3 + $0x34] ss:$8 sps:$4 sm:$0x7f]  }
  0x8d   : > { %596 = vmatpush1.bf16.msra.mxu0 %v9442_v3  ;;  %1501 = vmatpush1.bf16.msra.mxu1 %v9443_v4  ;;  %v9446_v6 = vld [vmem:[#allocation3 + $0x94] ss:$8 sps:$4 sm:$0x7f]   ;;  %v9448_v7 = vld [vmem:[#allocation3 + $0x30] ss:$8 sps:$4 sm:$0x7f]  }
  0x8e   : > { %s9374_s14 = smul.u32 240, %s10252_s9  ;;  %7854 = vmatprep.subr.msk.bf16.mxu0 %vm588_vm0, %v9444_v5  ;;  %v9449_v8 = vld [vmem:[#allocation3 + $0x90] ss:$8 sps:$4 sm:$0x7f]   ;;  %7926 = vmatprep.subr.msk.bf16.mxu1 %vm588_vm0, %v9446_v6  ;;  %v10270_v10 = vsel %vm588_vm0, %v9448_v7, 0  ;;  %vm545_vm1 = vcmask 244736  }
  0x8f   : > { %v10273_v11 = vsel %vm588_vm0, %v9449_v8, 0  ;;  %v9451_v12 = vld [vmem:[#allocation3] ss:$8 sps:$4 sm:$0xff]   ;;  %v9453_v13 = vld [vmem:[#allocation3 + $0x4] ss:$8 sps:$4 sm:$0xff]   ;;  %vm3923_vm2 = vcmask 785408  }
  0x90   : > { %s10263_s10 = scalar_lea.vmem %s12457_s0, %s9374_s14  ;;  %v9454_v14 = vld [vmem:[#allocation3 + $0x60] ss:$8 sps:$4 sm:$0xff]   ;;  %v9456_v15 = vld [vmem:[#allocation3 + $0x64] ss:$8 sps:$4 sm:$0xff]   ;;  %vm7647_vm3 = vcmask 113664  }
  0x91   : > { %v9450_v9 = vld [vmem:[%s10263_s10 + $0x78] sm:$0xff]   ;;  %598 = vmatpush1.bf16.msra.mxu0 %v10270_v10  ;;  %1503 = vmatpush1.bf16.msra.mxu1 %v10273_v11  ;;  %v9457_v16 = vld [vmem:[%s10263_s10 + $0x80] sm:$0xff]   ;;  %v9458_v23 = vld [vmem:[%s10263_s10 + $0x88] sm:$0xff]  }
  0x92   : > { %904 = vmatprep.subr.bf16.mxu0 %v9453_v13  ;;  %1697 = vmatprep.subr.bf16.mxu1 %v9456_v15  ;;  %v9464_v17 = vld [vmem:[#allocation3 + $0x14] ss:$8 sps:$4 sm:$0x7f]   ;;  %v9466_v18 = vld [vmem:[#allocation3 + $0x10] ss:$8 sps:$4 sm:$0x7f]  }
  0x93   : > { %v9467_v19 = vld [vmem:[#allocation3 + $0x74] ss:$8 sps:$4 sm:$0x7f]   ;;  %v10285_v20 = vsel %vm588_vm0, %v9466_v18, 0  ;;  %v9479_v24 = vld [vmem:[#allocation3 + $0x44] ss:$8 sps:$4 sm:$0xff]  }
  0x94   : > { %7855 = vmatmul.mubr.msk.bf16.vlgmr.msra.gmra.mrb[0].mxu0 %vm545_vm1, %v9450_v9  ;;  %7927 = vmatmul.mubr.msk.bf16.vlgmr.msra.gmra.mrb[0].mxu1 %vm545_vm1, %v9450_v9  ;;  %v9469_v21 = vld [vmem:[#allocation3 + $0x70] ss:$8 sps:$4 sm:$0x7f]   ;;  %v9482_v25 = vld [vmem:[#allocation3 + $0xa4] ss:$8 sps:$4 sm:$0xff]   ;;  %v1344_v9 = vlaneseq }
  0x95   : > { %905 = vmatpush1.bf16.msra.mxu0 %v9451_v12  ;;  %1698 = vmatpush1.bf16.msra.mxu1 %v9454_v14  ;;  %v10292_v22 = vsel %vm588_vm0, %v9469_v21, 0  ;;  %v9459_v26 = vld [vmem:[%s10263_s10 + $0x90] sm:$0xff]   ;;  %v9460_v27 = vld [vmem:[%s10263_s10 + $0x98] sm:$0xff]   ;;  %v9461_v28 = vld [vmem:[%s10263_s10 + $0xa0] sm:$0xff]  }
  0x96   : > { %637 = vmatprep.mubr.bf16.mxu0 %v10044_v0  ;;  %1542 = vmatprep.mubr.bf16.mxu1 %v10044_v0  ;;  %v9462_v29 = vld [vmem:[%s10263_s10 + $0xa8] sm:$0xff]   ;;  %v9463_v30 = vld [vmem:[%s10263_s10 + $0xb0] sm:$0xff]   ;;  %v9470_v31 = vld [vmem:[%s10263_s10 + $0xb8] sm:$0xff]  }
  0x97   : > { %7887 = vmatprep.subr.msk.bf16.mxu0 %vm588_vm0, %v9464_v17  ;;  %7945 = vmatprep.subr.msk.bf16.mxu1 %vm588_vm0, %v9467_v19  ;;  %v9471_v32 = vld [vmem:[%s10263_s10 + $0xc0] sm:$0xff]   ;;  %v9472_v33 = vld [vmem:[%s10263_s10 + $0xc8] sm:$0xff]   ;;  %v9492_v34 = vld [vmem:[#allocation3 + $0x50] ss:$8 sps:$4 sm:$0x7f]  }
  0x98   : > { %v9495_v35 = vld [vmem:[#allocation3 + $0xb0] ss:$8 sps:$4 sm:$0x7f]   ;;  %v10342_v36 = vsel %vm588_vm0, %v9492_v34, 0  ;;  %v9475_v40 = vld [vmem:[%s10263_s10 + $0xe0] sm:$0xff]   ;;  %v10368_v46 = vld [vmem:[%s10263_s10 + $0x8] sm:$0xff]  }
  0x99   : > { %907 = vmatpush1.bf16.msra.mxu0 %v10285_v20  ;;  %1700 = vmatpush1.bf16.msra.mxu1 %v10292_v22  ;;  %v10345_v37 = vsel %vm588_vm0, %v9495_v35, 0  ;;  %v9473_v38 = vld [vmem:[%s10263_s10 + $0xd0] sm:$0xff]   ;;  %v9474_v39 = vld [vmem:[%s10263_s10 + $0xd8] sm:$0xff]   ;;  %v9476_v41 = vld [vmem:[%s10263_s10] sm:$0xff]  }
  0x9a   : > { %1114 = vmatprep.subr.bf16.mxu0 %v9479_v24  ;;  %1899 = vmatprep.subr.bf16.mxu1 %v9482_v25  ;;  %v9477_v42 = vld [vmem:[#allocation3 + $0x40] ss:$8 sps:$4 sm:$0xff]   ;;  %v9490_v44 = vld [vmem:[#allocation3 + $0x54] ss:$8 sps:$4 sm:$0x7f]  }
  0x9b   : > { %v9480_v43 = vld [vmem:[#allocation3 + $0xa0] ss:$8 sps:$4 sm:$0xff]   ;;  %v9493_v45 = vld [vmem:[#allocation3 + $0xb4] ss:$8 sps:$4 sm:$0x7f]  }
  0x9c   : > { %7856 = vmatmul.mubr.msk.bf16.gmra.mrb[4].mxu0 %vm545_vm1, %v9457_v16  ;;  %7928 = vmatmul.mubr.msk.bf16.gmra.mrb[4].mxu1 %vm545_vm1, %v9457_v16  ;;  %v10383_v47 = vld [vmem:[%s10263_s10 + $0x10] sm:$0xff]   ;;  %v10392_v48 = vld [vmem:[%s10263_s10 + $0x18] sm:$0xff]   ;;  %v10398_v49 = vld [vmem:[#allocation2] sm:$0xff] }
  0x9d   : > { %647 = vmatprep.mubr.bf16.mxu0 %v10044_v0  ;;  %1552 = vmatprep.mubr.bf16.mxu1 %v10044_v0  ;;  %v10403_v50 = vld [vmem:[%s10263_s10 + $0x20] sm:$0xff]   ;;  %v10412_v51 = vld [vmem:[%s10263_s10 + $0x28] sm:$0xff]   ;;  %v10421_v52 = vld [vmem:[%s10263_s10 + $0x30] sm:$0xff]  }
  0x9e   : > { %v10430_v53 = vld [vmem:[%s10263_s10 + $0x38] sm:$0xff]   ;;  %v10439_v54 = vld [vmem:[%s10263_s10 + $0x40] sm:$0xff]   ;;  %v10448_v55 = vld [vmem:[%s10263_s10 + $0x48] sm:$0xff]  }
  0x9f   : > { %v10457_v56 = vld [vmem:[%s10263_s10 + $0x50] sm:$0xff]   ;;  %v10466_v57 = vld [vmem:[%s10263_s10 + $0x58] sm:$0xff]   ;;  %v10475_v58 = vld [vmem:[%s10263_s10 + $0x60] sm:$0xff]  }
  0xa0   : > { %v10484_v59 = vld [vmem:[%s10263_s10 + $0x68] sm:$0xff]   ;;  %v9842_v62 = vld [vmem:[#allocation3 + $0x34] ss:$8 sps:$4 sm:$0x7f]   ;;  %v388_v12 = vld [vmem:[#allocation5] sm:$0x3] }
  0xa1   : > { %v9840_v60 = vld [vmem:[#allocation3 + $0x20] ss:$8 sps:$4 sm:$0xff]   ;;  %v9843_v63 = vld [vmem:[#allocation3 + $0x94] ss:$8 sps:$4 sm:$0x7f]  }
  0xa2   : > { %v9841_v61 = vld [vmem:[#allocation3 + $0x80] ss:$8 sps:$4 sm:$0xff]   ;;  %v9848_v5 = vld [vmem:[#allocation3 + $0x14] ss:$8 sps:$4 sm:$0x7f]  }
  0xa3   : > { %v9846_v3 = vld [vmem:[#allocation3] ss:$8 sps:$4 sm:$0xff]   ;;  %v9849_v6 = vld [vmem:[#allocation3 + $0x74] ss:$8 sps:$4 sm:$0x7f]  }
  0xa4   : > { %7857 = vmatmul.mubr.msk.bf16.gmra.mrb[8].mxu0 %vm545_vm1, %v9458_v23  ;;  %7929 = vmatmul.mubr.msk.bf16.gmra.mrb[8].mxu1 %vm545_vm1, %v9458_v23  ;;  %v9847_v4 = vld [vmem:[#allocation3 + $0x60] ss:$8 sps:$4 sm:$0xff]   ;;  %v9850_v7 = vld [vmem:[#allocation3 + $0x44] ss:$8 sps:$4 sm:$0xff]  }
  0xa5   : > { %657 = vmatprep.mubr.bf16.mxu0 %v10044_v0  ;;  %1562 = vmatprep.mubr.bf16.mxu1 %v10044_v0  ;;  %v9851_v8 = vld [vmem:[#allocation3 + $0xa4] ss:$8 sps:$4 sm:$0xff]  }
  0xac   : > { %7858 = vmatmul.mubr.msk.bf16.gmra.mrb[12].mxu0 %vm545_vm1, %v9459_v26  ;;  %7930 = vmatmul.mubr.msk.bf16.gmra.mrb[12].mxu1 %vm545_vm1, %v9459_v26 }
  0xad   : > { %667 = vmatprep.mubr.bf16.mxu0 %v10044_v0  ;;  %1572 = vmatprep.mubr.bf16.mxu1 %v10044_v0 }
  0xb4   : > { %7859 = vmatmul.mubr.msk.bf16.gmra.mrb[16].mxu0 %vm545_vm1, %v9460_v27  ;;  %7931 = vmatmul.mubr.msk.bf16.gmra.mrb[16].mxu1 %vm545_vm1, %v9460_v27 }
  0xb5   : > { %677 = vmatprep.mubr.bf16.mxu0 %v10044_v0  ;;  %1582 = vmatprep.mubr.bf16.mxu1 %v10044_v0 }
  0xbc   : > { %7860 = vmatmul.mubr.msk.bf16.gmra.mrb[20].mxu0 %vm545_vm1, %v9461_v28  ;;  %7932 = vmatmul.mubr.msk.bf16.gmra.mrb[20].mxu1 %vm545_vm1, %v9461_v28 }
  0xbd   : > { %687 = vmatprep.mubr.bf16.mxu0 %v10044_v0  ;;  %1592 = vmatprep.mubr.bf16.mxu1 %v10044_v0 }
  0xc4   : > { %7861 = vmatmul.mubr.msk.bf16.gmra.mrb[24].mxu0 %vm545_vm1, %v9462_v29  ;;  %7933 = vmatmul.mubr.msk.bf16.gmra.mrb[24].mxu1 %vm545_vm1, %v9462_v29 }
  0xc5   : > { %697 = vmatprep.mubr.bf16.mxu0 %v10044_v0  ;;  %1602 = vmatprep.mubr.bf16.mxu1 %v10044_v0 }
  0xcc   : > { %7862 = vmatmul.mubr.msk.bf16.gmra.mrb[28].mxu0 %vm545_vm1, %v9463_v30  ;;  %7934 = vmatmul.mubr.msk.bf16.gmra.mrb[28].mxu1 %vm545_vm1, %v9463_v30 }
  0xcd   : > { %707 = vmatprep.mubr.bf16.mxu0 %v10044_v0  ;;  %1612 = vmatprep.mubr.bf16.mxu1 %v10044_v0 }
  0xd4   : > { %7863 = vmatmul.mubr.msk.bf16.gmra.mrb[32].mxu0 %vm545_vm1, %v9470_v31  ;;  %7935 = vmatmul.mubr.msk.bf16.gmra.mrb[32].mxu1 %vm545_vm1, %v9470_v31 }
  0xd5   : > { %717 = vmatprep.mubr.bf16.mxu0 %v10044_v0  ;;  %1622 = vmatprep.mubr.bf16.mxu1 %v10044_v0 }
  0xdc   : > { %7864 = vmatmul.mubr.msk.bf16.gmra.mrb[36].mxu0 %vm545_vm1, %v9471_v32  ;;  %7936 = vmatmul.mubr.msk.bf16.gmra.mrb[36].mxu1 %vm545_vm1, %v9471_v32 }
  0xdd   : > { %727 = vmatprep.mubr.bf16.mxu0 %v10044_v0  ;;  %1632 = vmatprep.mubr.bf16.mxu1 %v10044_v0 }
  0xe4   : > { %7865 = vmatmul.mubr.msk.bf16.gmra.mrb[40].mxu0 %vm545_vm1, %v9472_v33  ;;  %7937 = vmatmul.mubr.msk.bf16.gmra.mrb[40].mxu1 %vm545_vm1, %v9472_v33 }
  0xe5   : > { %737 = vmatprep.mubr.bf16.mxu0 %v10044_v0  ;;  %1642 = vmatprep.mubr.bf16.mxu1 %v10044_v0 }
  0xec   : > { %7866 = vmatmul.mubr.msk.bf16.gmra.mrb[44].mxu0 %vm545_vm1, %v9473_v38  ;;  %7938 = vmatmul.mubr.msk.bf16.gmra.mrb[44].mxu1 %vm545_vm1, %v9473_v38 }
  0xed   : > { %747 = vmatprep.mubr.bf16.mxu0 %v10044_v0  ;;  %1652 = vmatprep.mubr.bf16.mxu1 %v10044_v0 }
  0xf4   : > { %7867 = vmatmul.mubr.msk.bf16.gmra.mrb[48].mxu0 %vm545_vm1, %v9474_v39  ;;  %7939 = vmatmul.mubr.msk.bf16.gmra.mrb[48].mxu1 %vm545_vm1, %v9474_v39 }
  0xf5   : > { %757 = vmatprep.mubr.bf16.mxu0 %v10044_v0  ;;  %1662 = vmatprep.mubr.bf16.mxu1 %v10044_v0 }
  0xfc   : > { %7868 = vmatmul.mubr.msk.bf16.gmra.mrb[52].mxu0 %vm545_vm1, %v9475_v40  ;;  %7940 = vmatmul.mubr.msk.bf16.gmra.mrb[52].mxu1 %vm545_vm1, %v9475_v40 }
  0xfd   : > { %936 = vmatprep.mubr.bf16.mxu0 %v10044_v0  ;;  %1729 = vmatprep.mubr.bf16.mxu1 %v10044_v0 }
 0x104   : > { %7888 = vmatmul.mubr.msk.bf16.vlgmr.msra.gmra.mrb[0].mxu0 %vm545_vm1, %v9476_v41  ;;  %7946 = vmatmul.mubr.msk.bf16.vlgmr.msra.gmra.mrb[0].mxu1 %vm545_vm1, %v9476_v41 }
 0x105   : > { %1115 = vmatpush1.bf16.msra.mxu0 %v9477_v42  ;;  %1900 = vmatpush1.bf16.msra.mxu1 %v9480_v43 }
 0x106   : > { %946 = vmatprep.mubr.bf16.mxu0 %v10044_v0  ;;  %1739 = vmatprep.mubr.bf16.mxu1 %v10044_v0 }
 0x107   : > { %7907 = vmatprep.subr.msk.bf16.mxu0 %vm588_vm0, %v9490_v44  ;;  %7964 = vmatprep.subr.msk.bf16.mxu1 %vm588_vm0, %v9493_v45 }
 0x109   : > { %1117 = vmatpush1.bf16.msra.mxu0 %v10342_v36  ;;  %1902 = vmatpush1.bf16.msra.mxu1 %v10345_v37 }
 0x10a   : > { %2324 = vmatprep.subr.bf16.mxu0 %v10255_v1  ;;  %3179 = vmatprep.subr.bf16.mxu1 %v10257_v2  ;;  %v9845_v1 = vld [vmem:[#allocation3 + $0x64] ss:$8 sps:$4 sm:$0xff]   ;;  %v10575_v2 = vld [vmem:[%s10263_s10 + $0x70] sm:$0xff]  }
 0x10c   : > { %7889 = vmatmul.mubr.msk.bf16.gmra.mrb[4].mxu0 %vm545_vm1, %v10368_v46  ;;  %7947 = vmatmul.mubr.msk.bf16.gmra.mrb[4].mxu1 %vm545_vm1, %v10368_v46 }
 0x10d   : > { %956 = vmatprep.mubr.bf16.mxu0 %v10044_v0  ;;  %1749 = vmatprep.mubr.bf16.mxu1 %v10044_v0 }
 0x114   : > { %7890 = vmatmul.mubr.msk.bf16.gmra.mrb[8].mxu0 %vm545_vm1, %v10383_v47  ;;  %7948 = vmatmul.mubr.msk.bf16.gmra.mrb[8].mxu1 %vm545_vm1, %v10383_v47 }
 0x115   : > { %966 = vmatprep.mubr.bf16.mxu0 %v10044_v0  ;;  %1759 = vmatprep.mubr.bf16.mxu1 %v10044_v0  ;;  %v9844_v0 = vld [vmem:[#allocation3 + $0x4] ss:$8 sps:$4 sm:$0xff]  }
 0x11c   : > { %7891 = vmatmul.mubr.msk.bf16.gmra.mrb[12].mxu0 %vm545_vm1, %v10392_v48  ;;  %7949 = vmatmul.mubr.msk.bf16.gmra.mrb[12].mxu1 %vm545_vm1, %v10392_v48 }
 0x11d   : > { %976 = vmatprep.mubr.bf16.mxu0 %v10398_v49  ;;  %1769 = vmatprep.mubr.bf16.mxu1 %v10398_v49 }
 0x124   : > { %7892 = vmatmul.mubr.msk.bf16.gmra.mrb[16].mxu0 %vm545_vm1, %v10403_v50  ;;  %7950 = vmatmul.mubr.msk.bf16.gmra.mrb[16].mxu1 %vm545_vm1, %v10403_v50 }
 0x125   : > { %986 = vmatprep.mubr.bf16.mxu0 %v10398_v49  ;;  %1779 = vmatprep.mubr.bf16.mxu1 %v10398_v49 }
 0x12c   : > { %7893 = vmatmul.mubr.msk.bf16.gmra.mrb[20].mxu0 %vm545_vm1, %v10412_v51  ;;  %7951 = vmatmul.mubr.msk.bf16.gmra.mrb[20].mxu1 %vm545_vm1, %v10412_v51 }
 0x12d   : > { %996 = vmatprep.mubr.bf16.mxu0 %v10398_v49  ;;  %1789 = vmatprep.mubr.bf16.mxu1 %v10398_v49 }
 0x134   : > { %7894 = vmatmul.mubr.msk.bf16.gmra.mrb[24].mxu0 %vm545_vm1, %v10421_v52  ;;  %7952 = vmatmul.mubr.msk.bf16.gmra.mrb[24].mxu1 %vm545_vm1, %v10421_v52 }
 0x135   : > { %1006 = vmatprep.mubr.bf16.mxu0 %v10398_v49  ;;  %1799 = vmatprep.mubr.bf16.mxu1 %v10398_v49 }
 0x13c   : > { %7895 = vmatmul.mubr.msk.bf16.gmra.mrb[28].mxu0 %vm545_vm1, %v10430_v53  ;;  %7953 = vmatmul.mubr.msk.bf16.gmra.mrb[28].mxu1 %vm545_vm1, %v10430_v53 }
 0x13d   : > { %1016 = vmatprep.mubr.bf16.mxu0 %v10398_v49  ;;  %1809 = vmatprep.mubr.bf16.mxu1 %v10398_v49 }
 0x144   : > { %7896 = vmatmul.mubr.msk.bf16.gmra.mrb[32].mxu0 %vm545_vm1, %v10439_v54  ;;  %7954 = vmatmul.mubr.msk.bf16.gmra.mrb[32].mxu1 %vm545_vm1, %v10439_v54 }
 0x145   : > { %1026 = vmatprep.mubr.bf16.mxu0 %v10398_v49  ;;  %1819 = vmatprep.mubr.bf16.mxu1 %v10398_v49 }
 0x14c   : > { %7897 = vmatmul.mubr.msk.bf16.gmra.mrb[36].mxu0 %vm545_vm1, %v10448_v55  ;;  %7955 = vmatmul.mubr.msk.bf16.gmra.mrb[36].mxu1 %vm545_vm1, %v10448_v55 }
 0x14d   : > { %1036 = vmatprep.mubr.bf16.mxu0 %v10398_v49  ;;  %1829 = vmatprep.mubr.bf16.mxu1 %v10398_v49 }
 0x154   : > { %7898 = vmatmul.mubr.msk.bf16.gmra.mrb[40].mxu0 %vm545_vm1, %v10457_v56  ;;  %7956 = vmatmul.mubr.msk.bf16.gmra.mrb[40].mxu1 %vm545_vm1, %v10457_v56 }
 0x155   : > { %1046 = vmatprep.mubr.bf16.mxu0 %v10398_v49  ;;  %1839 = vmatprep.mubr.bf16.mxu1 %v10398_v49 }
 0x15c   : > { %7899 = vmatmul.mubr.msk.bf16.gmra.mrb[44].mxu0 %vm545_vm1, %v10466_v57  ;;  %7957 = vmatmul.mubr.msk.bf16.gmra.mrb[44].mxu1 %vm545_vm1, %v10466_v57 }
 0x15d   : > { %1056 = vmatprep.mubr.bf16.mxu0 %v10398_v49  ;;  %1849 = vmatprep.mubr.bf16.mxu1 %v10398_v49 }
 0x164   : > { %7900 = vmatmul.mubr.msk.bf16.gmra.mrb[48].mxu0 %vm545_vm1, %v10475_v58  ;;  %7958 = vmatmul.mubr.msk.bf16.gmra.mrb[48].mxu1 %vm545_vm1, %v10475_v58 }
 0x165   : > { %1066 = vmatprep.mubr.bf16.mxu0 %v10398_v49  ;;  %1859 = vmatprep.mubr.bf16.mxu1 %v10398_v49 }
 0x16c   : > { %7901 = vmatmul.mubr.msk.bf16.gmra.mrb[52].mxu0 %vm545_vm1, %v10484_v59  ;;  %7959 = vmatmul.mubr.msk.bf16.gmra.mrb[52].mxu1 %vm545_vm1, %v10484_v59 }
 0x16d   : > { %1146 = vmatprep.mubr.bf16.mxu0 %v10398_v49  ;;  %1931 = vmatprep.mubr.bf16.mxu1 %v10398_v49 }
 0x174   : > { %7908 = vmatmul.mubr.msk.bf16.vlgmr.msra.gmra.mrb[0].mxu0 %vm545_vm1, %v10368_v46  ;;  %7965 = vmatmul.mubr.msk.bf16.vlgmr.msra.gmra.mrb[0].mxu1 %vm545_vm1, %v10368_v46 }
 0x175   : > { %2325 = vmatpush1.bf16.msra.mxu0 %v9840_v60  ;;  %3180 = vmatpush1.bf16.msra.mxu1 %v9841_v61 }
 0x176   : > { %1156 = vmatprep.mubr.bf16.mxu0 %v10398_v49  ;;  %1941 = vmatprep.mubr.bf16.mxu1 %v10398_v49 }
 0x177   : > { %8007 = vmatprep.subr.msk.bf16.mxu0 %vm588_vm0, %v9842_v62  ;;  %8066 = vmatprep.subr.msk.bf16.mxu1 %vm588_vm0, %v9843_v63 }
 0x179   : > { %2327 = vmatpush1.bf16.msra.mxu0 %v10270_v10  ;;  %3182 = vmatpush1.bf16.msra.mxu1 %v10273_v11  ;;  %v10657_v10 = vshrl.u32 %v1344_v9, 7 }
 0x17a   : > { %2497 = vmatprep.subr.bf16.mxu0 %v9844_v0  ;;  %3352 = vmatprep.subr.bf16.mxu1 %v9845_v1 }
 0x17b   : > { %12482 = vst [vmem:[#allocation14_spill] sm:$0xff] %v10657_v10  ;;  %v12469_v11 = vsub.s32 0, %v10657_v10  ;;  %v12468_v13 = vsub.s32 1, %v10657_v10 }
 0x17c   : > { %7909 = vmatmul.mubr.msk.bf16.gmra.mrb[4].mxu0 %vm545_vm1, %v10383_v47  ;;  %7966 = vmatmul.mubr.msk.bf16.gmra.mrb[4].mxu1 %vm545_vm1, %v10383_v47 }
 0x17d   : > { %1166 = vmatprep.mubr.bf16.mxu0 %v10398_v49  ;;  %1951 = vmatprep.mubr.bf16.mxu1 %v10398_v49  ;;  %v10669_v14 = vrot.slane %v388_v12, %v12469_v11  ;;  %v10673_v15 = vrot.slane %v388_v12, %v12468_v13  ;;  %v9853_v12 = vld [vmem:[#allocation3 + $0x40] ss:$8 sps:$4 sm:$0xff]  }
 0x17e   : > { %v9866_v11 = vld [vmem:[%s10263_s10 + $0xc0] sm:$0xff]  }
 0x184   : > { %7910 = vmatmul.mubr.msk.bf16.gmra.mrb[8].mxu0 %vm545_vm1, %v10392_v48  ;;  %7967 = vmatmul.mubr.msk.bf16.gmra.mrb[8].mxu1 %vm545_vm1, %v10392_v48 }
 0x185   : > { %1176 = vmatprep.mubr.bf16.mxu0 %v10398_v49  ;;  %1961 = vmatprep.mubr.bf16.mxu1 %v10398_v49 }
 0x18c   : > { %7911 = vmatmul.mubr.msk.bf16.gmra.mrb[12].mxu0 %vm545_vm1, %v10403_v50  ;;  %7968 = vmatmul.mubr.msk.bf16.gmra.mrb[12].mxu1 %vm545_vm1, %v10403_v50 }
 0x18d   : > { %1186 = vmatprep.mubr.bf16.mxu0 %v10398_v49  ;;  %1971 = vmatprep.mubr.bf16.mxu1 %v10398_v49 }
 0x194   : > { %7912 = vmatmul.mubr.msk.bf16.gmra.mrb[16].mxu0 %vm545_vm1, %v10412_v51  ;;  %7969 = vmatmul.mubr.msk.bf16.gmra.mrb[16].mxu1 %vm545_vm1, %v10412_v51 }
 0x195   : > { %1196 = vmatprep.mubr.bf16.mxu0 %v10398_v49  ;;  %1981 = vmatprep.mubr.bf16.mxu1 %v10398_v49 }
 0x19c   : > { %7913 = vmatmul.mubr.msk.bf16.gmra.mrb[20].mxu0 %vm545_vm1, %v10421_v52  ;;  %7970 = vmatmul.mubr.msk.bf16.gmra.mrb[20].mxu1 %vm545_vm1, %v10421_v52 }
 0x19d   : > { %1206 = vmatprep.mubr.bf16.mxu0 %v10398_v49  ;;  %1991 = vmatprep.mubr.bf16.mxu1 %v10398_v49 }
 0x1a4   : > { %7914 = vmatmul.mubr.msk.bf16.gmra.mrb[24].mxu0 %vm545_vm1, %v10430_v53  ;;  %7971 = vmatmul.mubr.msk.bf16.gmra.mrb[24].mxu1 %vm545_vm1, %v10430_v53 }
 0x1a5   : > { %1216 = vmatprep.mubr.bf16.mxu0 %v10398_v49  ;;  %2001 = vmatprep.mubr.bf16.mxu1 %v10398_v49 }
 0x1ac   : > { %7915 = vmatmul.mubr.msk.bf16.gmra.mrb[28].mxu0 %vm545_vm1, %v10439_v54  ;;  %7972 = vmatmul.mubr.msk.bf16.gmra.mrb[28].mxu1 %vm545_vm1, %v10439_v54 }
 0x1ad   : > { %1226 = vmatprep.mubr.bf16.mxu0 %v10398_v49  ;;  %2011 = vmatprep.mubr.bf16.mxu1 %v10398_v49 }
 0x1b4   : > { %7916 = vmatmul.mubr.msk.bf16.gmra.mrb[32].mxu0 %vm545_vm1, %v10448_v55  ;;  %7973 = vmatmul.mubr.msk.bf16.gmra.mrb[32].mxu1 %vm545_vm1, %v10448_v55 }
 0x1b5   : > { %1236 = vmatprep.mubr.bf16.mxu0 %v10398_v49  ;;  %2021 = vmatprep.mubr.bf16.mxu1 %v10398_v49 }
 0x1bc   : > { %7917 = vmatmul.mubr.msk.bf16.gmra.mrb[36].mxu0 %vm545_vm1, %v10457_v56  ;;  %7974 = vmatmul.mubr.msk.bf16.gmra.mrb[36].mxu1 %vm545_vm1, %v10457_v56 }
 0x1bd   : > { %1246 = vmatprep.mubr.bf16.mxu0 %v10398_v49  ;;  %2031 = vmatprep.mubr.bf16.mxu1 %v10398_v49 }
 0x1c4   : > { %7918 = vmatmul.mubr.msk.bf16.gmra.mrb[40].mxu0 %vm545_vm1, %v10466_v57  ;;  %7975 = vmatmul.mubr.msk.bf16.gmra.mrb[40].mxu1 %vm545_vm1, %v10466_v57 }
 0x1c5   : > { %1256 = vmatprep.mubr.bf16.mxu0 %v10398_v49  ;;  %2041 = vmatprep.mubr.bf16.mxu1 %v10398_v49 }
 0x1cc   : > { %7919 = vmatmul.mubr.msk.bf16.gmra.mrb[44].mxu0 %vm545_vm1, %v10475_v58  ;;  %7976 = vmatmul.mubr.msk.bf16.gmra.mrb[44].mxu1 %vm545_vm1, %v10475_v58 }
 0x1cd   : > { %1266 = vmatprep.mubr.bf16.mxu0 %v10398_v49  ;;  %2051 = vmatprep.mubr.bf16.mxu1 %v10398_v49 }
 0x1d4   : > { %7920 = vmatmul.mubr.msk.bf16.gmra.mrb[48].mxu0 %vm545_vm1, %v10484_v59  ;;  %7977 = vmatmul.mubr.msk.bf16.gmra.mrb[48].mxu1 %vm545_vm1, %v10484_v59 }
 0x1d5   : > { %1276 = vmatprep.mubr.bf16.mxu0 %v10398_v49  ;;  %2061 = vmatprep.mubr.bf16.mxu1 %v10398_v49 }
 0x1dc   : > { %7921 = vmatmul.mubr.msk.bf16.gmra.mrb[52].mxu0 %vm545_vm1, %v10575_v2  ;;  %7978 = vmatmul.mubr.msk.bf16.gmra.mrb[52].mxu1 %vm545_vm1, %v10575_v2 }
 0x1dd   : > { %2356 = vmatprep.mubr.bf16.mxu0 %v10398_v49  ;;  %3211 = vmatprep.mubr.bf16.mxu1 %v10398_v49 }
 0x1e4   : > { %8008 = vmatmul.mubr.msk.bf16.vlgmr.msra.gmra.mrb[56].mxu0 %vm545_vm1, %v10368_v46  ;;  %8067 = vmatmul.mubr.msk.bf16.vlgmr.msra.gmra.mrb[56].mxu1 %vm545_vm1, %v10368_v46 }
 0x1e5   : > { %2498 = vmatpush1.bf16.msra.mxu0 %v9846_v3  ;;  %3353 = vmatpush1.bf16.msra.mxu1 %v9847_v4 }
 0x1e6   : > { %2366 = vmatprep.mubr.bf16.mxu0 %v10398_v49  ;;  %3221 = vmatprep.mubr.bf16.mxu1 %v10398_v49 }
 0x1e7   : > { %8022 = vmatprep.subr.msk.bf16.mxu0 %vm588_vm0, %v9848_v5  ;;  %8081 = vmatprep.subr.msk.bf16.mxu1 %vm588_vm0, %v9849_v6  ;;  %v9852_v6 = vld [vmem:[%s10263_s10 + $0x78] sm:$0xff]  }
 0x1e9   : > { %2500 = vmatpush1.bf16.msra.mxu0 %v10285_v20  ;;  %3355 = vmatpush1.bf16.msra.mxu1 %v10292_v22 }
 0x1ea   : > { %2782 = vmatprep.subr.bf16.mxu0 %v9850_v7  ;;  %3525 = vmatprep.subr.bf16.mxu1 %v9851_v8 }
 0x1ec   : > { %8009 = vmatmul.mubr.msk.bf16.gmra.mrb[60].mxu0 %vm545_vm1, %v10383_v47  ;;  %8068 = vmatmul.mubr.msk.bf16.gmra.mrb[60].mxu1 %vm545_vm1, %v10383_v47 }
 0x1ed   : > { %2376 = vmatprep.mubr.bf16.mxu0 %v10398_v49  ;;  %3231 = vmatprep.mubr.bf16.mxu1 %v10398_v49 }
 0x1f4   : > { %8010 = vmatmul.mubr.msk.bf16.gmra.mrb[64].mxu0 %vm545_vm1, %v10392_v48  ;;  %8069 = vmatmul.mubr.msk.bf16.gmra.mrb[64].mxu1 %vm545_vm1, %v10392_v48 }
 0x1f5   : > { %2386 = vmatprep.mubr.bf16.mxu0 %v10398_v49  ;;  %3241 = vmatprep.mubr.bf16.mxu1 %v10398_v49 }
 0x1fc   : > { %8011 = vmatmul.mubr.msk.bf16.gmra.mrb[68].mxu0 %vm545_vm1, %v10403_v50  ;;  %8070 = vmatmul.mubr.msk.bf16.gmra.mrb[68].mxu1 %vm545_vm1, %v10403_v50 }
 0x1fd   : > { %2396 = vmatprep.mubr.bf16.mxu0 %v10398_v49  ;;  %3251 = vmatprep.mubr.bf16.mxu1 %v10398_v49 }
 0x204   : > { %8012 = vmatmul.mubr.msk.bf16.gmra.mrb[72].mxu0 %vm545_vm1, %v10412_v51  ;;  %8071 = vmatmul.mubr.msk.bf16.gmra.mrb[72].mxu1 %vm545_vm1, %v10412_v51 }
 0x205   : > { %2406 = vmatprep.mubr.bf16.mxu0 %v10398_v49  ;;  %3261 = vmatprep.mubr.bf16.mxu1 %v10398_v49 }
 0x20c   : > { %8013 = vmatmul.mubr.msk.bf16.gmra.mrb[76].mxu0 %vm545_vm1, %v10421_v52  ;;  %8072 = vmatmul.mubr.msk.bf16.gmra.mrb[76].mxu1 %vm545_vm1, %v10421_v52 }
 0x20d   : > { %2416 = vmatprep.mubr.bf16.mxu0 %v10398_v49  ;;  %3271 = vmatprep.mubr.bf16.mxu1 %v10398_v49 }
 0x214   : > { %8014 = vmatmul.mubr.msk.bf16.gmra.mrb[80].mxu0 %vm545_vm1, %v10430_v53  ;;  %8073 = vmatmul.mubr.msk.bf16.gmra.mrb[80].mxu1 %vm545_vm1, %v10430_v53 }
 0x215   : > { %2426 = vmatprep.mubr.bf16.mxu0 %v10398_v49  ;;  %3281 = vmatprep.mubr.bf16.mxu1 %v10398_v49 }
 0x21c   : > { %8015 = vmatmul.mubr.msk.bf16.gmra.mrb[84].mxu0 %vm545_vm1, %v10439_v54  ;;  %8074 = vmatmul.mubr.msk.bf16.gmra.mrb[84].mxu1 %vm545_vm1, %v10439_v54 }
 0x21d   : > { %2436 = vmatprep.mubr.bf16.mxu0 %v10398_v49  ;;  %3291 = vmatprep.mubr.bf16.mxu1 %v10398_v49 }
 0x224   : > { %8016 = vmatmul.mubr.msk.bf16.gmra.mrb[88].mxu0 %vm545_vm1, %v10448_v55  ;;  %8075 = vmatmul.mubr.msk.bf16.gmra.mrb[88].mxu1 %vm545_vm1, %v10448_v55 }
 0x225   : > { %2446 = vmatprep.mubr.bf16.mxu0 %v10398_v49  ;;  %3301 = vmatprep.mubr.bf16.mxu1 %v10398_v49 }
 0x22c   : > { %8017 = vmatmul.mubr.msk.bf16.gmra.mrb[92].mxu0 %vm545_vm1, %v10457_v56  ;;  %8076 = vmatmul.mubr.msk.bf16.gmra.mrb[92].mxu1 %vm545_vm1, %v10457_v56 }
 0x22d   : > { %2456 = vmatprep.mubr.bf16.mxu0 %v10398_v49  ;;  %3311 = vmatprep.mubr.bf16.mxu1 %v10398_v49 }
 0x234   : > { %8018 = vmatmul.mubr.msk.bf16.gmra.mrb[96].mxu0 %vm545_vm1, %v10466_v57  ;;  %8077 = vmatmul.mubr.msk.bf16.gmra.mrb[96].mxu1 %vm545_vm1, %v10466_v57 }
 0x235   : > { %2466 = vmatprep.mubr.bf16.mxu0 %v10398_v49  ;;  %3321 = vmatprep.mubr.bf16.mxu1 %v10398_v49 }
 0x23c   : > { %8019 = vmatmul.mubr.msk.bf16.gmra.mrb[100].mxu0 %vm545_vm1, %v10475_v58  ;;  %8078 = vmatmul.mubr.msk.bf16.gmra.mrb[100].mxu1 %vm545_vm1, %v10475_v58 }
 0x23d   : > { %2476 = vmatprep.mubr.bf16.mxu0 %v10398_v49  ;;  %3331 = vmatprep.mubr.bf16.mxu1 %v10398_v49 }
 0x244   : > { %8020 = vmatmul.mubr.msk.bf16.gmra.mrb[104].mxu0 %vm545_vm1, %v10484_v59  ;;  %8079 = vmatmul.mubr.msk.bf16.gmra.mrb[104].mxu1 %vm545_vm1, %v10484_v59 }
 0x245   : > { %2486 = vmatprep.mubr.bf16.mxu0 %v10398_v49  ;;  %3341 = vmatprep.mubr.bf16.mxu1 %v10398_v49 }
 0x247   : > { %v1148_v16 = vpop.f32.mrb[0].mxu0  ;;  %v1933_v17 = vpop.f32.mrb[0].mxu1 }
 0x248   : > { %v1354_v18 = vadd.f32 %v10669_v14, %v1148_v16  ;;  %v2128_v19 = vadd.f32 %v1933_v17, %v10669_v14  ;;  %v1150_v20 = vpop.f32.mrb[1].mxu0  ;;  %v1935_v21 = vpop.f32.mrb[1].mxu1  ;;  %v9854_v16 = vld [vmem:[#allocation3 + $0xa0] ss:$8 sps:$4 sm:$0xff]  }
 0x249   : > { %v1355_v22 = vadd.f32 %v10673_v15, %v1150_v20  ;;  %v2129_v23 = vadd.f32 %v1935_v21, %v10673_v15  ;;  %v1152_v24 = vpop.f32.mrb[2].mxu0  ;;  %v1937_v25 = vpop.f32.mrb[2].mxu1  ;;  %v9855_v21 = vld [vmem:[#allocation3 + $0x54] ss:$8 sps:$4 sm:$0x7f]  }
 0x24a   : > { %v1410_v26 = vmax.f32 %v1354_v18, 0.0  ;;  %v2184_v27 = vmax.f32 %v2128_v19, 0.0  ;;  %v1356_v28 = vadd.f32 %v10669_v14, %v1152_v24  ;;  %v2130_v29 = vadd.f32 %v1937_v25, %v10669_v14  ;;  %v1154_v30 = vpop.f32.mrb[3].mxu0  ;;  %v1939_v31 = vpop.f32.mrb[3].mxu1 }
 0x24b   : > { %v1411_v32 = vmax.f32 %v1355_v22, 0.0  ;;  %v2185_v33 = vmax.f32 %v2129_v23, 0.0  ;;  %v1357_v34 = vadd.f32 %v10673_v15, %v1154_v30  ;;  %v2131_v35 = vadd.f32 %v1939_v31, %v10673_v15  ;;  %v9856_v22 = vld [vmem:[#allocation3 + $0xb4] ss:$8 sps:$4 sm:$0x7f]  }
 0x24c   : > { %v10685_v38 = vmax.f32 %v1410_v26, %v2184_v27  ;;  %v1412_v39 = vmax.f32 %v1356_v28, 0.0  ;;  %v2186_v40 = vmax.f32 %v2130_v29, 0.0  ;;  %8021 = vmatmul.mubr.msk.bf16.gmra.mrb[108].mxu0 %vm545_vm1, %v10575_v2  ;;  %8080 = vmatmul.mubr.msk.bf16.gmra.mrb[108].mxu1 %vm545_vm1, %v10575_v2 }
 0x24d   : > { %v10691_v41 = vmax.f32 %v1411_v32, %v2185_v33  ;;  %v1413_v42 = vmax.f32 %v1357_v34, 0.0  ;;  %v2187_v43 = vmax.f32 %v2131_v35, 0.0  ;;  %2529 = vmatprep.mubr.bf16.mxu0 %v10398_v49  ;;  %3384 = vmatprep.mubr.bf16.mxu1 %v10398_v49 }
 0x24e   : > { %v10695_v44 = vmax.f32 %v1412_v39, %v2186_v40 }
 0x24f   : > { %v10697_v45 = vmax.f32 %v1413_v42, %v2187_v43  ;;  %v1158_v46 = vpop.f32.mrb[4].mxu0  ;;  %v1943_v47 = vpop.f32.mrb[4].mxu1 }
 0x250   : > { %v1358_v48 = vadd.f32 %v10669_v14, %v1158_v46  ;;  %v2132_v50 = vadd.f32 %v1943_v47, %v10669_v14  ;;  %v1160_v51 = vpop.f32.mrb[5].mxu0  ;;  %v1945_v52 = vpop.f32.mrb[5].mxu1 }
 0x251   : > { %v1359_v53 = vadd.f32 %v10673_v15, %v1160_v51  ;;  %v2133_v54 = vadd.f32 %v1945_v52, %v10673_v15  ;;  %v1162_v55 = vpop.f32.mrb[6].mxu0  ;;  %v1947_v56 = vpop.f32.mrb[6].mxu1 }
 0x252   : > { %v1414_v57 = vmax.f32 %v1358_v48, 0.0  ;;  %v2188_v58 = vmax.f32 %v2132_v50, 0.0  ;;  %v1360_v59 = vadd.f32 %v10669_v14, %v1162_v55  ;;  %v2134_v60 = vadd.f32 %v1947_v56, %v10669_v14  ;;  %v1164_v61 = vpop.f32.mrb[7].mxu0  ;;  %v1949_v62 = vpop.f32.mrb[7].mxu1  ;;  %v9857_v48 = vld [vmem:[%s10263_s10 + $0x80] sm:$0xff]  }
 0x253   : > { %v1415_v63 = vmax.f32 %v1359_v53, 0.0  ;;  %v2189_v0 = vmax.f32 %v2133_v54, 0.0  ;;  %v1361_v1 = vadd.f32 %v10673_v15, %v1164_v61  ;;  %v2135_v2 = vadd.f32 %v1949_v62, %v10673_v15 }
 0x254   : > { %v10707_v3 = vmax.f32 %v1414_v57, %v2188_v58  ;;  %v1416_v4 = vmax.f32 %v1360_v59, 0.0  ;;  %v2190_v5 = vmax.f32 %v2134_v60, 0.0  ;;  %8023 = vmatmul.mubr.msk.bf16.vlgmr.msra.gmra.mrb[56].mxu0 %vm545_vm1, %v9852_v6  ;;  %8082 = vmatmul.mubr.msk.bf16.vlgmr.msra.gmra.mrb[56].mxu1 %vm545_vm1, %v9852_v6 }
 0x255   : > { %v10712_v7 = vmax.f32 %v1415_v63, %v2189_v0  ;;  %v1417_v8 = vmax.f32 %v1361_v1, 0.0  ;;  %v2191_v9 = vmax.f32 %v2135_v2, 0.0  ;;  %2783 = vmatpush1.bf16.msra.mxu0 %v9853_v12  ;;  %3526 = vmatpush1.bf16.msra.mxu1 %v9854_v16 }
 0x256   : > { %v10714_v17 = vmax.f32 %v1416_v4, %v2190_v5  ;;  %2539 = vmatprep.mubr.bf16.mxu0 %v10398_v49  ;;  %3394 = vmatprep.mubr.bf16.mxu1 %v10398_v49 }
 0x257   : > { %v10718_v18 = vmax.f32 %v1417_v8, %v2191_v9  ;;  %v1168_v19 = vpop.f32.mrb[8].mxu0  ;;  %v1953_v20 = vpop.f32.mrb[8].mxu1  ;;  %8051 = vmatprep.subr.msk.bf16.mxu0 %vm588_vm0, %v9855_v21  ;;  %8096 = vmatprep.subr.msk.bf16.mxu1 %vm588_vm0, %v9856_v22  ;;  %v9858_v22 = vld [vmem:[%s10263_s10 + $0x88] sm:$0xff]  }
 0x258   : > { %v1362_v23 = vadd.f32 %v10669_v14, %v1168_v19  ;;  %v2136_v24 = vadd.f32 %v1953_v20, %v10669_v14  ;;  %v1170_v25 = vpop.f32.mrb[9].mxu0  ;;  %v1955_v26 = vpop.f32.mrb[9].mxu1 }
 0x259   : > { %v1363_v27 = vadd.f32 %v10673_v15, %v1170_v25  ;;  %v2137_v28 = vadd.f32 %v1955_v26, %v10673_v15  ;;  %v1172_v29 = vpop.f32.mrb[10].mxu0  ;;  %v1957_v30 = vpop.f32.mrb[10].mxu1  ;;  %2785 = vmatpush1.bf16.msra.mxu0 %v10342_v36  ;;  %3528 = vmatpush1.bf16.msra.mxu1 %v10345_v37  ;;  %v10761_v26 = vld [vmem:[#allocation2] sm:$0xff] }
 0x25a   : > { %v1418_v31 = vmax.f32 %v1362_v23, 0.0  ;;  %v2192_v32 = vmax.f32 %v2136_v24, 0.0  ;;  %v1364_v33 = vadd.f32 %v10669_v14, %v1172_v29  ;;  %v2138_v34 = vadd.f32 %v1957_v30, %v10669_v14  ;;  %v1174_v35 = vpop.f32.mrb[11].mxu0  ;;  %v1959_v39 = vpop.f32.mrb[11].mxu1  ;;  %5561 = vmatprep.subr.bf16.mxu1 %v10398_v49  ;;  %3924 = vst.msk [vmem:[#allocation2 + $0x8] sm:$0xff] %vm3923_vm2, %v10761_v26  ;;  %3926 = vst.msk [vmem:[#allocation2 + $0xf8] sm:$0xff] %vm3923_vm2, %v10761_v26 }
 0x25b   : > { %v1419_v40 = vmax.f32 %v1363_v27, 0.0  ;;  %v2193_v42 = vmax.f32 %v2137_v28, 0.0  ;;  %v1365_v43 = vadd.f32 %v10673_v15, %v1174_v35  ;;  %v2139_v46 = vadd.f32 %v1959_v39, %v10673_v15 }
 0x25c   : > { %v10733_v36 = vmax.f32 %v1418_v31, %v2192_v32  ;;  %v1420_v47 = vmax.f32 %v1364_v33, 0.0  ;;  %v2194_v37 = vmax.f32 %v2138_v34, 0.0  ;;  %8024 = vmatmul.mubr.msk.bf16.gmra.mrb[60].mxu0 %vm545_vm1, %v9857_v48  ;;  %8083 = vmatmul.mubr.msk.bf16.gmra.mrb[60].mxu1 %vm545_vm1, %v9857_v48 }
 0x25d   : > { %v10738_v50 = vmax.f32 %v1419_v40, %v2193_v42  ;;  %v1421_v51 = vmax.f32 %v1365_v43, 0.0  ;;  %v2195_v52 = vmax.f32 %v2139_v46, 0.0  ;;  %2549 = vmatprep.mubr.bf16.mxu0 %v10398_v49  ;;  %3404 = vmatprep.mubr.bf16.mxu1 %v10398_v49 }
 0x25e   : > { %v10742_v53 = vmax.f32 %v1420_v47, %v2194_v37 }
 0x25f   : > { %v10744_v54 = vmax.f32 %v1421_v51, %v2195_v52  ;;  %v1178_v55 = vpop.f32.mrb[12].mxu0  ;;  %v1963_v56 = vpop.f32.mrb[12].mxu1 }
 0x260   : > { %v1366_v57 = vadd.f32 %v10669_v14, %v1178_v55  ;;  %v2140_v58 = vadd.f32 %v1963_v56, %v10669_v14  ;;  %v1180_v59 = vpop.f32.mrb[13].mxu0  ;;  %v1965_v60 = vpop.f32.mrb[13].mxu1 }
 0x261   : > { %v1367_v61 = vadd.f32 %v10673_v15, %v1180_v59  ;;  %v2141_v62 = vadd.f32 %v1965_v60, %v10673_v15  ;;  %v1182_v63 = vpop.f32.mrb[14].mxu0  ;;  %v1967_v0 = vpop.f32.mrb[14].mxu1 }
 0x262   : > { %v1422_v49 = vmax.f32 %v1366_v57, 0.0  ;;  %v2196_v1 = vmax.f32 %v2140_v58, 0.0  ;;  %v1368_v2 = vadd.f32 %v10669_v14, %v1182_v63  ;;  %v2142_v4 = vadd.f32 %v1967_v0, %v10669_v14  ;;  %v1184_v5 = vpop.f32.mrb[15].mxu0  ;;  %v1969_v6 = vpop.f32.mrb[15].mxu1 }
 0x263   : > { %v1423_v8 = vmax.f32 %v1367_v61, 0.0  ;;  %v2197_v9 = vmax.f32 %v2141_v62, 0.0  ;;  %v1369_v12 = vadd.f32 %v10673_v15, %v1184_v5  ;;  %v2143_v16 = vadd.f32 %v1969_v6, %v10673_v15  ;;  %v9860_v61 = vld [vmem:[%s10263_s10 + $0x90] sm:$0xff]  }
 0x264   : > { %v10754_v19 = vmax.f32 %v1422_v49, %v2196_v1  ;;  %v1424_v20 = vmax.f32 %v1368_v2, 0.0  ;;  %v2198_v21 = vmax.f32 %v2142_v4, 0.0  ;;  %8025 = vmatmul.mubr.msk.bf16.gmra.mrb[64].mxu0 %vm545_vm1, %v9858_v22  ;;  %8084 = vmatmul.mubr.msk.bf16.gmra.mrb[64].mxu1 %vm545_vm1, %v9858_v22 }
 0x265   : > { %v10759_v23 = vmax.f32 %v1423_v8, %v2197_v9  ;;  %v1425_v24 = vmax.f32 %v1369_v12, 0.0  ;;  %v2199_v25 = vmax.f32 %v2143_v16, 0.0  ;;  %2559 = vmatprep.mubr.bf16.mxu0 %v10761_v26  ;;  %3414 = vmatprep.mubr.bf16.mxu1 %v10761_v26 }
 0x266   : > { %v10765_v27 = vmax.f32 %v1424_v20, %v2198_v21 }
 0x267   : > { %v10767_v28 = vmax.f32 %v1425_v24, %v2199_v25  ;;  %v1188_v29 = vpop.f32.mrb[16].mxu0  ;;  %v1973_v30 = vpop.f32.mrb[16].mxu1 }
 0x268   : > { %v1370_v31 = vadd.f32 %v10669_v14, %v1188_v29  ;;  %v2144_v32 = vadd.f32 %v1973_v30, %v10669_v14  ;;  %v1190_v33 = vpop.f32.mrb[17].mxu0  ;;  %v1975_v34 = vpop.f32.mrb[17].mxu1 }
 0x269   : > { %v1371_v35 = vadd.f32 %v10673_v15, %v1190_v33  ;;  %v2145_v39 = vadd.f32 %v1975_v34, %v10673_v15  ;;  %v1192_v40 = vpop.f32.mrb[18].mxu0  ;;  %v1977_v42 = vpop.f32.mrb[18].mxu1 }
 0x26a   : > { %v1426_v43 = vmax.f32 %v1370_v31, 0.0  ;;  %v2200_v46 = vmax.f32 %v2144_v32, 0.0  ;;  %v1372_v47 = vadd.f32 %v10669_v14, %v1192_v40  ;;  %v2146_v37 = vadd.f32 %v1977_v42, %v10669_v14  ;;  %v1194_v48 = vpop.f32.mrb[19].mxu0  ;;  %v1979_v51 = vpop.f32.mrb[19].mxu1 }
 0x26b   : > { %v1427_v52 = vmax.f32 %v1371_v35, 0.0  ;;  %v2201_v55 = vmax.f32 %v2145_v39, 0.0  ;;  %v1373_v56 = vadd.f32 %v10673_v15, %v1194_v48  ;;  %v2147_v57 = vadd.f32 %v1979_v51, %v10673_v15 }
 0x26c   : > { %v10777_v58 = vmax.f32 %v1426_v43, %v2200_v46  ;;  %v1428_v59 = vmax.f32 %v1372_v47, 0.0  ;;  %v2202_v60 = vmax.f32 %v2146_v37, 0.0  ;;  %8026 = vmatmul.mubr.msk.bf16.gmra.mrb[68].mxu0 %vm545_vm1, %v9860_v61  ;;  %8085 = vmatmul.mubr.msk.bf16.gmra.mrb[68].mxu1 %vm545_vm1, %v9860_v61  ;;  %v9861_v43 = vld [vmem:[%s10263_s10 + $0x98] sm:$0xff]  }
 0x26d   : > { %v10782_v62 = vmax.f32 %v1427_v52, %v2201_v55  ;;  %v1429_v63 = vmax.f32 %v1373_v56, 0.0  ;;  %v2203_v0 = vmax.f32 %v2147_v57, 0.0  ;;  %2569 = vmatprep.mubr.bf16.mxu0 %v10761_v26  ;;  %3424 = vmatprep.mubr.bf16.mxu1 %v10761_v26 }
 0x26e   : > { %v10786_v49 = vmax.f32 %v1428_v59, %v2202_v60 }
 0x26f   : > { %v10788_v1 = vmax.f32 %v1429_v63, %v2203_v0  ;;  %v1198_v2 = vpop.f32.mrb[20].mxu0  ;;  %v1983_v4 = vpop.f32.mrb[20].mxu1 }
 0x270   : > { %v1374_v5 = vadd.f32 %v10669_v14, %v1198_v2  ;;  %v2148_v6 = vadd.f32 %v1983_v4, %v10669_v14  ;;  %v1200_v8 = vpop.f32.mrb[21].mxu0  ;;  %v1985_v9 = vpop.f32.mrb[21].mxu1 }
 0x271   : > { %v1375_v12 = vadd.f32 %v10673_v15, %v1200_v8  ;;  %v2149_v16 = vadd.f32 %v1985_v9, %v10673_v15  ;;  %v1202_v20 = vpop.f32.mrb[22].mxu0  ;;  %v1987_v21 = vpop.f32.mrb[22].mxu1 }
 0x272   : > { %v1430_v22 = vmax.f32 %v1374_v5, 0.0  ;;  %v2204_v24 = vmax.f32 %v2148_v6, 0.0  ;;  %v1376_v25 = vadd.f32 %v10669_v14, %v1202_v20  ;;  %v2150_v29 = vadd.f32 %v1987_v21, %v10669_v14  ;;  %v1204_v30 = vpop.f32.mrb[23].mxu0  ;;  %v1989_v31 = vpop.f32.mrb[23].mxu1 }
 0x273   : > { %v1431_v32 = vmax.f32 %v1375_v12, 0.0  ;;  %v2205_v33 = vmax.f32 %v2149_v16, 0.0  ;;  %v1377_v34 = vadd.f32 %v10673_v15, %v1204_v30  ;;  %v2151_v35 = vadd.f32 %v1989_v31, %v10673_v15  ;;  %v9862_v30 = vld [vmem:[%s10263_s10 + $0xa0] sm:$0xff]  }
 0x274   : > { %v10798_v39 = vmax.f32 %v1430_v22, %v2204_v24  ;;  %v1432_v40 = vmax.f32 %v1376_v25, 0.0  ;;  %v2206_v42 = vmax.f32 %v2150_v29, 0.0  ;;  %8027 = vmatmul.mubr.msk.bf16.gmra.mrb[72].mxu0 %vm545_vm1, %v9861_v43  ;;  %8086 = vmatmul.mubr.msk.bf16.gmra.mrb[72].mxu1 %vm545_vm1, %v9861_v43 }
 0x275   : > { %v10803_v46 = vmax.f32 %v1431_v32, %v2205_v33  ;;  %v1433_v47 = vmax.f32 %v1377_v34, 0.0  ;;  %v2207_v37 = vmax.f32 %v2151_v35, 0.0  ;;  %2579 = vmatprep.mubr.bf16.mxu0 %v10761_v26  ;;  %3434 = vmatprep.mubr.bf16.mxu1 %v10761_v26 }
 0x276   : > { %v10807_v48 = vmax.f32 %v1432_v40, %v2206_v42 }
 0x277   : > { %v10809_v51 = vmax.f32 %v1433_v47, %v2207_v37  ;;  %v1208_v52 = vpop.f32.mrb[24].mxu0  ;;  %v1993_v55 = vpop.f32.mrb[24].mxu1 }
 0x278   : > { %v1378_v56 = vadd.f32 %v10669_v14, %v1208_v52  ;;  %v2152_v57 = vadd.f32 %v1993_v55, %v10669_v14  ;;  %v1210_v59 = vpop.f32.mrb[25].mxu0  ;;  %v1995_v60 = vpop.f32.mrb[25].mxu1 }
 0x279   : > { %v1379_v61 = vadd.f32 %v10673_v15, %v1210_v59  ;;  %v2153_v63 = vadd.f32 %v1995_v60, %v10673_v15  ;;  %v1212_v0 = vpop.f32.mrb[26].mxu0  ;;  %v1997_v2 = vpop.f32.mrb[26].mxu1 }
 0x27a   : > { %v1434_v4 = vmax.f32 %v1378_v56, 0.0  ;;  %v2208_v5 = vmax.f32 %v2152_v57, 0.0  ;;  %v1380_v6 = vadd.f32 %v10669_v14, %v1212_v0  ;;  %v2154_v8 = vadd.f32 %v1997_v2, %v10669_v14  ;;  %v1214_v9 = vpop.f32.mrb[27].mxu0  ;;  %v1999_v12 = vpop.f32.mrb[27].mxu1 }
 0x27b   : > { %v1435_v16 = vmax.f32 %v1379_v61, 0.0  ;;  %v2209_v20 = vmax.f32 %v2153_v63, 0.0  ;;  %v1381_v21 = vadd.f32 %v10673_v15, %v1214_v9  ;;  %v2155_v22 = vadd.f32 %v1999_v12, %v10673_v15 }
 0x27c   : > { %v10819_v24 = vmax.f32 %v1434_v4, %v2208_v5  ;;  %v1436_v25 = vmax.f32 %v1380_v6, 0.0  ;;  %v2210_v29 = vmax.f32 %v2154_v8, 0.0  ;;  %8028 = vmatmul.mubr.msk.bf16.gmra.mrb[76].mxu0 %vm545_vm1, %v9862_v30  ;;  %8087 = vmatmul.mubr.msk.bf16.gmra.mrb[76].mxu1 %vm545_vm1, %v9862_v30 }
 0x27d   : > { %v10824_v31 = vmax.f32 %v1435_v16, %v2209_v20  ;;  %v1437_v32 = vmax.f32 %v1381_v21, 0.0  ;;  %v2211_v33 = vmax.f32 %v2155_v22, 0.0  ;;  %2589 = vmatprep.mubr.bf16.mxu0 %v10761_v26  ;;  %3444 = vmatprep.mubr.bf16.mxu1 %v10761_v26  ;;  %v9863_v21 = vld [vmem:[%s10263_s10 + $0xa8] sm:$0xff]  }
 0x27e   : > { %v10828_v34 = vmax.f32 %v1436_v25, %v2210_v29 }
 0x27f   : > { %v10830_v35 = vmax.f32 %v1437_v32, %v2211_v33  ;;  %v1218_v40 = vpop.f32.mrb[28].mxu0  ;;  %v2003_v42 = vpop.f32.mrb[28].mxu1 }
 0x280   : > { %v1382_v43 = vadd.f32 %v10669_v14, %v1218_v40  ;;  %v2156_v47 = vadd.f32 %v2003_v42, %v10669_v14  ;;  %v1220_v37 = vpop.f32.mrb[29].mxu0  ;;  %v2005_v52 = vpop.f32.mrb[29].mxu1 }
 0x281   : > { %v1383_v55 = vadd.f32 %v10673_v15, %v1220_v37  ;;  %v2157_v56 = vadd.f32 %v2005_v52, %v10673_v15  ;;  %v1222_v57 = vpop.f32.mrb[30].mxu0  ;;  %v2007_v59 = vpop.f32.mrb[30].mxu1 }
 0x282   : > { %v1438_v60 = vmax.f32 %v1382_v43, 0.0  ;;  %v2212_v61 = vmax.f32 %v2156_v47, 0.0  ;;  %v1384_v63 = vadd.f32 %v10669_v14, %v1222_v57  ;;  %v2158_v0 = vadd.f32 %v2007_v59, %v10669_v14  ;;  %v1224_v2 = vpop.f32.mrb[31].mxu0  ;;  %v2009_v4 = vpop.f32.mrb[31].mxu1 }
 0x283   : > { %v1439_v5 = vmax.f32 %v1383_v55, 0.0  ;;  %v2213_v6 = vmax.f32 %v2157_v56, 0.0  ;;  %v1385_v8 = vadd.f32 %v10673_v15, %v1224_v2  ;;  %v2159_v9 = vadd.f32 %v2009_v4, %v10673_v15 }
 0x284   : > { %v10840_v12 = vmax.f32 %v1438_v60, %v2212_v61  ;;  %v1440_v16 = vmax.f32 %v1384_v63, 0.0  ;;  %v2214_v20 = vmax.f32 %v2158_v0, 0.0  ;;  %8029 = vmatmul.mubr.msk.bf16.gmra.mrb[80].mxu0 %vm545_vm1, %v9863_v21  ;;  %8088 = vmatmul.mubr.msk.bf16.gmra.mrb[80].mxu1 %vm545_vm1, %v9863_v21  ;;  %v9864_v21 = vld [vmem:[%s10263_s10 + $0xb0] sm:$0xff]  }
 0x285   : > { %v10845_v22 = vmax.f32 %v1439_v5, %v2213_v6  ;;  %v1441_v25 = vmax.f32 %v1385_v8, 0.0  ;;  %v2215_v29 = vmax.f32 %v2159_v9, 0.0  ;;  %2599 = vmatprep.mubr.bf16.mxu0 %v10761_v26  ;;  %3454 = vmatprep.mubr.bf16.mxu1 %v10761_v26 }
 0x286   : > { %v10849_v30 = vmax.f32 %v1440_v16, %v2214_v20 }
 0x287   : > { %v10851_v32 = vmax.f32 %v1441_v25, %v2215_v29  ;;  %v1228_v33 = vpop.f32.mrb[32].mxu0  ;;  %v2013_v40 = vpop.f32.mrb[32].mxu1 }
 0x288   : > { %v1386_v42 = vadd.f32 %v10669_v14, %v1228_v33  ;;  %v2160_v43 = vadd.f32 %v2013_v40, %v10669_v14  ;;  %v1230_v47 = vpop.f32.mrb[33].mxu0  ;;  %v2015_v37 = vpop.f32.mrb[33].mxu1 }
 0x289   : > { %v1387_v52 = vadd.f32 %v10673_v15, %v1230_v47  ;;  %v2161_v55 = vadd.f32 %v2015_v37, %v10673_v15  ;;  %v1232_v56 = vpop.f32.mrb[34].mxu0  ;;  %v2017_v57 = vpop.f32.mrb[34].mxu1 }
 0x28a   : > { %v1442_v59 = vmax.f32 %v1386_v42, 0.0  ;;  %v2216_v60 = vmax.f32 %v2160_v43, 0.0  ;;  %v1388_v61 = vadd.f32 %v10669_v14, %v1232_v56  ;;  %v2162_v63 = vadd.f32 %v2017_v57, %v10669_v14  ;;  %v1234_v0 = vpop.f32.mrb[35].mxu0  ;;  %v2019_v2 = vpop.f32.mrb[35].mxu1 }
 0x28b   : > { %v1443_v4 = vmax.f32 %v1387_v52, 0.0  ;;  %v2217_v5 = vmax.f32 %v2161_v55, 0.0  ;;  %v1389_v6 = vadd.f32 %v10673_v15, %v1234_v0  ;;  %v2163_v8 = vadd.f32 %v2019_v2, %v10673_v15 }
 0x28c   : > { %v10861_v9 = vmax.f32 %v1442_v59, %v2216_v60  ;;  %v1444_v16 = vmax.f32 %v1388_v61, 0.0  ;;  %v2218_v20 = vmax.f32 %v2162_v63, 0.0  ;;  %8030 = vmatmul.mubr.msk.bf16.gmra.mrb[84].mxu0 %vm545_vm1, %v9864_v21  ;;  %8089 = vmatmul.mubr.msk.bf16.gmra.mrb[84].mxu1 %vm545_vm1, %v9864_v21 }
 0x28d   : > { %v10866_v25 = vmax.f32 %v1443_v4, %v2217_v5  ;;  %v1445_v29 = vmax.f32 %v1389_v6, 0.0  ;;  %v2219_v33 = vmax.f32 %v2163_v8, 0.0  ;;  %2609 = vmatprep.mubr.bf16.mxu0 %v10761_v26  ;;  %3464 = vmatprep.mubr.bf16.mxu1 %v10761_v26 }
 0x28e   : > { %v10870_v40 = vmax.f32 %v1444_v16, %v2218_v20 }
 0x28f   : > { %v10872_v42 = vmax.f32 %v1445_v29, %v2219_v33  ;;  %v1238_v43 = vpop.f32.mrb[36].mxu0  ;;  %v2023_v47 = vpop.f32.mrb[36].mxu1 }
 0x290   : > { %v1390_v37 = vadd.f32 %v10669_v14, %v1238_v43  ;;  %v2164_v52 = vadd.f32 %v2023_v47, %v10669_v14  ;;  %v1240_v55 = vpop.f32.mrb[37].mxu0  ;;  %v2025_v56 = vpop.f32.mrb[37].mxu1  ;;  %v9865_v47 = vld [vmem:[%s10263_s10 + $0xb8] sm:$0xff]  }
 0x291   : > { %v1391_v57 = vadd.f32 %v10673_v15, %v1240_v55  ;;  %v2165_v59 = vadd.f32 %v2025_v56, %v10673_v15  ;;  %v1242_v60 = vpop.f32.mrb[38].mxu0  ;;  %v2027_v61 = vpop.f32.mrb[38].mxu1 }
 0x292   : > { %v1446_v63 = vmax.f32 %v1390_v37, 0.0  ;;  %v2220_v0 = vmax.f32 %v2164_v52, 0.0  ;;  %v1392_v2 = vadd.f32 %v10669_v14, %v1242_v60  ;;  %v2166_v4 = vadd.f32 %v2027_v61, %v10669_v14  ;;  %v1244_v5 = vpop.f32.mrb[39].mxu0  ;;  %v2029_v6 = vpop.f32.mrb[39].mxu1 }
 0x293   : > { %v1447_v8 = vmax.f32 %v1391_v57, 0.0  ;;  %v2221_v16 = vmax.f32 %v2165_v59, 0.0  ;;  %v1393_v20 = vadd.f32 %v10673_v15, %v1244_v5  ;;  %v2167_v21 = vadd.f32 %v2029_v6, %v10673_v15 }
 0x294   : > { %v10882_v29 = vmax.f32 %v1446_v63, %v2220_v0  ;;  %v1448_v33 = vmax.f32 %v1392_v2, 0.0  ;;  %v2222_v43 = vmax.f32 %v2166_v4, 0.0  ;;  %8031 = vmatmul.mubr.msk.bf16.gmra.mrb[88].mxu0 %vm545_vm1, %v9865_v47  ;;  %8090 = vmatmul.mubr.msk.bf16.gmra.mrb[88].mxu1 %vm545_vm1, %v9865_v47 }
 0x295   : > { %v10887_v37 = vmax.f32 %v1447_v8, %v2221_v16  ;;  %v1449_v52 = vmax.f32 %v1393_v20, 0.0  ;;  %v2223_v55 = vmax.f32 %v2167_v21, 0.0  ;;  %2619 = vmatprep.mubr.bf16.mxu0 %v10761_v26  ;;  %3474 = vmatprep.mubr.bf16.mxu1 %v10761_v26 }
 0x296   : > { %v10891_v56 = vmax.f32 %v1448_v33, %v2222_v43 }
 0x297   : > { %v10893_v57 = vmax.f32 %v1449_v52, %v2223_v55  ;;  %v1248_v59 = vpop.f32.mrb[40].mxu0  ;;  %v2033_v60 = vpop.f32.mrb[40].mxu1 }
 0x298   : > { %12483 = vst [vmem:[#allocation15_spill] sm:$0xff] %v10891_v56  ;;  %v1394_v61 = vadd.f32 %v10669_v14, %v1248_v59  ;;  %v2168_v63 = vadd.f32 %v2033_v60, %v10669_v14  ;;  %v1250_v0 = vpop.f32.mrb[41].mxu0  ;;  %v2035_v2 = vpop.f32.mrb[41].mxu1 }
 0x299   : > { %12484 = vst [vmem:[#allocation16_spill] sm:$0xff] %v10893_v57  ;;  %v1395_v4 = vadd.f32 %v10673_v15, %v1250_v0  ;;  %v2169_v5 = vadd.f32 %v2035_v2, %v10673_v15  ;;  %v1252_v6 = vpop.f32.mrb[42].mxu0  ;;  %v2037_v8 = vpop.f32.mrb[42].mxu1 }
 0x29a   : > { %v1450_v16 = vmax.f32 %v1394_v61, 0.0  ;;  %v2224_v20 = vmax.f32 %v2168_v63, 0.0  ;;  %v1396_v21 = vadd.f32 %v10669_v14, %v1252_v6  ;;  %v2170_v33 = vadd.f32 %v2037_v8, %v10669_v14  ;;  %v1254_v43 = vpop.f32.mrb[43].mxu0  ;;  %v2039_v47 = vpop.f32.mrb[43].mxu1 }
 0x29b   : > { %v1451_v52 = vmax.f32 %v1395_v4, 0.0  ;;  %v2225_v55 = vmax.f32 %v2169_v5, 0.0  ;;  %v1397_v59 = vadd.f32 %v10673_v15, %v1254_v43  ;;  %v2171_v60 = vadd.f32 %v2039_v47, %v10673_v15 }
 0x29c   : > { %v10903_v0 = vmax.f32 %v1450_v16, %v2224_v20  ;;  %v1452_v2 = vmax.f32 %v1396_v21, 0.0  ;;  %v2226_v13 = vmax.f32 %v2170_v33, 0.0  ;;  %8032 = vmatmul.mubr.msk.bf16.gmra.mrb[92].mxu0 %vm545_vm1, %v9866_v11  ;;  %8091 = vmatmul.mubr.msk.bf16.gmra.mrb[92].mxu1 %vm545_vm1, %v9866_v11 }
 0x29d   : > { %v10908_v61 = vmax.f32 %v1451_v52, %v2225_v55  ;;  %v1453_v63 = vmax.f32 %v1397_v59, 0.0  ;;  %v2227_v6 = vmax.f32 %v2171_v60, 0.0  ;;  %2629 = vmatprep.mubr.bf16.mxu0 %v10761_v26  ;;  %3484 = vmatprep.mubr.bf16.mxu1 %v10761_v26 }
 0x29e   : > { %12485 = vst [vmem:[#allocation17_spill] sm:$0xff] %v10903_v0  ;;  %v10912_v4 = vmax.f32 %v1452_v2, %v2226_v13 }
 0x29f   : > { %12486 = vst [vmem:[#allocation18_spill] sm:$0xff] %v10908_v61  ;;  %v10914_v5 = vmax.f32 %v1453_v63, %v2227_v6  ;;  %v1258_v8 = vpop.f32.mrb[44].mxu0  ;;  %v2043_v16 = vpop.f32.mrb[44].mxu1  ;;  %v9867_v61 = vld [vmem:[%s10263_s10 + $0xc8] sm:$0xff]  }
 0x2a0   : > { %12487 = vst [vmem:[#allocation19_spill] sm:$0xff] %v10912_v4  ;;  %v1398_v20 = vadd.f32 %v10669_v14, %v1258_v8  ;;  %v2172_v21 = vadd.f32 %v2043_v16, %v10669_v14  ;;  %v1260_v33 = vpop.f32.mrb[45].mxu0  ;;  %v2045_v11 = vpop.f32.mrb[45].mxu1 }
 0x2a1   : > { %12488 = vst [vmem:[#allocation20_spill] sm:$0xff] %v10914_v5  ;;  %v1399_v43 = vadd.f32 %v10673_v15, %v1260_v33  ;;  %v2173_v47 = vadd.f32 %v2045_v11, %v10673_v15  ;;  %v1262_v52 = vpop.f32.mrb[46].mxu0  ;;  %v2047_v55 = vpop.f32.mrb[46].mxu1 }
 0x2a2   : > { %v1454_v59 = vmax.f32 %v1398_v20, 0.0  ;;  %v2228_v13 = vmax.f32 %v2172_v21, 0.0  ;;  %v1400_v60 = vadd.f32 %v10669_v14, %v1262_v52  ;;  %v2174_v2 = vadd.f32 %v2047_v55, %v10669_v14  ;;  %v1264_v63 = vpop.f32.mrb[47].mxu0  ;;  %v2049_v6 = vpop.f32.mrb[47].mxu1 }
 0x2a3   : > { %v1455_v8 = vmax.f32 %v1399_v43, 0.0  ;;  %v2229_v10 = vmax.f32 %v2173_v47, 0.0  ;;  %v1401_v16 = vadd.f32 %v10673_v15, %v1264_v63  ;;  %v2175_v5 = vadd.f32 %v2049_v6, %v10673_v15 }
 0x2a4   : > { %v10924_v33 = vmax.f32 %v1454_v59, %v2228_v13  ;;  %v1456_v11 = vmax.f32 %v1400_v60, 0.0  ;;  %v2230_v4 = vmax.f32 %v2174_v2, 0.0  ;;  %8033 = vmatmul.mubr.msk.bf16.gmra.mrb[96].mxu0 %vm545_vm1, %v9867_v61  ;;  %8092 = vmatmul.mubr.msk.bf16.gmra.mrb[96].mxu1 %vm545_vm1, %v9867_v61 }
 0x2a5   : > { %v10929_v20 = vmax.f32 %v1455_v8, %v2229_v10  ;;  %v1457_v21 = vmax.f32 %v1401_v16, 0.0  ;;  %v2231_v52 = vmax.f32 %v2175_v5, 0.0  ;;  %2639 = vmatprep.mubr.bf16.mxu0 %v10761_v26  ;;  %3494 = vmatprep.mubr.bf16.mxu1 %v10761_v26 }
 0x2a6   : > { %12489 = vst [vmem:[#allocation21_spill] sm:$0xff] %v10924_v33  ;;  %v10933_v43 = vmax.f32 %v1456_v11, %v2230_v4  ;;  %v9868_v33 = vld [vmem:[%s10263_s10 + $0xd0] sm:$0xff]  }
 0x2a7   : > { %12490 = vst [vmem:[#allocation22_spill] sm:$0xff] %v10929_v20  ;;  %v10935_v47 = vmax.f32 %v1457_v21, %v2231_v52  ;;  %v1268_v55 = vpop.f32.mrb[48].mxu0  ;;  %v2053_v59 = vpop.f32.mrb[48].mxu1 }
 0x2a8   : > { %12491 = vst [vmem:[#allocation23_spill] sm:$0xff] %v10933_v43  ;;  %v1402_v13 = vadd.f32 %v10669_v14, %v1268_v55  ;;  %v2176_v60 = vadd.f32 %v2053_v59, %v10669_v14  ;;  %v1270_v2 = vpop.f32.mrb[49].mxu0  ;;  %v2055_v61 = vpop.f32.mrb[49].mxu1 }
 0x2a9   : > { %12492 = vst [vmem:[#allocation24_spill] sm:$0xff] %v10935_v47  ;;  %v1403_v10 = vadd.f32 %v10673_v15, %v1270_v2  ;;  %v2177_v5 = vadd.f32 %v2055_v61, %v10673_v15  ;;  %v1272_v63 = vpop.f32.mrb[50].mxu0  ;;  %v2057_v6 = vpop.f32.mrb[50].mxu1 }
 0x2aa   : > { %v1458_v8 = vmax.f32 %v1402_v13, 0.0  ;;  %v2232_v4 = vmax.f32 %v2176_v60, 0.0  ;;  %v1404_v16 = vadd.f32 %v10669_v14, %v1272_v63  ;;  %v2178_v11 = vadd.f32 %v2057_v6, %v10669_v14  ;;  %v1274_v21 = vpop.f32.mrb[51].mxu0  ;;  %v2059_v52 = vpop.f32.mrb[51].mxu1  ;;  %v9519_v13 = vld [vmem:[#allocation7 + $0xe4] ss:$8 sps:$4 sm:$0xff]  }
 0x2ab   : > { %v1459_v55 = vmax.f32 %v1403_v10, 0.0  ;;  %v2233_v47 = vmax.f32 %v2177_v5, 0.0  ;;  %v1405_v59 = vadd.f32 %v10673_v15, %v1274_v21  ;;  %v2179_v43 = vadd.f32 %v2059_v52, %v10673_v15  ;;  %4252 = vmatprep.subr.bf16.mxu0 %v9519_v13 }
 0x2ac   : > { %v10945_v2 = vmax.f32 %v1458_v8, %v2232_v4  ;;  %v1460_v61 = vmax.f32 %v1404_v16, 0.0  ;;  %v2234_v20 = vmax.f32 %v2178_v11, 0.0  ;;  %8034 = vmatmul.mubr.msk.bf16.gmra.mrb[100].mxu0 %vm545_vm1, %v9868_v33  ;;  %8093 = vmatmul.mubr.msk.bf16.gmra.mrb[100].mxu1 %vm545_vm1, %v9868_v33 }
 0x2ad   : > { %v10950_v60 = vmax.f32 %v1459_v55, %v2233_v47  ;;  %v1461_v63 = vmax.f32 %v1405_v59, 0.0  ;;  %v2235_v6 = vmax.f32 %v2179_v43, 0.0  ;;  %2649 = vmatprep.mubr.bf16.mxu0 %v10761_v26  ;;  %3504 = vmatprep.mubr.bf16.mxu1 %v10761_v26 }
 0x2ae   : > { %12493 = vst [vmem:[#allocation25_spill] sm:$0xff] %v10945_v2  ;;  %v10954_v10 = vmax.f32 %v1460_v61, %v2234_v20 }
 0x2af   : > { %12494 = vst [vmem:[#allocation26_spill] sm:$0xff] %v10950_v60  ;;  %v10956_v5 = vmax.f32 %v1461_v63, %v2235_v6  ;;  %v1278_v8 = vpop.f32.mrb[52].mxu0  ;;  %v2063_v4 = vpop.f32.mrb[52].mxu1 }
 0x2b0   : > { %12495 = vst [vmem:[#allocation27_spill] sm:$0xff] %v10954_v10  ;;  %v1406_v16 = vadd.f32 %v10669_v14, %v1278_v8  ;;  %v2180_v33 = vadd.f32 %v2063_v4, %v10669_v14  ;;  %v1280_v11 = vpop.f32.mrb[53].mxu0  ;;  %v2065_v47 = vpop.f32.mrb[53].mxu1 }
 0x2b1   : > { %12496 = vst [vmem:[#allocation28_spill] sm:$0xff] %v10956_v5  ;;  %v1407_v21 = vadd.f32 %v10673_v15, %v1280_v11  ;;  %v2181_v43 = vadd.f32 %v2065_v47, %v10673_v15  ;;  %v1282_v52 = vpop.f32.mrb[54].mxu0  ;;  %v2067_v55 = vpop.f32.mrb[54].mxu1 }
 0x2b2   : > { %v1462_v20 = vmax.f32 %v1406_v16, 0.0  ;;  %v2236_v59 = vmax.f32 %v2180_v33, 0.0  ;;  %v1408_v61 = vadd.f32 %v10669_v14, %v1282_v52  ;;  %v2182_v13 = vadd.f32 %v2067_v55, %v10669_v14  ;;  %v1284_v63 = vpop.f32.mrb[55].mxu0  ;;  %v2069_v6 = vpop.f32.mrb[55].mxu1  ;;  %v9869_v16 = vld [vmem:[%s10263_s10 + $0xd8] sm:$0xff]  }
 0x2b3   : > { %v1463_v8 = vmax.f32 %v1407_v21, 0.0  ;;  %v2237_v5 = vmax.f32 %v2181_v43, 0.0  ;;  %v1409_v4 = vadd.f32 %v10673_v15, %v1284_v63  ;;  %v2183_v11 = vadd.f32 %v2069_v6, %v10673_v15  ;;  %v9504_v63 = vld [vmem:[%s10263_s10 + $0x88] sm:$0xff]  }
 0x2b4   : > { %v10966_v10 = vmax.f32 %v1462_v20, %v2236_v59  ;;  %v1464_v47 = vmax.f32 %v1408_v61, 0.0  ;;  %v2238_v60 = vmax.f32 %v2182_v13, 0.0  ;;  %8035 = vmatmul.mubr.msk.bf16.gmra.mrb[104].mxu0 %vm545_vm1, %v9869_v16  ;;  %8094 = vmatmul.mubr.msk.bf16.gmra.mrb[104].mxu1 %vm545_vm1, %v9869_v16  ;;  %v9870_v20 = vld [vmem:[%s10263_s10 + $0xe0] sm:$0xff]  }
 0x2b5   : > { %v10971_v33 = vmax.f32 %v1463_v8, %v2237_v5  ;;  %v1465_v52 = vmax.f32 %v1409_v4, 0.0  ;;  %v2239_v21 = vmax.f32 %v2183_v11, 0.0  ;;  %2659 = vmatprep.mubr.bf16.mxu0 %v10761_v26  ;;  %3514 = vmatprep.mubr.bf16.mxu1 %v10761_v26  ;;  %v9503_v5 = vld [vmem:[%s10263_s10 + $0x80] sm:$0xff]   ;;  %v9526_v4 = vld [vmem:[#allocation7 + $0x110] ss:$8 sps:$4 sm:$0xff]  }
 0x2b6   : > { %12497 = vst [vmem:[#allocation29_spill] sm:$0xff] %v10966_v10  ;;  %v10975_v43 = vmax.f32 %v1464_v47, %v2238_v60  ;;  %v9517_v59 = vld [vmem:[#allocation7 + $0xe0] ss:$8 sps:$4 sm:$0xff]   ;;  %v9522_v61 = vld [vmem:[#allocation7 + $0xf4] ss:$8 sps:$4 sm:$0xff]  }
 0x2b7   : > { %12498 = vst [vmem:[#allocation30_spill] sm:$0xff] %v10971_v33  ;;  %v10977_v55 = vmax.f32 %v1465_v52, %v2239_v21  ;;  %v9520_v60 = vld [vmem:[#allocation7 + $0xf0] ss:$8 sps:$4 sm:$0xff]   ;;  %v9525_v13 = vld [vmem:[#allocation7 + $0x104] ss:$8 sps:$4 sm:$0xff]  }
 0x2b8   : > { %12499 = vst [vmem:[#allocation31_spill] sm:$0xff] %v10975_v43  ;;  %v9523_v6 = vld [vmem:[#allocation7 + $0x100] ss:$8 sps:$4 sm:$0xff]   ;;  %v9528_v8 = vld [vmem:[#allocation7 + $0x114] ss:$8 sps:$4 sm:$0xff]  }
 0x2b9   : > { %12500 = vst [vmem:[#allocation32_spill] sm:$0xff] %v10977_v55  ;;  %v9531_v11 = vld [vmem:[#allocation7 + $0x124] ss:$8 sps:$4 sm:$0xff]   ;;  %v9529_v16 = vld [vmem:[#allocation7 + $0x120] ss:$8 sps:$4 sm:$0xff]  }
 0x2ba   : > { %v9505_v47 = vld [vmem:[%s10263_s10 + $0x90] sm:$0xff]  }
 0x2bb   : > { %v9534_v52 = vld [vmem:[#allocation7 + $0x134] ss:$8 sps:$4 sm:$0xff]   ;;  %v9532_v21 = vld [vmem:[#allocation7 + $0x130] ss:$8 sps:$4 sm:$0xff]  }
 0x2bc   : > { %8036 = vmatmul.mubr.msk.bf16.gmra.mrb[108].mxu0 %vm545_vm1, %v9870_v20  ;;  %8095 = vmatmul.mubr.msk.bf16.gmra.mrb[108].mxu1 %vm545_vm1, %v9870_v20  ;;  %v9537_v20 = vld [vmem:[#allocation7 + $0x144] ss:$8 sps:$4 sm:$0xff]  }
 0x2bd   : > { %2814 = vmatprep.mubr.bf16.mxu0 %v10761_v26  ;;  %3557 = vmatprep.mubr.bf16.mxu1 %v10761_v26 }
 0x2c4   : > { %8052 = vmatmul.mubr.msk.bf16.vlgmr.msra.gmra.mrb[56].mxu0 %vm545_vm1, %v9503_v5  ;;  %8097 = vmatmul.mubr.msk.bf16.vlgmr.msra.gmra.mrb[56].mxu1 %vm545_vm1, %v9503_v5  ;;  %v9506_v5 = vld [vmem:[%s10263_s10 + $0x98] sm:$0xff]  }
 0x2c5   : > { %2824 = vmatprep.mubr.bf16.mxu0 %v10761_v26  ;;  %3567 = vmatprep.mubr.bf16.mxu1 %v10761_v26 }
 0x2c6   : > { %4253 = vmatpush1.bf16.msra.mxu0 %v9517_v59  ;;  %v9535_v59 = vld [vmem:[#allocation7 + $0x140] ss:$8 sps:$4 sm:$0xff]  }
 0x2c7   : > { %4254 = vmatprep.subr.bf16.mxu0 %v9522_v61  ;;  %v9540_v61 = vld [vmem:[#allocation7 + $0x154] ss:$8 sps:$4 sm:$0xff]  }
 0x2ca   : > { %4255 = vmatpush1.bf16.msra.mxu0 %v9520_v60  ;;  %v9538_v60 = vld [vmem:[#allocation7 + $0x150] ss:$8 sps:$4 sm:$0xff]  }
 0x2cb   : > { %4256 = vmatprep.subr.bf16.mxu0 %v9525_v13  ;;  %v9543_v13 = vld [vmem:[#allocation7 + $0x164] ss:$8 sps:$4 sm:$0xff]  }
 0x2cc   : > { %8053 = vmatmul.mubr.msk.bf16.gmra.mrb[60].mxu0 %vm545_vm1, %v9504_v63  ;;  %8098 = vmatmul.mubr.msk.bf16.gmra.mrb[60].mxu1 %vm545_vm1, %v9504_v63  ;;  %v9507_v63 = vld [vmem:[%s10263_s10 + $0xa0] sm:$0xff]  }
 0x2cd   : > { %2834 = vmatprep.mubr.bf16.mxu0 %v10761_v26  ;;  %3577 = vmatprep.mubr.bf16.mxu1 %v10761_v26 }
 0x2ce   : > { %4257 = vmatpush1.bf16.msra.mxu0 %v9523_v6  ;;  %v9541_v6 = vld [vmem:[#allocation7 + $0x160] ss:$8 sps:$4 sm:$0xff]  }
 0x2cf   : > { %4258 = vmatprep.subr.bf16.mxu0 %v9528_v8  ;;  %v9546_v8 = vld [vmem:[#allocation7 + $0x174] ss:$8 sps:$4 sm:$0xff]  }
 0x2d2   : > { %4259 = vmatpush1.bf16.msra.mxu0 %v9526_v4  ;;  %v9544_v4 = vld [vmem:[#allocation7 + $0x170] ss:$8 sps:$4 sm:$0xff]  }
 0x2d3   : > { %4260 = vmatprep.subr.bf16.mxu0 %v9531_v11  ;;  %v9549_v11 = vld [vmem:[#allocation7 + $0x184] ss:$8 sps:$4 sm:$0xff]  }
 0x2d4   : > { %8054 = vmatmul.mubr.msk.bf16.gmra.mrb[64].mxu0 %vm545_vm1, %v9505_v47  ;;  %8099 = vmatmul.mubr.msk.bf16.gmra.mrb[64].mxu1 %vm545_vm1, %v9505_v47  ;;  %v9508_v47 = vld [vmem:[%s10263_s10 + $0xa8] sm:$0xff]  }
 0x2d5   : > { %2844 = vmatprep.mubr.bf16.mxu0 %v10761_v26  ;;  %3587 = vmatprep.mubr.bf16.mxu1 %v10761_v26 }
 0x2d6   : > { %4261 = vmatpush1.bf16.msra.mxu0 %v9529_v16  ;;  %v9547_v16 = vld [vmem:[#allocation7 + $0x180] ss:$8 sps:$4 sm:$0xff]  }
 0x2d7   : > { %4262 = vmatprep.subr.bf16.mxu0 %v9534_v52  ;;  %v9552_v52 = vld [vmem:[#allocation7 + $0x194] ss:$8 sps:$4 sm:$0xff]  }
 0x2da   : > { %4263 = vmatpush1.bf16.msra.mxu0 %v9532_v21  ;;  %v9550_v21 = vld [vmem:[#allocation7 + $0x190] ss:$8 sps:$4 sm:$0xff]  }
 0x2db   : > { %4264 = vmatprep.subr.bf16.mxu0 %v9537_v20  ;;  %v9509_v20 = vld [vmem:[%s10263_s10 + $0xb0] sm:$0xff]  }
 0x2dc   : > { %8055 = vmatmul.mubr.msk.bf16.gmra.mrb[68].mxu0 %vm545_vm1, %v9506_v5  ;;  %8100 = vmatmul.mubr.msk.bf16.gmra.mrb[68].mxu1 %vm545_vm1, %v9506_v5  ;;  %v9510_v5 = vld [vmem:[%s10263_s10 + $0xb8] sm:$0xff]  }
 0x2dd   : > { %2854 = vmatprep.mubr.bf16.mxu0 %v10761_v26  ;;  %3597 = vmatprep.mubr.bf16.mxu1 %v10761_v26 }
 0x2de   : > { %4265 = vmatpush1.bf16.msra.mxu0 %v9535_v59  ;;  %v9511_v59 = vld [vmem:[%s10263_s10 + $0xc0] sm:$0xff]  }
 0x2df   : > { %4266 = vmatprep.subr.bf16.mxu0 %v9540_v61  ;;  %v9512_v61 = vld [vmem:[%s10263_s10 + $0xc8] sm:$0xff]  }
 0x2e2   : > { %4267 = vmatpush1.bf16.msra.mxu0 %v9538_v60  ;;  %v9513_v60 = vld [vmem:[%s10263_s10 + $0xd0] sm:$0xff]  }
 0x2e3   : > { %4268 = vmatprep.subr.bf16.mxu0 %v9543_v13  ;;  %v9514_v13 = vld [vmem:[%s10263_s10 + $0xd8] sm:$0xff]  }
 0x2e4   : > { %8056 = vmatmul.mubr.msk.bf16.gmra.mrb[72].mxu0 %vm545_vm1, %v9507_v63  ;;  %8101 = vmatmul.mubr.msk.bf16.gmra.mrb[72].mxu1 %vm545_vm1, %v9507_v63  ;;  %v9515_v63 = vld [vmem:[%s10263_s10 + $0xe0] sm:$0xff]  }
 0x2e5   : > { %2864 = vmatprep.mubr.bf16.mxu0 %v10761_v26  ;;  %3607 = vmatprep.mubr.bf16.mxu1 %v10761_v26 }
 0x2e6   : > { %4269 = vmatpush1.bf16.msra.mxu0 %v9541_v6  ;;  %v9555_v6 = vld [vmem:[#allocation7 + $0x1a4] ss:$8 sps:$4 sm:$0xff]  }
 0x2e7   : > { %4270 = vmatprep.subr.bf16.mxu0 %v9546_v8  ;;  %v9553_v8 = vld [vmem:[#allocation7 + $0x1a0] ss:$8 sps:$4 sm:$0xff]  }
 0x2ea   : > { %4271 = vmatpush1.bf16.msra.mxu0 %v9544_v4  ;;  %v9516_v4 = vld [vmem:[%s10263_s10 + $0xe8] sm:$0xff]   ;;  %s9375_s10 = smul.u32 448, %s10252_s9  ;;  %s7806_s9 = sshll.u32 %s10096_s30, 1 }
 0x2eb   : > { %4272 = vmatprep.subr.bf16.mxu0 %v9549_v11  ;;  %v9558_v11 = vld [vmem:[#allocation7 + $0x1b4] ss:$8 sps:$4 sm:$0xff]   ;;  %p382_p6 = scmp.lt.s32.totalorder %s7806_s9, 3 }
 0x2ec   : > { %8057 = vmatmul.mubr.msk.bf16.gmra.mrb[76].mxu0 %vm545_vm1, %v9508_v47  ;;  %8102 = vmatmul.mubr.msk.bf16.gmra.mrb[76].mxu1 %vm545_vm1, %v9508_v47  ;;  %v9556_v47 = vld [vmem:[#allocation7 + $0x1b0] ss:$8 sps:$4 sm:$0xff]   ;;  %s11534_s15 = scalar_lea.vmem %s12464_s7, %s9375_s10 }
 0x2ed   : > { %2874 = vmatprep.mubr.bf16.mxu0 %v10761_v26  ;;  %3617 = vmatprep.mubr.bf16.mxu1 %v10761_v26  ;;  %s12523_s9 = smov (!%p382_p6, %s7806_s9), 3 }
 0x2ee   : > { %4273 = vmatpush1.bf16.msra.mxu0 %v9547_v16  ;;  %v9561_v16 = vld [vmem:[#allocation7 + $0x4] ss:$8 sps:$4 sm:$0xff]   ;;  %s7807_s11 = sshll.u32 %s12523_s9, 3 }
 0x2ef   : > { %4274 = vmatprep.subr.bf16.mxu0 %v9552_v52 }
 0x2f2   : > { %4275 = vmatpush1.bf16.msra.mxu0 %v9550_v21 }
 0x2f3   : > { %4276 = vmatprep.subr.bf16.mxu0 %v9555_v6 }
 0x2f4   : > { %8058 = vmatmul.mubr.msk.bf16.gmra.mrb[80].mxu0 %vm545_vm1, %v9509_v20  ;;  %8103 = vmatmul.mubr.msk.bf16.gmra.mrb[80].mxu1 %vm545_vm1, %v9509_v20 }
 0x2f5   : > { %2884 = vmatprep.mubr.bf16.mxu0 %v10761_v26  ;;  %3627 = vmatprep.mubr.bf16.mxu1 %v10761_v26 }
 0x2f6   : > { %4277 = vmatpush1.bf16.msra.mxu0 %v9553_v8 }
 0x2f7   : > { %4278 = vmatprep.subr.bf16.mxu0 %v9558_v11 }
 0x2fa   : > { %4279 = vmatpush1.bf16.msra.mxu0 %v9556_v47 }
 0x2fb   : > { %4568 = vmatprep.subr.bf16.mxu0 %v9561_v16 }
 0x2fc   : > { %8059 = vmatmul.mubr.msk.bf16.gmra.mrb[84].mxu0 %vm545_vm1, %v9510_v5  ;;  %8104 = vmatmul.mubr.msk.bf16.gmra.mrb[84].mxu1 %vm545_vm1, %v9510_v5 }
 0x2fd   : > { %2894 = vmatprep.mubr.bf16.mxu0 %v10761_v26  ;;  %3637 = vmatprep.mubr.bf16.mxu1 %v10761_v26 }
 0x304   : > { %8060 = vmatmul.mubr.msk.bf16.gmra.mrb[88].mxu0 %vm545_vm1, %v9511_v59  ;;  %8105 = vmatmul.mubr.msk.bf16.gmra.mrb[88].mxu1 %vm545_vm1, %v9511_v59 }
 0x305   : > { %2904 = vmatprep.mubr.bf16.mxu0 %v10761_v26  ;;  %3647 = vmatprep.mubr.bf16.mxu1 %v10761_v26 }
 0x30c   : > { %8061 = vmatmul.mubr.msk.bf16.gmra.mrb[92].mxu0 %vm545_vm1, %v9512_v61  ;;  %8106 = vmatmul.mubr.msk.bf16.gmra.mrb[92].mxu1 %vm545_vm1, %v9512_v61 }
 0x30d   : > { %2914 = vmatprep.mubr.bf16.mxu0 %v10761_v26  ;;  %3657 = vmatprep.mubr.bf16.mxu1 %v10761_v26 }
 0x314   : > { %8062 = vmatmul.mubr.msk.bf16.gmra.mrb[96].mxu0 %vm545_vm1, %v9513_v60  ;;  %8107 = vmatmul.mubr.msk.bf16.gmra.mrb[96].mxu1 %vm545_vm1, %v9513_v60 }
 0x315   : > { %2924 = vmatprep.mubr.bf16.mxu0 %v10761_v26  ;;  %3667 = vmatprep.mubr.bf16.mxu1 %v10761_v26 }
 0x31c   : > { %8063 = vmatmul.mubr.msk.bf16.gmra.mrb[100].mxu0 %vm545_vm1, %v9514_v13  ;;  %8108 = vmatmul.mubr.msk.bf16.gmra.mrb[100].mxu1 %vm545_vm1, %v9514_v13 }
 0x31d   : > { %2934 = vmatprep.mubr.bf16.mxu0 %v10761_v26  ;;  %3677 = vmatprep.mubr.bf16.mxu1 %v10761_v26 }
 0x324   : > { %8064 = vmatmul.mubr.msk.bf16.gmra.mrb[104].mxu0 %vm545_vm1, %v9515_v63  ;;  %8109 = vmatmul.mubr.msk.bf16.gmra.mrb[104].mxu1 %vm545_vm1, %v9515_v63 }
 0x325   : > { %2944 = vmatprep.mubr.bf16.mxu0 %v10761_v26  ;;  %3687 = vmatprep.mubr.bf16.mxu1 %v10761_v26 }
 0x32c   : > { %8065 = vmatmul.mubr.msk.bf16.gmra.mrb[108].mxu0 %vm545_vm1, %v9516_v4  ;;  %8110 = vmatmul.mubr.msk.bf16.gmra.mrb[108].mxu1 %vm545_vm1, %v9516_v4 }
 0x397   : > { %v2816_v52 = vpop.f32.mrb[56].mxu0  ;;  %v3559_v21 = vpop.f32.mrb[56].mxu1 }
 0x398   : > { %v3011_v20 = vadd.f32 %v2816_v52, %v10669_v14  ;;  %v3754_v26 = vadd.f32 %v3559_v21, %v10669_v14  ;;  %v2818_v5 = vpop.f32.mrb[57].mxu0  ;;  %v3561_v59 = vpop.f32.mrb[57].mxu1 }
 0x399   : > { %v3012_v61 = vadd.f32 %v2818_v5, %v10673_v15  ;;  %v3755_v60 = vadd.f32 %v3561_v59, %v10673_v15  ;;  %v2820_v13 = vpop.f32.mrb[58].mxu0  ;;  %v3563_v63 = vpop.f32.mrb[58].mxu1 }
 0x39a   : > { %v3067_v6 = vmax.f32 %v3011_v20, 0.0  ;;  %v3013_v8 = vadd.f32 %v2820_v13, %v10669_v14  ;;  %v3756_v4 = vadd.f32 %v3563_v63, %v10669_v14  ;;  %v2822_v11 = vpop.f32.mrb[59].mxu0  ;;  %v3565_v47 = vpop.f32.mrb[59].mxu1  ;;  %v3810_v43 = vmax.f32 %v3754_v26, 0.0 }
 0x39b   : > { %v3068_v16 = vmax.f32 %v3012_v61, 0.0  ;;  %v3014_v52 = vadd.f32 %v2822_v11, %v10673_v15  ;;  %v3757_v21 = vadd.f32 %v3565_v47, %v10673_v15  ;;  %v3811_v33 = vmax.f32 %v3755_v60, 0.0 }
 0x39c   : > { %v3123_v55 = vmax.f32 %v10685_v38, %v3067_v6  ;;  %v3069_v5 = vmax.f32 %v3013_v8, 0.0  ;;  %v3812_v2 = vmax.f32 %v3756_v4, 0.0 }
 0x39d   : > { %v3124_v59 = vmax.f32 %v10691_v41, %v3068_v16  ;;  %v3070_v10 = vmax.f32 %v3014_v52, 0.0  ;;  %v3813_v61 = vmax.f32 %v3757_v21, 0.0 }
 0x39e   : > { %v3866_v20 = vmax.f32 %v3123_v55, %v3810_v43  ;;  %v3125_v13 = vmax.f32 %v10695_v44, %v3069_v5 }
 0x39f   : > { %v3867_v63 = vmax.f32 %v3124_v59, %v3811_v33  ;;  %v3126_v0 = vmax.f32 %v10697_v45, %v3070_v10  ;;  %v2826_v57 = vpop.f32.mrb[60].mxu0  ;;  %v3569_v11 = vpop.f32.mrb[60].mxu1 }
 0x3a0   : > { %v3868_v56 = vmax.f32 %v3125_v13, %v3812_v2  ;;  %v3015_v47 = vadd.f32 %v2826_v57, %v10669_v14  ;;  %v3758_v38 = vadd.f32 %v3569_v11, %v10669_v14  ;;  %v2828_v26 = vpop.f32.mrb[61].mxu0  ;;  %v3571_v6 = vpop.f32.mrb[61].mxu1 }
 0x3a1   : > { %v3869_v41 = vmax.f32 %v3126_v0, %v3813_v61  ;;  %v3016_v60 = vadd.f32 %v2828_v26, %v10673_v15  ;;  %v3759_v43 = vadd.f32 %v3571_v6, %v10673_v15  ;;  %v2830_v44 = vpop.f32.mrb[62].mxu0  ;;  %v3573_v55 = vpop.f32.mrb[62].mxu1 }
 0x3a2   : > { %v3927_v33 = vpack.c.bf16 %v3868_v56, %v3866_v20  ;;  %v3071_v8 = vmax.f32 %v3015_v47, 0.0  ;;  %v3017_v45 = vadd.f32 %v2830_v44, %v10669_v14  ;;  %v2832_v10 = vpop.f32.mrb[63].mxu0  ;;  %v3575_v4 = vpop.f32.mrb[63].mxu1  ;;  %v3814_v16 = vmax.f32 %v3758_v38, 0.0 }
 0x3a3   : > { %v3928_v2 = vpack.c.bf16 %v3869_v41, %v3867_v63  ;;  %v3072_v57 = vmax.f32 %v3016_v60, 0.0  ;;  %v3760_v52 = vadd.f32 %v3573_v55, %v10669_v14  ;;  %v3018_v5 = vadd.f32 %v2832_v10, %v10673_v15 }
 0x3a4   : > { %3955 = vst [vmem:[#allocation2 + $0x10] sm:$0xff] %v3927_v33  ;;  %v3127_v0 = vmax.f32 %v10707_v3, %v3071_v8  ;;  %v3073_v21 = vmax.f32 %v3017_v45, 0.0  ;;  %v3761_v59 = vadd.f32 %v3575_v4, %v10673_v15  ;;  %v3815_v20 = vmax.f32 %v3759_v43, 0.0 }
 0x3a5   : > { %3956 = vst.msk [vmem:[#allocation2 + $0x18] sm:$0xff] %vm3923_vm2, %v3928_v2  ;;  %v3128_v56 = vmax.f32 %v10712_v7, %v3072_v57  ;;  %v3816_v61 = vmax.f32 %v3760_v52, 0.0  ;;  %v3074_v11 = vmax.f32 %v3018_v5, 0.0  ;;  %v9559_v5 = vld [vmem:[#allocation7] ss:$8 sps:$4 sm:$0xff]  }
 0x3a6   : > { %v3870_v13 = vmax.f32 %v3127_v0, %v3814_v16  ;;  %v3129_v63 = vmax.f32 %v10714_v17, %v3073_v21  ;;  %v3817_v38 = vmax.f32 %v3761_v59, 0.0 }
 0x3a7   : > { %v3871_v47 = vmax.f32 %v3128_v56, %v3815_v20  ;;  %v2836_v26 = vpop.f32.mrb[64].mxu0  ;;  %v3579_v6 = vpop.f32.mrb[64].mxu1  ;;  %v3130_v41 = vmax.f32 %v10718_v18, %v3074_v11 }
 0x3a8   : > { %v3872_v3 = vmax.f32 %v3129_v63, %v3816_v61  ;;  %v3019_v60 = vadd.f32 %v2836_v26, %v10669_v14  ;;  %v3762_v44 = vadd.f32 %v3579_v6, %v10669_v14  ;;  %v2838_v55 = vpop.f32.mrb[65].mxu0  ;;  %v3581_v8 = vpop.f32.mrb[65].mxu1  ;;  %v9564_v61 = vld [vmem:[#allocation7 + $0x14] ss:$8 sps:$4 sm:$0xff]  }
 0x3a9   : > { %v3020_v7 = vadd.f32 %v2838_v55, %v10673_v15  ;;  %v3763_v43 = vadd.f32 %v3581_v8, %v10673_v15  ;;  %v2840_v17 = vpop.f32.mrb[66].mxu0  ;;  %v3583_v45 = vpop.f32.mrb[66].mxu1  ;;  %v3873_v4 = vmax.f32 %v3130_v41, %v3817_v38  ;;  %v9562_v55 = vld [vmem:[#allocation7 + $0x10] ss:$8 sps:$4 sm:$0xff]  }
 0x3aa   : > { %v11085_v10 = vpack.c.bf16 %v3872_v3, %v3870_v13  ;;  %v3075_v2 = vmax.f32 %v3019_v60, 0.0  ;;  %v2842_v16 = vpop.f32.mrb[67].mxu0  ;;  %v3585_v57 = vpop.f32.mrb[67].mxu1  ;;  %v3818_v52 = vmax.f32 %v3762_v44, 0.0  ;;  %v3021_v0 = vadd.f32 %v2840_v17, %v10669_v14 }
 0x3ab   : > { %v3076_v18 = vmax.f32 %v3020_v7, 0.0  ;;  %v3764_v21 = vadd.f32 %v3583_v45, %v10669_v14  ;;  %v3930_v59 = vpack.c.bf16 %v3873_v4, %v3871_v47  ;;  %v3022_v20 = vadd.f32 %v2842_v16, %v10673_v15  ;;  %v9567_v4 = vld [vmem:[#allocation7 + $0x24] ss:$8 sps:$4 sm:$0xff]  }
 0x3ac   : > { %3957 = vst [vmem:[#allocation2 + $0x20] sm:$0xff] %v11085_v10  ;;  %v3131_v56 = vmax.f32 %v10733_v36, %v3075_v2  ;;  %v3765_v13 = vadd.f32 %v3585_v57, %v10673_v15  ;;  %v3986_v63 = vld [vmem:[#allocation2 + $0x18] sm:$0xff]  ;;  %v3819_v38 = vmax.f32 %v3763_v43, 0.0  ;;  %v3077_v26 = vmax.f32 %v3021_v0, 0.0 }
 0x3ad   : > { %v3132_v11 = vmax.f32 %v10738_v50, %v3076_v18  ;;  %8139 = vmatprep.mubr.msk.bf16.mxu0 %vm3923_vm2, %v3986_v63  ;;  %3958 = vst.msk [vmem:[#allocation2 + $0x28] sm:$0xff] %vm3923_vm2, %v3930_v59  ;;  %v3078_v3 = vmax.f32 %v3022_v20, 0.0  ;;  %v3820_v41 = vmax.f32 %v3764_v21, 0.0 }
 0x3ae   : > { %v3874_v6 = vmax.f32 %v3131_v56, %v3818_v52  ;;  %4285 = vmatmul.mubr.bf16.vlgmr.msra.gmra.mrb[112].mxu0 %v3927_v33  ;;  %v3133_v36 = vmax.f32 %v10742_v53, %v3077_v26  ;;  %v3821_v50 = vmax.f32 %v3765_v13, 0.0 }
 0x3af   : > { %v3875_v47 = vmax.f32 %v3132_v11, %v3819_v38  ;;  %v2846_v60 = vpop.f32.mrb[68].mxu0  ;;  %v3589_v44 = vpop.f32.mrb[68].mxu1  ;;  %4569 = vmatpush1.bf16.msra.mxu0 %v9559_v5  ;;  %v3134_v8 = vmax.f32 %v10744_v54, %v3078_v3  ;;  %v9565_v38 = vld [vmem:[#allocation7 + $0x20] ss:$8 sps:$4 sm:$0xff]  }
 0x3b0   : > { %v3023_v7 = vadd.f32 %v2846_v60, %v10669_v14  ;;  %v3766_v43 = vadd.f32 %v3589_v44, %v10669_v14  ;;  %v2848_v17 = vpop.f32.mrb[69].mxu0  ;;  %v3591_v45 = vpop.f32.mrb[69].mxu1  ;;  %4570 = vmatprep.subr.bf16.mxu0 %v9564_v61  ;;  %v3876_v33 = vmax.f32 %v3133_v36, %v3820_v41  ;;  %v9570_v41 = vld [vmem:[#allocation7 + $0x34] ss:$8 sps:$4 sm:$0xff]  }
 0x3b1   : > { %v3024_v2 = vadd.f32 %v2848_v17, %v10673_v15  ;;  %v3767_v53 = vadd.f32 %v3591_v45, %v10673_v15  ;;  %v2850_v16 = vpop.f32.mrb[70].mxu0  ;;  %v3593_v57 = vpop.f32.mrb[70].mxu1  ;;  %v3877_v52 = vmax.f32 %v3134_v8, %v3821_v50 }
 0x3b2   : > { %v3079_v18 = vmax.f32 %v3023_v7, 0.0  ;;  %v3025_v54 = vadd.f32 %v2850_v16, %v10669_v14  ;;  %v2852_v0 = vpop.f32.mrb[71].mxu0  ;;  %v3595_v21 = vpop.f32.mrb[71].mxu1  ;;  %v11103_v5 = vpack.c.bf16 %v3876_v33, %v3874_v6  ;;  %v3822_v59 = vmax.f32 %v3766_v43, 0.0  ;;  %v9568_v33 = vld [vmem:[#allocation7 + $0x30] ss:$8 sps:$4 sm:$0xff]  }
 0x3b3   : > { %v3080_v56 = vmax.f32 %v3024_v2, 0.0  ;;  %v3768_v20 = vadd.f32 %v3593_v57, %v10669_v14  ;;  %4571 = vmatpush1.bf16.msra.mxu0 %v9562_v55  ;;  %v3932_v13 = vpack.c.bf16 %v3877_v52, %v3875_v47  ;;  %v3026_v11 = vadd.f32 %v2852_v0, %v10673_v15 }
 0x3b4   : > { %v3135_v63 = vmax.f32 %v10754_v19, %v3079_v18  ;;  %v3081_v61 = vmax.f32 %v3025_v54, 0.0  ;;  %4572 = vmatprep.subr.bf16.mxu0 %v9567_v4  ;;  %3959 = vst [vmem:[#allocation2 + $0x30] sm:$0xff] %v11103_v5  ;;  %v3823_v3 = vmax.f32 %v3767_v53, 0.0  ;;  %v3769_v6 = vadd.f32 %v3595_v21, %v10673_v15  ;;  %v11111_v36 = vld [vmem:[#allocation2 + $0x28] sm:$0xff] }
 0x3b5   : > { %v3136_v26 = vmax.f32 %v10759_v23, %v3080_v56  ;;  %3960 = vst.msk [vmem:[#allocation2 + $0x38] sm:$0xff] %vm3923_vm2, %v3932_v13  ;;  %v3824_v60 = vmax.f32 %v3768_v20, 0.0  ;;  %v3082_v44 = vmax.f32 %v3026_v11, 0.0  ;;  %8140 = vmatprep.mubr.msk.bf16.mxu0 %vm3923_vm2, %v11111_v36 }
 0x3b6   : > { %v3878_v47 = vmax.f32 %v3135_v63, %v3822_v59  ;;  %v3137_v19 = vmax.f32 %v10765_v27, %v3081_v61  ;;  %v3825_v8 = vmax.f32 %v3769_v6, 0.0  ;;  %4295 = vmatmul.mubr.bf16.gmra.mrb[116].mxu0 %v11085_v10  ;;  %v9573_v10 = vld [vmem:[#allocation7 + $0x44] ss:$8 sps:$4 sm:$0xff]  }
 0x3b7   : > { %v3879_v55 = vmax.f32 %v3136_v26, %v3823_v3  ;;  %v2856_v23 = vpop.f32.mrb[72].mxu0  ;;  %v3599_v50 = vpop.f32.mrb[72].mxu1  ;;  %v3138_v43 = vmax.f32 %v10767_v28, %v3082_v44  ;;  %4573 = vmatpush1.bf16.msra.mxu0 %v9565_v38  ;;  %v9571_v38 = vld [vmem:[#allocation7 + $0x40] ss:$8 sps:$4 sm:$0xff]  }
 0x3b8   : > { %v3880_v7 = vmax.f32 %v3137_v19, %v3824_v60  ;;  %v3027_v17 = vadd.f32 %v2856_v23, %v10669_v14  ;;  %v3770_v45 = vadd.f32 %v3599_v50, %v10669_v14  ;;  %v2858_v4 = vpop.f32.mrb[73].mxu0  ;;  %v3601_v27 = vpop.f32.mrb[73].mxu1  ;;  %4574 = vmatprep.subr.bf16.mxu0 %v9570_v41 }
 0x3b9   : > { %v3028_v2 = vadd.f32 %v2858_v4, %v10673_v15  ;;  %v3771_v53 = vadd.f32 %v3601_v27, %v10673_v15  ;;  %v2860_v16 = vpop.f32.mrb[74].mxu0  ;;  %v3603_v57 = vpop.f32.mrb[74].mxu1  ;;  %v3881_v18 = vmax.f32 %v3138_v43, %v3825_v8  ;;  %v9574_v4 = vld [vmem:[#allocation7 + $0x50] ss:$8 sps:$4 sm:$0xff]  }
 0x3ba   : > { %v11123_v52 = vpack.c.bf16 %v3880_v7, %v3878_v47  ;;  %v3083_v28 = vmax.f32 %v3027_v17, 0.0  ;;  %v2862_v54 = vpop.f32.mrb[75].mxu0  ;;  %v3605_v0 = vpop.f32.mrb[75].mxu1  ;;  %v3826_v21 = vmax.f32 %v3770_v45, 0.0  ;;  %v3029_v56 = vadd.f32 %v2860_v16, %v10669_v14  ;;  %v9576_v47 = vld [vmem:[#allocation7 + $0x54] ss:$8 sps:$4 sm:$0xff]  }
 0x3bb   : > { %v3084_v59 = vmax.f32 %v3028_v2, 0.0  ;;  %v3772_v20 = vadd.f32 %v3603_v57, %v10669_v14  ;;  %v3934_v13 = vpack.c.bf16 %v3881_v18, %v3879_v55  ;;  %v3030_v61 = vadd.f32 %v2862_v54, %v10673_v15  ;;  %4575 = vmatpush1.bf16.msra.mxu0 %v9568_v33  ;;  %v9579_v16 = vld [vmem:[#allocation7 + $0x64] ss:$8 sps:$4 sm:$0xff]  }
 0x3bc   : > { %3961 = vst [vmem:[#allocation2 + $0x40] sm:$0xff] %v11123_v52  ;;  %v3139_v63 = vmax.f32 %v10777_v58, %v3083_v28  ;;  %v3773_v11 = vadd.f32 %v3605_v0, %v10673_v15  ;;  %v3827_v3 = vmax.f32 %v3771_v53, 0.0  ;;  %v3085_v6 = vmax.f32 %v3029_v56, 0.0  ;;  %v11132_v41 = vld [vmem:[#allocation2 + $0x38] sm:$0xff]  ;;  %4576 = vmatprep.subr.bf16.mxu0 %v9573_v10 }
 0x3bd   : > { %v3140_v26 = vmax.f32 %v10782_v62, %v3084_v59  ;;  %3962 = vst.msk [vmem:[#allocation2 + $0x48] sm:$0xff] %vm3923_vm2, %v3934_v13  ;;  %v3086_v60 = vmax.f32 %v3030_v61, 0.0  ;;  %8141 = vmatprep.mubr.msk.bf16.mxu0 %vm3923_vm2, %v11132_v41  ;;  %v3828_v55 = vmax.f32 %v3772_v20, 0.0  ;;  %v9577_v61 = vld [vmem:[#allocation7 + $0x60] ss:$8 sps:$4 sm:$0xff]  }
 0x3be   : > { %v3882_v19 = vmax.f32 %v3139_v63, %v3826_v21  ;;  %v3141_v44 = vmax.f32 %v10786_v49, %v3085_v6  ;;  %4305 = vmatmul.mubr.bf16.gmra.mrb[120].mxu0 %v11103_v5  ;;  %v3829_v50 = vmax.f32 %v3773_v11, 0.0  ;;  %v9582_v6 = vld [vmem:[#allocation7 + $0x74] ss:$8 sps:$4 sm:$0xff]  }
 0x3bf   : > { %v3883_v58 = vmax.f32 %v3140_v26, %v3827_v3  ;;  %v2866_v62 = vpop.f32.mrb[76].mxu0  ;;  %v3609_v8 = vpop.f32.mrb[76].mxu1  ;;  %v3142_v23 = vmax.f32 %v10788_v1, %v3086_v60  ;;  %4577 = vmatpush1.bf16.msra.mxu0 %v9571_v38 }
 0x3c0   : > { %v3031_v7 = vadd.f32 %v2866_v62, %v10669_v14  ;;  %v3774_v43 = vadd.f32 %v3609_v8, %v10669_v14  ;;  %v2868_v17 = vpop.f32.mrb[77].mxu0  ;;  %v3611_v45 = vpop.f32.mrb[77].mxu1  ;;  %v3884_v27 = vmax.f32 %v3141_v44, %v3828_v55  ;;  %4578 = vmatprep.subr.bf16.mxu0 %v9576_v47 }
 0x3c1   : > { %v3032_v33 = vadd.f32 %v2868_v17, %v10673_v15  ;;  %v3775_v49 = vadd.f32 %v3611_v45, %v10673_v15  ;;  %v2870_v2 = vpop.f32.mrb[78].mxu0  ;;  %v3613_v53 = vpop.f32.mrb[78].mxu1  ;;  %v3885_v57 = vmax.f32 %v3142_v23, %v3829_v50 }
 0x3c2   : > { %v3087_v1 = vmax.f32 %v3031_v7, 0.0  ;;  %v3033_v10 = vadd.f32 %v2870_v2, %v10669_v14  ;;  %v2872_v18 = vpop.f32.mrb[79].mxu0  ;;  %v3615_v28 = vpop.f32.mrb[79].mxu1  ;;  %v11145_v54 = vpack.c.bf16 %v3884_v27, %v3882_v19  ;;  %v3830_v0 = vmax.f32 %v3774_v43, 0.0  ;;  %v9580_v43 = vld [vmem:[#allocation7 + $0x70] ss:$8 sps:$4 sm:$0xff]  }
 0x3c3   : > { %v3088_v21 = vmax.f32 %v3032_v33, 0.0  ;;  %v3776_v59 = vadd.f32 %v3613_v53, %v10669_v14  ;;  %v3936_v56 = vpack.c.bf16 %v3885_v57, %v3883_v58  ;;  %v3034_v63 = vadd.f32 %v2872_v18, %v10673_v15  ;;  %4579 = vmatpush1.bf16.msra.mxu0 %v9574_v4  ;;  %v9585_v33 = vld [vmem:[#allocation7 + $0x84] ss:$8 sps:$4 sm:$0xff]  }
 0x3c4   : > { %v3143_v20 = vmax.f32 %v10798_v39, %v3087_v1  ;;  %v3089_v13 = vmax.f32 %v3033_v10, 0.0  ;;  %3963 = vst [vmem:[#allocation2 + $0x50] sm:$0xff] %v11145_v54  ;;  %v3831_v38 = vmax.f32 %v3775_v49, 0.0  ;;  %v3777_v26 = vadd.f32 %v3615_v28, %v10673_v15  ;;  %v11153_v3 = vld [vmem:[#allocation2 + $0x48] sm:$0xff]  ;;  %4580 = vmatprep.subr.bf16.mxu0 %v9579_v16 }
 0x3c5   : > { %v3144_v11 = vmax.f32 %v10803_v46, %v3088_v21  ;;  %3964 = vst.msk [vmem:[#allocation2 + $0x58] sm:$0xff] %vm3923_vm2, %v3936_v56  ;;  %v3832_v19 = vmax.f32 %v3776_v59, 0.0  ;;  %v3090_v60 = vmax.f32 %v3034_v63, 0.0  ;;  %8142 = vmatprep.mubr.msk.bf16.mxu0 %vm3923_vm2, %v11153_v3  ;;  %v9583_v56 = vld [vmem:[#allocation7 + $0x80] ss:$8 sps:$4 sm:$0xff]  }
 0x3c6   : > { %v3886_v47 = vmax.f32 %v3143_v20, %v3830_v0  ;;  %v3145_v39 = vmax.f32 %v10807_v48, %v3089_v13  ;;  %v3833_v44 = vmax.f32 %v3777_v26, 0.0  ;;  %4315 = vmatmul.mubr.bf16.gmra.mrb[124].mxu0 %v11123_v52 }
 0x3c7   : > { %v3887_v58 = vmax.f32 %v3144_v11, %v3831_v38  ;;  %v2876_v46 = vpop.f32.mrb[80].mxu0  ;;  %v3619_v55 = vpop.f32.mrb[80].mxu1  ;;  %v3146_v8 = vmax.f32 %v10809_v51, %v3090_v60  ;;  %4581 = vmatpush1.bf16.msra.mxu0 %v9577_v61  ;;  %v9588_v11 = vld [vmem:[#allocation7 + $0x94] ss:$8 sps:$4 sm:$0xff]  }
 0x3c8   : > { %v3888_v62 = vmax.f32 %v3145_v39, %v3832_v19  ;;  %v3035_v23 = vadd.f32 %v2876_v46, %v10669_v14  ;;  %v3778_v50 = vadd.f32 %v3619_v55, %v10669_v14  ;;  %v2878_v7 = vpop.f32.mrb[81].mxu0  ;;  %v3621_v48 = vpop.f32.mrb[81].mxu1  ;;  %4582 = vmatprep.subr.bf16.mxu0 %v9582_v6 }
 0x3c9   : > { %v3036_v17 = vadd.f32 %v2878_v7, %v10673_v15  ;;  %v3779_v45 = vadd.f32 %v3621_v48, %v10673_v15  ;;  %v2880_v4 = vpop.f32.mrb[82].mxu0  ;;  %v3623_v27 = vpop.f32.mrb[82].mxu1  ;;  %v3889_v2 = vmax.f32 %v3146_v8, %v3833_v44  ;;  %v9591_v48 = vld [vmem:[#allocation7 + $0xa4] ss:$8 sps:$4 sm:$0xff]  }
 0x3ca   : > { %v11165_v49 = vpack.c.bf16 %v3888_v62, %v3886_v47  ;;  %v3091_v51 = vmax.f32 %v3035_v23, 0.0  ;;  %v2882_v53 = vpop.f32.mrb[83].mxu0  ;;  %v3625_v16 = vpop.f32.mrb[83].mxu1  ;;  %v3834_v57 = vmax.f32 %v3778_v50, 0.0  ;;  %v3037_v10 = vadd.f32 %v2880_v4, %v10669_v14  ;;  %v9586_v62 = vld [vmem:[#allocation7 + $0x90] ss:$8 sps:$4 sm:$0xff]  }
 0x3cb   : > { %v3092_v1 = vmax.f32 %v3036_v17, 0.0  ;;  %v3780_v18 = vadd.f32 %v3623_v27, %v10669_v14  ;;  %v3938_v28 = vpack.c.bf16 %v3889_v2, %v3887_v58  ;;  %v3038_v21 = vadd.f32 %v2882_v53, %v10673_v15  ;;  %4583 = vmatpush1.bf16.msra.mxu0 %v9580_v43 }
 0x3cc   : > { %3965 = vst [vmem:[#allocation2 + $0x60] sm:$0xff] %v11165_v49  ;;  %v3147_v0 = vmax.f32 %v10819_v24, %v3091_v51  ;;  %v3781_v59 = vadd.f32 %v3625_v16, %v10673_v15  ;;  %v3835_v13 = vmax.f32 %v3779_v45, 0.0  ;;  %v3093_v63 = vmax.f32 %v3037_v10, 0.0  ;;  %v11174_v61 = vld [vmem:[#allocation2 + $0x58] sm:$0xff]  ;;  %4584 = vmatprep.subr.bf16.mxu0 %v9585_v33  ;;  %v9589_v10 = vld [vmem:[#allocation7 + $0xa0] ss:$8 sps:$4 sm:$0xff]  }
 0x3cd   : > { %v3148_v20 = vmax.f32 %v10824_v31, %v3092_v1  ;;  %3966 = vst.msk [vmem:[#allocation2 + $0x68] sm:$0xff] %vm3923_vm2, %v3938_v28  ;;  %v3094_v26 = vmax.f32 %v3038_v21, 0.0  ;;  %8143 = vmatprep.mubr.msk.bf16.mxu0 %vm3923_vm2, %v11174_v61  ;;  %v3836_v47 = vmax.f32 %v3780_v18, 0.0 }
 0x3ce   : > { %v3890_v38 = vmax.f32 %v3147_v0, %v3834_v57  ;;  %v3149_v6 = vmax.f32 %v10828_v34, %v3093_v63  ;;  %4325 = vmatmul.mubr.bf16.gmra.mrb[128].mxu0 %v11145_v54  ;;  %v3837_v60 = vmax.f32 %v3781_v59, 0.0  ;;  %v9594_v59 = vld [vmem:[#allocation7 + $0xb4] ss:$8 sps:$4 sm:$0xff]  }
 0x3cf   : > { %v3891_v24 = vmax.f32 %v3148_v20, %v3835_v13  ;;  %v2886_v31 = vpop.f32.mrb[84].mxu0  ;;  %v3629_v39 = vpop.f32.mrb[84].mxu1  ;;  %v3150_v19 = vmax.f32 %v10830_v35, %v3094_v26  ;;  %4585 = vmatpush1.bf16.msra.mxu0 %v9583_v56 }
 0x3d0   : > { %v3039_v58 = vadd.f32 %v2886_v31, %v10669_v14  ;;  %v3782_v44 = vadd.f32 %v3629_v39, %v10669_v14  ;;  %v2888_v46 = vpop.f32.mrb[85].mxu0  ;;  %v3631_v55 = vpop.f32.mrb[85].mxu1  ;;  %v3892_v8 = vmax.f32 %v3149_v6, %v3836_v47  ;;  %4586 = vmatprep.subr.bf16.mxu0 %v9588_v11  ;;  %v9592_v39 = vld [vmem:[#allocation7 + $0xb0] ss:$8 sps:$4 sm:$0xff]  }
 0x3d1   : > { %v3040_v23 = vadd.f32 %v2888_v46, %v10673_v15  ;;  %v3783_v34 = vadd.f32 %v3631_v55, %v10673_v15  ;;  %v2890_v50 = vpop.f32.mrb[86].mxu0  ;;  %v3633_v7 = vpop.f32.mrb[86].mxu1  ;;  %v3893_v43 = vmax.f32 %v3150_v19, %v3837_v60  ;;  %v9597_v46 = vld [vmem:[#allocation7 + $0xc4] ss:$8 sps:$4 sm:$0xff]  }
 0x3d2   : > { %v3095_v35 = vmax.f32 %v3039_v58, 0.0  ;;  %v3041_v17 = vadd.f32 %v2890_v50, %v10669_v14  ;;  %v2892_v45 = vpop.f32.mrb[87].mxu0  ;;  %v3635_v4 = vpop.f32.mrb[87].mxu1  ;;  %v11187_v27 = vpack.c.bf16 %v3892_v8, %v3890_v38  ;;  %v3838_v33 = vmax.f32 %v3782_v44, 0.0 }
 0x3d3   : > { %v3096_v2 = vmax.f32 %v3040_v23, 0.0  ;;  %v3784_v51 = vadd.f32 %v3633_v7, %v10669_v14  ;;  %v3940_v53 = vpack.c.bf16 %v3893_v43, %v3891_v24  ;;  %v3042_v1 = vadd.f32 %v2892_v45, %v10673_v15  ;;  %4587 = vmatpush1.bf16.msra.mxu0 %v9586_v62 }
 0x3d4   : > { %v3151_v16 = vmax.f32 %v10840_v12, %v3095_v35  ;;  %v3097_v57 = vmax.f32 %v3041_v17, 0.0  ;;  %v3839_v28 = vmax.f32 %v3783_v34, 0.0  ;;  %v3785_v0 = vadd.f32 %v3635_v4, %v10673_v15  ;;  %v11194_v21 = vld [vmem:[#allocation2 + $0x68] sm:$0xff]  ;;  %4588 = vmatprep.subr.bf16.mxu0 %v9591_v48 }
 0x3d5   : > { %v3152_v18 = vmax.f32 %v10845_v22, %v3096_v2  ;;  %3968 = vst.msk [vmem:[#allocation2 + $0x78] sm:$0xff] %vm3923_vm2, %v3940_v53  ;;  %v3840_v12 = vmax.f32 %v3784_v51, 0.0  ;;  %v3098_v13 = vmax.f32 %v3042_v1, 0.0  ;;  %8144 = vmatprep.mubr.msk.bf16.mxu0 %vm3923_vm2, %v11194_v21  ;;  %v9595_v4 = vld [vmem:[#allocation7 + $0xc0] ss:$8 sps:$4 sm:$0xff]  }
 0x3d6   : > { %v3894_v56 = vmax.f32 %v3151_v16, %v3838_v33  ;;  %v3153_v20 = vmax.f32 %v10849_v30, %v3097_v57  ;;  %v3841_v11 = vmax.f32 %v3785_v0, 0.0  ;;  %4335 = vmatmul.mubr.bf16.gmra.mrb[132].mxu0 %v11165_v49  ;;  %v9600_v16 = vld [vmem:[#allocation7 + $0xd4] ss:$8 sps:$4 sm:$0xff]  }
 0x3d7   : > { %v3895_v63 = vmax.f32 %v3152_v18, %v3839_v28  ;;  %v2896_v22 = vpop.f32.mrb[88].mxu0  ;;  %v3639_v38 = vpop.f32.mrb[88].mxu1  ;;  %v3154_v24 = vmax.f32 %v10851_v32, %v3098_v13  ;;  %4589 = vmatpush1.bf16.msra.mxu0 %v9589_v10 }
 0x3d8   : > { %v3896_v26 = vmax.f32 %v3153_v20, %v3840_v12  ;;  %v3043_v6 = vadd.f32 %v2896_v22, %v10669_v14  ;;  %v3786_v47 = vadd.f32 %v3639_v38, %v10669_v14  ;;  %v2898_v31 = vpop.f32.mrb[89].mxu0  ;;  %v3641_v30 = vpop.f32.mrb[89].mxu1  ;;  %4590 = vmatprep.subr.bf16.mxu0 %v9594_v59 }
 0x3d9   : > { %v3044_v19 = vadd.f32 %v2898_v31, %v10673_v15  ;;  %v3787_v60 = vadd.f32 %v3641_v30, %v10673_v15  ;;  %v2900_v58 = vpop.f32.mrb[90].mxu0  ;;  %v3643_v44 = vpop.f32.mrb[90].mxu1  ;;  %v3897_v62 = vmax.f32 %v3154_v24, %v3841_v11  ;;  %v9603_v24 = vld [vmem:[#allocation7 + $0x1c4] ss:$8 sps:$4 sm:$0xff]  }
 0x3da   : > { %v11206_v55 = vpack.c.bf16 %v3896_v26, %v3894_v56  ;;  %v3099_v32 = vmax.f32 %v3043_v6, 0.0  ;;  %v2902_v8 = vpop.f32.mrb[91].mxu0  ;;  %v3645_v23 = vpop.f32.mrb[91].mxu1  ;;  %v3842_v34 = vmax.f32 %v3786_v47, 0.0  ;;  %v3045_v7 = vadd.f32 %v2900_v58, %v10669_v14 }
 0x3db   : > { %v3100_v50 = vmax.f32 %v3044_v19, 0.0  ;;  %v3788_v48 = vadd.f32 %v3643_v44, %v10669_v14  ;;  %v3942_v43 = vpack.c.bf16 %v3897_v62, %v3895_v63  ;;  %v3046_v17 = vadd.f32 %v2902_v8, %v10673_v15  ;;  %4591 = vmatpush1.bf16.msra.mxu0 %v9592_v39  ;;  %v9598_v63 = vld [vmem:[#allocation7 + $0xd0] ss:$8 sps:$4 sm:$0xff]  }
 0x3dc   : > { %v3155_v35 = vmax.f32 %v10861_v9, %v3099_v32  ;;  %v3789_v45 = vadd.f32 %v3645_v23, %v10673_v15  ;;  %v3843_v2 = vmax.f32 %v3787_v60, 0.0  ;;  %v3101_v51 = vmax.f32 %v3045_v7, 0.0  ;;  %v11214_v53 = vld [vmem:[#allocation2 + $0x78] sm:$0xff]  ;;  %4592 = vmatprep.subr.bf16.mxu0 %v9597_v46 }
 0x3dd   : > { %v3156_v33 = vmax.f32 %v10866_v25, %v3100_v50  ;;  %3970 = vst.msk [vmem:[#allocation2 + $0x88] sm:$0xff] %vm3923_vm2, %v3942_v43  ;;  %v3102_v1 = vmax.f32 %v3046_v17, 0.0  ;;  %8145 = vmatprep.mubr.msk.bf16.mxu0 %vm3923_vm2, %v11214_v53  ;;  %v3844_v18 = vmax.f32 %v3788_v48, 0.0  ;;  %v12501_v48 = vld [vmem:[#allocation15_spill] sm:$0xff] }
 0x3de   : > { %v3898_v57 = vmax.f32 %v3155_v35, %v3842_v34  ;;  %v3157_v10 = vmax.f32 %v10870_v40, %v3101_v51  ;;  %4345 = vmatmul.mubr.bf16.gmra.mrb[136].mxu0 %v11187_v27  ;;  %v3845_v59 = vmax.f32 %v3789_v45, 0.0 }
 0x3df   : > { %v3899_v9 = vmax.f32 %v3156_v33, %v3843_v2  ;;  %v2906_v25 = vpop.f32.mrb[92].mxu0  ;;  %v3649_v28 = vpop.f32.mrb[92].mxu1  ;;  %v3158_v0 = vmax.f32 %v10872_v42, %v3102_v1  ;;  %4593 = vmatpush1.bf16.msra.mxu0 %v9595_v4  ;;  %v12502_v2 = vld [vmem:[#allocation16_spill] sm:$0xff] }
 0x3e0   : > { %v3047_v56 = vadd.f32 %v2906_v25, %v10669_v14  ;;  %v3790_v20 = vadd.f32 %v3649_v28, %v10669_v14  ;;  %v2908_v12 = vpop.f32.mrb[93].mxu0  ;;  %v3651_v13 = vpop.f32.mrb[93].mxu1  ;;  %v3900_v11 = vmax.f32 %v3157_v10, %v3844_v18  ;;  %4594 = vmatprep.subr.bf16.mxu0 %v9600_v16 }
 0x3e1   : > { %v3048_v22 = vadd.f32 %v2908_v12, %v10673_v15  ;;  %v3791_v40 = vadd.f32 %v3651_v13, %v10673_v15  ;;  %v2910_v38 = vpop.f32.mrb[94].mxu0  ;;  %v3653_v26 = vpop.f32.mrb[94].mxu1  ;;  %v3901_v6 = vmax.f32 %v3158_v0, %v3845_v59 }
 0x3e2   : > { %v3103_v42 = vmax.f32 %v3047_v56, 0.0  ;;  %v3049_v47 = vadd.f32 %v2910_v38, %v10669_v14  ;;  %v2912_v31 = vpop.f32.mrb[95].mxu0  ;;  %v3655_v30 = vpop.f32.mrb[95].mxu1  ;;  %v11227_v39 = vpack.c.bf16 %v3900_v11, %v3898_v57  ;;  %v3846_v19 = vmax.f32 %v3790_v20, 0.0  ;;  %v12503_v38 = vld [vmem:[#allocation17_spill] sm:$0xff] }
 0x3e3   : > { %v3104_v60 = vmax.f32 %v3048_v22, 0.0  ;;  %v3792_v58 = vadd.f32 %v3653_v26, %v10669_v14  ;;  %v3944_v44 = vpack.c.bf16 %v3901_v6, %v3899_v9  ;;  %v3050_v32 = vadd.f32 %v2912_v31, %v10673_v15  ;;  %4595 = vmatpush1.bf16.msra.mxu0 %v9598_v63 }
 0x3e4   : > { %v3159_v46 = vmax.f32 %v10882_v29, %v3103_v42  ;;  %v3105_v62 = vmax.f32 %v3049_v47, 0.0  ;;  %v3847_v23 = vmax.f32 %v3791_v40, 0.0  ;;  %v3793_v34 = vadd.f32 %v3655_v30, %v10673_v15  ;;  %v11234_v50 = vld [vmem:[#allocation2 + $0x88] sm:$0xff]  ;;  %4980 = vmatprep.subr.bf16.mxu0 %v9603_v24 }
 0x3e5   : > { %v3160_v8 = vmax.f32 %v10887_v37, %v3104_v60  ;;  %3972 = vst.msk [vmem:[#allocation2 + $0x98] sm:$0xff] %vm3923_vm2, %v3944_v44  ;;  %v3848_v35 = vmax.f32 %v3792_v58, 0.0  ;;  %v3106_v17 = vmax.f32 %v3050_v32, 0.0  ;;  %8146 = vmatprep.mubr.msk.bf16.mxu0 %vm3923_vm2, %v11234_v50  ;;  %v12504_v42 = vld [vmem:[#allocation18_spill] sm:$0xff] }
 0x3e6   : > { %v3902_v7 = vmax.f32 %v3159_v46, %v3846_v19  ;;  %v3161_v43 = vmax.f32 %v12501_v48, %v3105_v62  ;;  %v3849_v45 = vmax.f32 %v3793_v34, 0.0  ;;  %4355 = vmatmul.mubr.bf16.gmra.mrb[140].mxu0 %v11206_v55  ;;  %v12505_v46 = vld [vmem:[#allocation19_spill] sm:$0xff]  ;;  %v12506_v34 = vld [vmem:[#allocation20_spill] sm:$0xff] }
 0x3e7   : > { %v3903_v29 = vmax.f32 %v3160_v8, %v3847_v23  ;;  %v2916_v37 = vpop.f32.mrb[96].mxu0  ;;  %v3659_v4 = vpop.f32.mrb[96].mxu1  ;;  %v3162_v51 = vmax.f32 %v12502_v2, %v3106_v17 }
 0x3e8   : > { %v3904_v33 = vmax.f32 %v3161_v43, %v3848_v35  ;;  %v3051_v16 = vadd.f32 %v2916_v37, %v10669_v14  ;;  %v3794_v57 = vadd.f32 %v3659_v4, %v10669_v14  ;;  %v2918_v1 = vpop.f32.mrb[97].mxu0  ;;  %v3661_v9 = vpop.f32.mrb[97].mxu1 }
 0x3e9   : > { %v3052_v10 = vadd.f32 %v2918_v1, %v10673_v15  ;;  %v3795_v18 = vadd.f32 %v3661_v9, %v10673_v15  ;;  %v2920_v25 = vpop.f32.mrb[98].mxu0  ;;  %v3663_v28 = vpop.f32.mrb[98].mxu1  ;;  %v3905_v59 = vmax.f32 %v3162_v51, %v3849_v45 }
 0x3ea   : > { %v11246_v0 = vpack.c.bf16 %v3904_v33, %v3902_v7  ;;  %v3107_v56 = vmax.f32 %v3051_v16, 0.0  ;;  %v2922_v20 = vpop.f32.mrb[99].mxu0  ;;  %v3665_v12 = vpop.f32.mrb[99].mxu1  ;;  %v3850_v13 = vmax.f32 %v3794_v57, 0.0  ;;  %v3053_v11 = vadd.f32 %v2920_v25, %v10669_v14 }
 0x3eb   : > { %v3108_v63 = vmax.f32 %v3052_v10, 0.0  ;;  %v3796_v22 = vadd.f32 %v3663_v28, %v10669_v14  ;;  %v3946_v40 = vpack.c.bf16 %v3905_v59, %v3903_v29  ;;  %v3054_v24 = vadd.f32 %v2922_v20, %v10673_v15 }
 0x3ec   : > { %v3163_v26 = vmax.f32 %v12503_v38, %v3107_v56  ;;  %v3797_v6 = vadd.f32 %v3665_v12, %v10673_v15  ;;  %v3851_v31 = vmax.f32 %v3795_v18, 0.0  ;;  %v3109_v30 = vmax.f32 %v3053_v11, 0.0  ;;  %v11254_v19 = vld [vmem:[#allocation2 + $0x98] sm:$0xff] }
 0x3ed   : > { %v3164_v47 = vmax.f32 %v12504_v42, %v3108_v63  ;;  %3974 = vst.msk [vmem:[#allocation2 + $0xa8] sm:$0xff] %vm3923_vm2, %v3946_v40  ;;  %v3110_v58 = vmax.f32 %v3054_v24, 0.0  ;;  %8147 = vmatprep.mubr.msk.bf16.mxu0 %vm3923_vm2, %v11254_v19  ;;  %v3852_v32 = vmax.f32 %v3796_v22, 0.0  ;;  %v12507_v56 = vld [vmem:[#allocation21_spill] sm:$0xff]  ;;  %v12508_v63 = vld [vmem:[#allocation22_spill] sm:$0xff]  ;;  %v12509_v24 = vld [vmem:[#allocation23_spill] sm:$0xff] }
 0x3ee   : > { %v3906_v60 = vmax.f32 %v3163_v26, %v3850_v13  ;;  %v3165_v62 = vmax.f32 %v12505_v46, %v3109_v30  ;;  %4365 = vmatmul.mubr.bf16.gmra.mrb[144].mxu0 %v11227_v39  ;;  %v3853_v48 = vmax.f32 %v3797_v6, 0.0  ;;  %v12510_v46 = vld [vmem:[#allocation24_spill] sm:$0xff] }
 0x3ef   : > { %v3907_v44 = vmax.f32 %v3164_v47, %v3851_v31  ;;  %v2926_v8 = vpop.f32.mrb[100].mxu0  ;;  %v3669_v23 = vpop.f32.mrb[100].mxu1  ;;  %v3166_v7 = vmax.f32 %v12506_v34, %v3110_v58 }
 0x3f0   : > { %v3055_v43 = vadd.f32 %v2926_v8, %v10669_v14  ;;  %v3798_v35 = vadd.f32 %v3669_v23, %v10669_v14  ;;  %v2928_v17 = vpop.f32.mrb[101].mxu0  ;;  %v3671_v29 = vpop.f32.mrb[101].mxu1  ;;  %v3908_v45 = vmax.f32 %v3165_v62, %v3852_v32 }
 0x3f1   : > { %v3056_v37 = vadd.f32 %v2928_v17, %v10673_v15  ;;  %v3799_v4 = vadd.f32 %v3671_v29, %v10673_v15  ;;  %v2930_v33 = vpop.f32.mrb[102].mxu0  ;;  %v3673_v2 = vpop.f32.mrb[102].mxu1  ;;  %v3909_v51 = vmax.f32 %v3166_v7, %v3853_v48 }
 0x3f2   : > { %v3111_v16 = vmax.f32 %v3055_v43, 0.0  ;;  %v3057_v57 = vadd.f32 %v2930_v33, %v10669_v14  ;;  %v2932_v1 = vpop.f32.mrb[103].mxu0  ;;  %v3675_v9 = vpop.f32.mrb[103].mxu1  ;;  %v11267_v10 = vpack.c.bf16 %v3908_v45, %v3906_v60  ;;  %v3854_v18 = vmax.f32 %v3798_v35, 0.0 }
 0x3f3   : > { %v3112_v25 = vmax.f32 %v3056_v37, 0.0  ;;  %v3800_v28 = vadd.f32 %v3673_v2, %v10669_v14  ;;  %v3948_v59 = vpack.c.bf16 %v3909_v51, %v3907_v44  ;;  %v3058_v13 = vadd.f32 %v2932_v1, %v10673_v15  ;;  %v12511_v1 = vld [vmem:[#allocation25_spill] sm:$0xff] }
 0x3f4   : > { %v3167_v20 = vmax.f32 %v12507_v56, %v3111_v16  ;;  %v3113_v12 = vmax.f32 %v3057_v57, 0.0  ;;  %v3855_v22 = vmax.f32 %v3799_v4, 0.0  ;;  %v3801_v40 = vadd.f32 %v3675_v9, %v10673_v15  ;;  %v11274_v38 = vld [vmem:[#allocation2 + $0xa8] sm:$0xff] }
 0x3f5   : > { %v3168_v11 = vmax.f32 %v12508_v63, %v3112_v25  ;;  %3976 = vst.msk [vmem:[#allocation2 + $0xb8] sm:$0xff] %vm3923_vm2, %v3948_v59  ;;  %v3856_v42 = vmax.f32 %v3800_v28, 0.0  ;;  %v3114_v47 = vmax.f32 %v3058_v13, 0.0  ;;  %8148 = vmatprep.mubr.msk.bf16.mxu0 %vm3923_vm2, %v11274_v38  ;;  %v12512_v28 = vld [vmem:[#allocation26_spill] sm:$0xff] }
 0x3f6   : > { %v3910_v26 = vmax.f32 %v3167_v20, %v3854_v18  ;;  %v3169_v6 = vmax.f32 %v12509_v24, %v3113_v12  ;;  %v3857_v30 = vmax.f32 %v3801_v40, 0.0  ;;  %4375 = vmatmul.mubr.bf16.gmra.mrb[148].mxu0 %v11246_v0 }
 0x3f7   : > { %v3911_v31 = vmax.f32 %v3168_v11, %v3855_v22  ;;  %v2936_v60 = vpop.f32.mrb[104].mxu0  ;;  %v3679_v58 = vpop.f32.mrb[104].mxu1  ;;  %v3170_v62 = vmax.f32 %v12510_v46, %v3114_v47  ;;  %v12513_v22 = vld [vmem:[#allocation27_spill] sm:$0xff] }
 0x3f8   : > { %v3912_v44 = vmax.f32 %v3169_v6, %v3856_v42  ;;  %v3059_v32 = vadd.f32 %v2936_v60, %v10669_v14  ;;  %v3802_v8 = vadd.f32 %v3679_v58, %v10669_v14  ;;  %v2938_v23 = vpop.f32.mrb[105].mxu0  ;;  %v3681_v34 = vpop.f32.mrb[105].mxu1  ;;  %v12514_v42 = vld [vmem:[#allocation28_spill] sm:$0xff] }
 0x3f9   : > { %v3060_v7 = vadd.f32 %v2938_v23, %v10673_v15  ;;  %v3803_v48 = vadd.f32 %v3681_v34, %v10673_v15  ;;  %v2940_v43 = vpop.f32.mrb[106].mxu0  ;;  %v3683_v35 = vpop.f32.mrb[106].mxu1  ;;  %v3913_v29 = vmax.f32 %v3170_v62, %v3857_v30 }
 0x3fa   : > { %v11286_v17 = vpack.c.bf16 %v3912_v44, %v3910_v26  ;;  %v3115_v45 = vmax.f32 %v3059_v32, 0.0  ;;  %v2942_v37 = vpop.f32.mrb[107].mxu0  ;;  %v3685_v4 = vpop.f32.mrb[107].mxu1  ;;  %v3858_v33 = vmax.f32 %v3802_v8, 0.0  ;;  %v3061_v51 = vadd.f32 %v2940_v43, %v10669_v14 }
 0x3fb   : > { %v3116_v2 = vmax.f32 %v3060_v7, 0.0  ;;  %v3804_v16 = vadd.f32 %v3683_v35, %v10669_v14  ;;  %v3950_v57 = vpack.c.bf16 %v3913_v29, %v3911_v31  ;;  %v3062_v18 = vadd.f32 %v2942_v37, %v10673_v15 }
 0x3fc   : > { %v3171_v9 = vmax.f32 %v12511_v1, %v3115_v45  ;;  %v3805_v25 = vadd.f32 %v3685_v4, %v10673_v15  ;;  %v3859_v56 = vmax.f32 %v3803_v48, 0.0  ;;  %v3117_v20 = vmax.f32 %v3061_v51, 0.0  ;;  %v11294_v12 = vld [vmem:[#allocation2 + $0xb8] sm:$0xff]  ;;  %v12516_v1 = vld [vmem:[#allocation30_spill] sm:$0xff] }
 0x3fd   : > { %v3172_v59 = vmax.f32 %v12512_v28, %v3116_v2  ;;  %3978 = vst.msk [vmem:[#allocation2 + $0xc8] sm:$0xff] %vm3923_vm2, %v3950_v57  ;;  %v3118_v63 = vmax.f32 %v3062_v18, 0.0  ;;  %8149 = vmatprep.mubr.msk.bf16.mxu0 %vm3923_vm2, %v11294_v12  ;;  %v3860_v26 = vmax.f32 %v3804_v16, 0.0  ;;  %v12515_v2 = vld [vmem:[#allocation29_spill] sm:$0xff] }
 0x3fe   : > { %v3914_v13 = vmax.f32 %v3171_v9, %v3858_v33  ;;  %v3173_v40 = vmax.f32 %v12513_v22, %v3117_v20  ;;  %4385 = vmatmul.mubr.bf16.gmra.mrb[152].mxu0 %v11267_v10  ;;  %v3861_v31 = vmax.f32 %v3805_v25, 0.0  ;;  %v12518_v22 = vld [vmem:[#allocation32_spill] sm:$0xff] }
 0x3ff   : > { %v3915_v11 = vmax.f32 %v3172_v59, %v3859_v56  ;;  %v2946_v24 = vpop.f32.mrb[108].mxu0  ;;  %v3689_v6 = vpop.f32.mrb[108].mxu1  ;;  %v3174_v47 = vmax.f32 %v12514_v42, %v3118_v63  ;;  %v12517_v56 = vld [vmem:[#allocation31_spill] sm:$0xff] }
 0x400   : > { %v3063_v30 = vadd.f32 %v2946_v24, %v10669_v14  ;;  %v3806_v60 = vadd.f32 %v3689_v6, %v10669_v14  ;;  %v2948_v58 = vpop.f32.mrb[109].mxu0  ;;  %v3691_v44 = vpop.f32.mrb[109].mxu1  ;;  %v3916_v46 = vmax.f32 %v3173_v40, %v3860_v26 }
 0x401   : > { %v3064_v62 = vadd.f32 %v2948_v58, %v10673_v15  ;;  %v3807_v32 = vadd.f32 %v3691_v44, %v10673_v15  ;;  %v2950_v8 = vpop.f32.mrb[110].mxu0  ;;  %v3693_v23 = vpop.f32.mrb[110].mxu1  ;;  %v3917_v34 = vmax.f32 %v3174_v47, %v3861_v31  ;;  %v3984_v31 = vld [vmem:[#allocation2 + $0x8] sm:$0xff]  ;;  %v11336_v58 = vld [vmem:[#allocation2] sm:$0xff]  ;;  %v9872_v44 = vld [vmem:[#allocation2 + $0x18] sm:$0xff] }
 0x402   : > { %v3119_v7 = vmax.f32 %v3063_v30, 0.0  ;;  %v3065_v48 = vadd.f32 %v2950_v8, %v10669_v14  ;;  %v2952_v43 = vpop.f32.mrb[111].mxu0  ;;  %v3695_v35 = vpop.f32.mrb[111].mxu1  ;;  %v11307_v29 = vpack.c.bf16 %v3916_v46, %v3914_v13  ;;  %v3862_v45 = vmax.f32 %v3806_v60, 0.0  ;;  %v9601_v30 = vld [vmem:[#allocation7 + $0x1c0] ss:$8 sps:$4 sm:$0xff]  }
 0x403   : > { %v3120_v37 = vmax.f32 %v3064_v62, 0.0  ;;  %v3808_v4 = vadd.f32 %v3693_v23, %v10669_v14  ;;  %v3952_v33 = vpack.c.bf16 %v3917_v34, %v3915_v11  ;;  %v3066_v57 = vadd.f32 %v2952_v43, %v10673_v15  ;;  %v9606_v60 = vld [vmem:[#allocation7 + $0x1d4] ss:$8 sps:$4 sm:$0xff]   ;;  %v9604_v46 = vld [vmem:[#allocation7 + $0x1d0] ss:$8 sps:$4 sm:$0xff]  }
 0x404   : > { %v3175_v51 = vmax.f32 %v12515_v2, %v3119_v7  ;;  %v3121_v16 = vmax.f32 %v3065_v48, 0.0  ;;  %v3863_v18 = vmax.f32 %v3807_v32, 0.0  ;;  %v3809_v25 = vadd.f32 %v3695_v35, %v10673_v15  ;;  %v11314_v28 = vld [vmem:[#allocation2 + $0xc8] sm:$0xff]  ;;  %v9612_v8 = vld [vmem:[#allocation7 + $0x1f4] ss:$8 sps:$4 sm:$0xff]  }
 0x405   : > { %v3176_v9 = vmax.f32 %v12516_v1, %v3120_v37  ;;  %3980 = vst.msk [vmem:[#allocation2 + $0xd8] sm:$0xff] %vm3923_vm2, %v3952_v33  ;;  %v3864_v13 = vmax.f32 %v3808_v4, 0.0  ;;  %v3122_v14 = vmax.f32 %v3066_v57, 0.0  ;;  %8150 = vmatprep.mubr.msk.bf16.mxu0 %vm3923_vm2, %v11314_v28  ;;  %v9609_v62 = vld [vmem:[#allocation7 + $0x1e4] ss:$8 sps:$4 sm:$0xff]  }
 0x406   : > { %v3918_v59 = vmax.f32 %v3175_v51, %v3862_v45  ;;  %v3177_v20 = vmax.f32 %v12517_v56, %v3121_v16  ;;  %4395 = vmatmul.mubr.bf16.gmra.mrb[156].mxu0 %v11286_v17  ;;  %v3865_v26 = vmax.f32 %v3809_v25, 0.0  ;;  %v9607_v32 = vld [vmem:[#allocation7 + $0x1e0] ss:$8 sps:$4 sm:$0xff]   ;;  %v9873_v23 = vld [vmem:[#allocation2 + $0x10] sm:$0xff] }
 0x407   : > { %v3919_v63 = vmax.f32 %v3176_v9, %v3863_v18  ;;  %v3178_v40 = vmax.f32 %v12518_v22, %v3122_v14  ;;  %v9610_v34 = vld [vmem:[#allocation7 + $0x1f0] ss:$8 sps:$4 sm:$0xff]   ;;  %v9615_v7 = vld [vmem:[#allocation7 + $0x204] ss:$8 sps:$4 sm:$0xff]   ;;  %v9613_v48 = vld [vmem:[#allocation7 + $0x200] ss:$8 sps:$4 sm:$0xff]  }
 0x408   : > { %v3920_v11 = vmax.f32 %v3177_v20, %v3864_v13  ;;  %v9618_v43 = vld [vmem:[#allocation7 + $0x214] ss:$8 sps:$4 sm:$0xff]   ;;  %v9616_v45 = vld [vmem:[#allocation7 + $0x210] ss:$8 sps:$4 sm:$0xff]   ;;  %v9621_v37 = vld [vmem:[#allocation7 + $0x224] ss:$8 sps:$4 sm:$0xff]  }
 0x409   : > { %v3921_v24 = vmax.f32 %v3178_v40, %v3865_v26  ;;  %v9874_v35 = vld [vmem:[#allocation2 + $0x20] sm:$0xff]  ;;  %v9622_v33 = vld [vmem:[#allocation7 + $0x230] ss:$8 sps:$4 sm:$0xff]   ;;  %v9646_v56 = vld [vmem:[%s12462_s5 + $0x88] sm:$0xff]  }
 0x40a   : > { %v11322_v15 = vpack.c.bf16 %v3920_v11, %v3918_v59  ;;  %v9619_v4 = vld [vmem:[#allocation7 + $0x220] ss:$8 sps:$4 sm:$0xff]   ;;  %v9627_v2 = vld [vmem:[#allocation7 + $0x244] ss:$8 sps:$4 sm:$0xff]   ;;  %v9628_v16 = vld [vmem:[#allocation7 + $0x250] ss:$8 sps:$4 sm:$0xff]  }
 0x40b   : > { %v3954_v6 = vpack.c.bf16 %v3921_v24, %v3919_v63  ;;  %v9625_v51 = vld [vmem:[#allocation7 + $0x240] ss:$8 sps:$4 sm:$0xff]   ;;  %v9634_v1 = vld [vmem:[#allocation7 + $0x270] ss:$8 sps:$4 sm:$0xff]   ;;  %v9642_v18 = vld [vmem:[#allocation7 + $0x294] ss:$8 sps:$4 sm:$0xff]  }
 0x40c   : > { %v11324_v42 = vld [vmem:[#allocation2 + $0xd8] sm:$0xff]  ;;  %v9631_v57 = vld [vmem:[#allocation7 + $0x260] ss:$8 sps:$4 sm:$0xff]   ;;  %v9647_v20 = vld [vmem:[%s12462_s5 + $0x90] sm:$0xff]  }
 0x40d   : > { %3982 = vst.msk [vmem:[#allocation2 + $0xe8] sm:$0xff] %vm3923_vm2, %v3954_v6  ;;  %8151 = vmatprep.mubr.msk.bf16.mxu0 %vm3923_vm2, %v11324_v42  ;;  %v9637_v9 = vld [vmem:[#allocation7 + $0x280] ss:$8 sps:$4 sm:$0xff]   ;;  %v9640_v25 = vld [vmem:[#allocation7 + $0x290] ss:$8 sps:$4 sm:$0xff]  }
 0x40e   : > { %4405 = vmatmul.mubr.bf16.gmra.mrb[160].mxu0 %v11307_v29  ;;  %v9645_v59 = vld [vmem:[%s12462_s5 + $0x80] sm:$0xff]   ;;  %v4742_v13 = vld [vmem:[#allocation2 + $0x28] sm:$0xff]  ;;  %v9648_v14 = vld [vmem:[%s12462_s5 + $0x98] sm:$0xff]  }
 0x40f   : > { %v9649_v63 = vld [vmem:[%s12462_s5 + $0xa0] sm:$0xff]   ;;  %v4744_v22 = vld [vmem:[#allocation2 + $0x38] sm:$0xff]  ;;  %v9650_v40 = vld [vmem:[%s12462_s5 + $0xa8] sm:$0xff]  }
 0x410   : > { %v4741_v11 = vld [vmem:[#allocation2 + $0x20] sm:$0xff]  ;;  %v9651_v26 = vld [vmem:[%s12462_s5 + $0xb0] sm:$0xff]   ;;  %v4746_v6 = vld [vmem:[#allocation2 + $0x48] sm:$0xff] }
 0x411   : > { %v4743_v24 = vld [vmem:[#allocation2 + $0x30] sm:$0xff] }
 0x414   : > { %v11330_v47 = vld [vmem:[#allocation2 + $0xe8] sm:$0xff] }
 0x415   : > { %8152 = vmatprep.mubr.msk.bf16.mxu0 %vm3923_vm2, %v11330_v47 }
 0x416   : > { %4415 = vmatmul.mubr.bf16.gmra.mrb[164].mxu0 %v11322_v15 }
 0x417   : > { %8181 = vmatprep.mubr.msk.bf16.mxu0 %vm3923_vm2, %v3984_v31  ;;  %v9652_v31 = vld [vmem:[%s12462_s5 + $0xb8] sm:$0xff]  }
 0x41e   : > { %4601 = vmatmul.mubr.bf16.vlgmr.msra.gmra.mrb[112].mxu0 %v11336_v58 }
 0x41f   : > { %8182 = vmatprep.mubr.msk.bf16.mxu0 %vm3923_vm2, %v9872_v44  ;;  %4981 = vmatpush1.bf16.msra.mxu0 %v9601_v30  ;;  %v9653_v30 = vld [vmem:[%s12462_s5 + $0xc0] sm:$0xff]   ;;  %v9654_v44 = vld [vmem:[%s12462_s5 + $0xc8] sm:$0xff]  }
 0x420   : > { %4982 = vmatprep.subr.bf16.mxu0 %v9606_v60  ;;  %v4745_v60 = vld [vmem:[#allocation2 + $0x40] sm:$0xff] }
 0x423   : > { %4983 = vmatpush1.bf16.msra.mxu0 %v9604_v46  ;;  %v4747_v46 = vld [vmem:[#allocation2 + $0x50] sm:$0xff] }
 0x424   : > { %4984 = vmatprep.subr.bf16.mxu0 %v9609_v62  ;;  %v4749_v62 = vld [vmem:[#allocation2 + $0x60] sm:$0xff] }
 0x426   : > { %4611 = vmatmul.mubr.bf16.gmra.mrb[116].mxu0 %v9873_v23 }
 0x427   : > { %8183 = vmatprep.mubr.msk.bf16.mxu0 %vm3923_vm2, %v11111_v36  ;;  %4985 = vmatpush1.bf16.msra.mxu0 %v9607_v32  ;;  %v9624_v36 = vld [vmem:[#allocation7 + $0x234] ss:$8 sps:$4 sm:$0xff]   ;;  %v12519_v32 = vld [vmem:[#allocation14_spill] sm:$0xff] }
 0x428   : > { %4986 = vmatprep.subr.bf16.mxu0 %v9612_v8  ;;  %v12520_v8 = vsub.s32 0, %v12519_v32 }
 0x42b   : > { %4987 = vmatpush1.bf16.msra.mxu0 %v9610_v34  ;;  %v12521_v34 = vsub.s32 1, %v12519_v32 }
 0x42c   : > { %4988 = vmatprep.subr.bf16.mxu0 %v9615_v7 }
 0x42e   : > { %4621 = vmatmul.mubr.bf16.gmra.mrb[120].mxu0 %v9874_v35 }
 0x42f   : > { %8184 = vmatprep.mubr.msk.bf16.mxu0 %vm3923_vm2, %v11132_v41  ;;  %4989 = vmatpush1.bf16.msra.mxu0 %v9613_v48  ;;  %v9630_v41 = vld [vmem:[#allocation7 + $0x254] ss:$8 sps:$4 sm:$0xff]  }
 0x430   : > { %4990 = vmatprep.subr.bf16.mxu0 %v9618_v43 }
 0x433   : > { %4991 = vmatpush1.bf16.msra.mxu0 %v9616_v45 }
 0x434   : > { %4992 = vmatprep.subr.bf16.mxu0 %v9621_v37 }
 0x436   : > { %4631 = vmatmul.mubr.bf16.gmra.mrb[124].mxu0 %v11103_v5  ;;  %v9633_v5 = vld [vmem:[#allocation7 + $0x264] ss:$8 sps:$4 sm:$0xff]  }
 0x437   : > { %8185 = vmatprep.mubr.msk.bf16.mxu0 %vm3923_vm2, %v11153_v3  ;;  %4993 = vmatpush1.bf16.msra.mxu0 %v9619_v4  ;;  %v9636_v3 = vld [vmem:[#allocation7 + $0x274] ss:$8 sps:$4 sm:$0xff]  }
 0x438   : > { %4994 = vmatprep.subr.bf16.mxu0 %v9624_v36 }
 0x43b   : > { %4995 = vmatpush1.bf16.msra.mxu0 %v9622_v33 }
 0x43c   : > { %4996 = vmatprep.subr.bf16.mxu0 %v9627_v2 }
 0x43e   : > { %4641 = vmatmul.mubr.bf16.gmra.mrb[128].mxu0 %v11123_v52  ;;  %v9639_v52 = vld [vmem:[#allocation7 + $0x284] ss:$8 sps:$4 sm:$0xff]  }
 0x43f   : > { %8186 = vmatprep.mubr.msk.bf16.mxu0 %vm3923_vm2, %v11174_v61  ;;  %4997 = vmatpush1.bf16.msra.mxu0 %v9625_v51 }
 0x440   : > { %4998 = vmatprep.subr.bf16.mxu0 %v9630_v41 }
 0x443   : > { %4999 = vmatpush1.bf16.msra.mxu0 %v9628_v16 }
 0x444   : > { %5000 = vmatprep.subr.bf16.mxu0 %v9633_v5 }
 0x446   : > { %4651 = vmatmul.mubr.bf16.gmra.mrb[132].mxu0 %v11145_v54  ;;  %v9643_v54 = vld [vmem:[%s12462_s5 + $0x70] sm:$0xff]  }
 0x447   : > { %8187 = vmatprep.mubr.msk.bf16.mxu0 %vm3923_vm2, %v11194_v21  ;;  %5001 = vmatpush1.bf16.msra.mxu0 %v9631_v57 }
 0x448   : > { %5002 = vmatprep.subr.bf16.mxu0 %v9636_v3  ;;  %5562 = vmatpush1.bf16.msra.mxu1 %v9643_v54 }
 0x449   : > { %5563 = vmatprep.subr.bf16.mxu1 %v11336_v58 }
 0x44b   : > { %5003 = vmatpush1.bf16.msra.mxu0 %v9634_v1 }
 0x44c   : > { %5004 = vmatprep.subr.bf16.mxu0 %v9639_v52 }
 0x44e   : > { %4661 = vmatmul.mubr.bf16.gmra.mrb[136].mxu0 %v11165_v49  ;;  %v9644_v49 = vld [vmem:[%s12462_s5 + $0x78] sm:$0xff]  }
 0x44f   : > { %8188 = vmatprep.mubr.msk.bf16.mxu0 %vm3923_vm2, %v11214_v53  ;;  %5005 = vmatpush1.bf16.msra.mxu0 %v9637_v9 }
 0x450   : > { %5006 = vmatprep.subr.bf16.mxu0 %v9642_v18  ;;  %5564 = vmatpush1.bf16.msra.mxu1 %v9644_v49 }
 0x451   : > { %5565 = vmatprep.subr.bf16.mxu1 %v11336_v58 }
 0x453   : > { %5007 = vmatpush1.bf16.msra.mxu0 %v9640_v25 }
 0x454   : > { %6482 = vmatprep.subr.bf16.mxu0 %v11336_v58  ;;  %5566 = vmatpush1.bf16.msra.mxu1 %v9645_v59 }
 0x455   : > { %5567 = vmatprep.subr.bf16.mxu1 %v11336_v58 }
 0x456   : > { %4671 = vmatmul.mubr.bf16.gmra.mrb[140].mxu0 %v11187_v27 }
 0x457   : > { %8189 = vmatprep.mubr.msk.bf16.mxu0 %vm3923_vm2, %v11234_v50 }
 0x458   : > { %5568 = vmatpush1.bf16.msra.mxu1 %v9646_v56 }
 0x459   : > { %5569 = vmatprep.subr.bf16.mxu1 %v11336_v58 }
 0x45c   : > { %5570 = vmatpush1.bf16.msra.mxu1 %v9647_v20 }
 0x45d   : > { %5571 = vmatprep.subr.bf16.mxu1 %v11336_v58 }
 0x45e   : > { %4681 = vmatmul.mubr.bf16.gmra.mrb[144].mxu0 %v11206_v55 }
 0x45f   : > { %8190 = vmatprep.mubr.msk.bf16.mxu0 %vm3923_vm2, %v11254_v19 }
 0x460   : > { %5572 = vmatpush1.bf16.msra.mxu1 %v9648_v14 }
 0x461   : > { %5573 = vmatprep.subr.bf16.mxu1 %v11336_v58 }
 0x464   : > { %5574 = vmatpush1.bf16.msra.mxu1 %v9649_v63 }
 0x465   : > { %5575 = vmatprep.subr.bf16.mxu1 %v11336_v58 }
 0x466   : > { %4691 = vmatmul.mubr.bf16.gmra.mrb[148].mxu0 %v11227_v39 }
 0x467   : > { %8191 = vmatprep.mubr.msk.bf16.mxu0 %vm3923_vm2, %v11274_v38 }
 0x468   : > { %5576 = vmatpush1.bf16.msra.mxu1 %v9650_v40 }
 0x469   : > { %5577 = vmatprep.subr.bf16.mxu1 %v11336_v58 }
 0x46c   : > { %5578 = vmatpush1.bf16.msra.mxu1 %v9651_v26 }
 0x46d   : > { %5579 = vmatprep.subr.bf16.mxu1 %v11336_v58 }
 0x46e   : > { %4701 = vmatmul.mubr.bf16.gmra.mrb[152].mxu0 %v11246_v0 }
 0x46f   : > { %8192 = vmatprep.mubr.msk.bf16.mxu0 %vm3923_vm2, %v11294_v12 }
 0x470   : > { %5580 = vmatpush1.bf16.msra.mxu1 %v9652_v31 }
 0x471   : > { %5581 = vmatprep.subr.bf16.mxu1 %v11336_v58 }
 0x474   : > { %5582 = vmatpush1.bf16.msra.mxu1 %v9653_v30 }
 0x475   : > { %5583 = vmatprep.subr.bf16.mxu1 %v11336_v58 }
 0x476   : > { %4711 = vmatmul.mubr.bf16.gmra.mrb[156].mxu0 %v11267_v10 }
 0x477   : > { %8193 = vmatprep.mubr.msk.bf16.mxu0 %vm3923_vm2, %v11314_v28 }
 0x478   : > { %5584 = vmatpush1.bf16.msra.mxu1 %v9654_v44 }
 0x479   : > { %5585 = vmatprep.subr.bf16.mxu1 %v11336_v58 }
 0x47e   : > { %4721 = vmatmul.mubr.bf16.gmra.mrb[160].mxu0 %v11286_v17 }
 0x47f   : > { %8194 = vmatprep.mubr.msk.bf16.mxu0 %vm3923_vm2, %v11324_v42 }
 0x486   : > { %4731 = vmatmul.mubr.bf16.gmra.mrb[164].mxu0 %v11307_v29 }
 0x487   : > { %8223 = vmatprep.mubr.msk.bf16.mxu0 %vm3923_vm2, %v4742_v13 }
 0x48e   : > { %5013 = vmatmul.mubr.bf16.vlgmr.msra.gmra.mrb[112].mxu0 %v4741_v11 }
 0x48f   : > { %8224 = vmatprep.mubr.msk.bf16.mxu0 %vm3923_vm2, %v4744_v22  ;;  %v9661_v22 = vld [vmem:[%s12462_s5] sm:$0xff]  }
 0x496   : > { %5023 = vmatmul.mubr.bf16.gmra.mrb[116].mxu0 %v4743_v24 }
 0x497   : > { %8225 = vmatprep.mubr.msk.bf16.mxu0 %vm3923_vm2, %v4746_v6 }
 0x49e   : > { %5033 = vmatmul.mubr.bf16.gmra.mrb[120].mxu0 %v4745_v60 }
 0x49f   : > { %8226 = vmatprep.mubr.msk.bf16.mxu0 %vm3923_vm2, %v11174_v61  ;;  %v9655_v61 = vld [vmem:[%s12462_s5 + $0x2a0] sm:$0xff]  }
 0x4a0   : > { %6483 = vmatpush1.bf16.msra.mxu0 %v9655_v61 }
 0x4a1   : > { %6484 = vmatprep.subr.bf16.mxu0 %v11336_v58 }
 0x4a6   : > { %5043 = vmatmul.mubr.bf16.gmra.mrb[124].mxu0 %v4747_v46 }
 0x4a7   : > { %8227 = vmatprep.mubr.msk.bf16.mxu0 %vm3923_vm2, %v11194_v21  ;;  %v9656_v21 = vld [vmem:[%s12462_s5 + $0xd0] sm:$0xff]  }
 0x4a8   : > { %5586 = vmatpush1.bf16.msra.mxu1 %v9656_v21 }
 0x4a9   : > { %5587 = vmatprep.subr.bf16.mxu1 %v11336_v58 }
 0x4ae   : > { %5053 = vmatmul.mubr.bf16.gmra.mrb[128].mxu0 %v4749_v62  ;;  %v9663_v62 = vld [vmem:[%s12462_s5 + $0x8] sm:$0xff]  }
 0x4af   : > { %8228 = vmatprep.mubr.msk.bf16.mxu0 %vm3923_vm2, %v11214_v53  ;;  %v4768_v53 = vld [vmem:[#allocation2 + $0xf8] sm:$0xff] }
 0x4b6   : > { %5063 = vmatmul.mubr.bf16.gmra.mrb[132].mxu0 %v11187_v27  ;;  %v9657_v27 = vld [vmem:[%s12462_s5 + $0x2a8] sm:$0xff]  }
 0x4b7   : > { %8229 = vmatprep.mubr.msk.bf16.mxu0 %vm3923_vm2, %v11234_v50  ;;  %6485 = vmatpush1.bf16.msra.mxu0 %v9657_v27  ;;  %v9660_v50 = vld [vmem:[%s12462_s5 + $0x2b8] sm:$0xff]  }
 0x4b8   : > { %6486 = vmatprep.subr.bf16.mxu0 %v11336_v58 }
 0x4be   : > { %5073 = vmatmul.mubr.bf16.gmra.mrb[136].mxu0 %v11206_v55  ;;  %v9658_v55 = vld [vmem:[%s12462_s5 + $0x2b0] sm:$0xff]  }
 0x4bf   : > { %8230 = vmatprep.mubr.msk.bf16.mxu0 %vm3923_vm2, %v11254_v19  ;;  %6487 = vmatpush1.bf16.msra.mxu0 %v9658_v55  ;;  %v9664_v19 = vld [vmem:[%s12462_s5 + $0x2c8] sm:$0xff]  }
 0x4c0   : > { %6488 = vmatprep.subr.bf16.mxu0 %v11336_v58 }
 0x4c3   : > { %6489 = vmatpush1.bf16.msra.mxu0 %v9660_v50 }
 0x4c4   : > { %6490 = vmatprep.subr.bf16.mxu0 %v11336_v58 }
 0x4c6   : > { %5083 = vmatmul.mubr.bf16.gmra.mrb[140].mxu0 %v11227_v39  ;;  %v9659_v39 = vld [vmem:[%s12462_s5 + $0xd8] sm:$0xff]  }
 0x4c7   : > { %8231 = vmatprep.mubr.msk.bf16.mxu0 %vm3923_vm2, %v11274_v38  ;;  %5588 = vmatpush1.bf16.msra.mxu1 %v9659_v39  ;;  %v9668_v38 = vld [vmem:[%s12462_s5 + $0x2d8] sm:$0xff]   ;;  %v9665_v39 = vld [vmem:[%s12462_s5 + $0x10] sm:$0xff]  }
 0x4c8   : > { %5689 = vmatprep.subr.bf16.mxu1 %v11336_v58 }
 0x4ce   : > { %5093 = vmatmul.mubr.bf16.gmra.mrb[144].mxu0 %v11246_v0  ;;  %v9662_v0 = vld [vmem:[%s12462_s5 + $0x2c0] sm:$0xff]  }
 0x4cf   : > { %8232 = vmatprep.mubr.msk.bf16.mxu0 %vm3923_vm2, %v11294_v12  ;;  %6491 = vmatpush1.bf16.msra.mxu0 %v9662_v0  ;;  %v9672_v12 = vld [vmem:[%s12462_s5 + $0x2e8] sm:$0xff]  }
 0x4d0   : > { %6492 = vmatprep.subr.bf16.mxu0 %v11336_v58 }
 0x4d3   : > { %6493 = vmatpush1.bf16.msra.mxu0 %v9664_v19 }
 0x4d4   : > { %6494 = vmatprep.subr.bf16.mxu0 %v11336_v58 }
 0x4d6   : > { %5103 = vmatmul.mubr.bf16.gmra.mrb[148].mxu0 %v11267_v10  ;;  %v9666_v10 = vld [vmem:[%s12462_s5 + $0x2d0] sm:$0xff]  }
 0x4d7   : > { %8233 = vmatprep.mubr.msk.bf16.mxu0 %vm3923_vm2, %v11314_v28  ;;  %6495 = vmatpush1.bf16.msra.mxu0 %v9666_v10  ;;  %v9676_v28 = vld [vmem:[%s12462_s5 + $0x2f8] sm:$0xff]  }
 0x4d8   : > { %6496 = vmatprep.subr.bf16.mxu0 %v11336_v58 }
 0x4db   : > { %6497 = vmatpush1.bf16.msra.mxu0 %v9668_v38 }
 0x4dc   : > { %6498 = vmatprep.subr.bf16.mxu0 %v11336_v58 }
 0x4de   : > { %5113 = vmatmul.mubr.bf16.gmra.mrb[152].mxu0 %v11286_v17  ;;  %v9670_v17 = vld [vmem:[%s12462_s5 + $0x2e0] sm:$0xff]  }
 0x4df   : > { %8234 = vmatprep.mubr.msk.bf16.mxu0 %vm3923_vm2, %v11324_v42  ;;  %6499 = vmatpush1.bf16.msra.mxu0 %v9670_v17  ;;  %v9680_v42 = vld [vmem:[%s12462_s5 + $0x308] sm:$0xff]  }
 0x4e0   : > { %6500 = vmatprep.subr.bf16.mxu0 %v11336_v58 }
 0x4e3   : > { %6501 = vmatpush1.bf16.msra.mxu0 %v9672_v12 }
 0x4e4   : > { %6502 = vmatprep.subr.bf16.mxu0 %v11336_v58 }
 0x4e6   : > { %5123 = vmatmul.mubr.bf16.gmra.mrb[156].mxu0 %v11307_v29  ;;  %v9674_v29 = vld [vmem:[%s12462_s5 + $0x2f0] sm:$0xff]  }
 0x4e7   : > { %8235 = vmatprep.mubr.msk.bf16.mxu0 %vm3923_vm2, %v11330_v47  ;;  %6503 = vmatpush1.bf16.msra.mxu0 %v9674_v29  ;;  %v5209_v47 = vld [vmem:[#allocation8] sm:$0x3] }
 0x4e8   : > { %6504 = vmatprep.subr.bf16.mxu0 %v11336_v58  ;;  %v11523_v23 = vrot.slane %v5209_v47, %v12520_v8  ;;  %v11528_v7 = vrot.slane %v5209_v47, %v12521_v34 }
 0x4eb   : > { %6505 = vmatpush1.bf16.msra.mxu0 %v9676_v28 }
 0x4ec   : > { %6506 = vmatprep.subr.bf16.mxu0 %v11336_v58 }
 0x4ee   : > { %5133 = vmatmul.mubr.bf16.gmra.mrb[160].mxu0 %v11322_v15  ;;  %v9678_v15 = vld [vmem:[%s12462_s5 + $0x300] sm:$0xff]  }
 0x4ef   : > { %8236 = vmatprep.mubr.msk.bf16.mxu0 %vm3923_vm2, %v4768_v53  ;;  %6507 = vmatpush1.bf16.msra.mxu0 %v9678_v15  ;;  %v9667_v15 = vld [vmem:[%s12462_s5 + $0x18] sm:$0xff]  }
 0x4f0   : > { %6508 = vmatprep.subr.bf16.mxu0 %v11336_v58 }
 0x4f3   : > { %6509 = vmatpush1.bf16.msra.mxu0 %v9680_v42 }
 0x4f4   : > { %6800 = vmatprep.subr.bf16.mxu0 %v11336_v58 }
 0x4f6   : > { %5143 = vmatmul.mubr.bf16.gmra.mrb[164].mxu0 %v11336_v58 }
 0x561   : > { %v5014_v48 = vpop.f32.mrb[112].mxu0 }
 0x562   : > { %v5221_v43 = vadd.f32 %v11523_v23, %v5014_v48  ;;  %v5016_v35 = vpop.f32.mrb[113].mxu0  ;;  %v9669_v48 = vld [vmem:[%s12462_s5 + $0x20] sm:$0xff]  }
 0x563   : > { %v5222_v45 = vadd.f32 %v11528_v7, %v5016_v35  ;;  %v5018_v37 = vpop.f32.mrb[114].mxu0 }
 0x564   : > { %v5277_v4 = vmax.f32 %v5221_v43, 0.0  ;;  %v5223_v36 = vadd.f32 %v11523_v23, %v5018_v37  ;;  %v5020_v33 = vpop.f32.mrb[115].mxu0 }
 0x565   : > { %v5278_v2 = vmax.f32 %v5222_v45, 0.0  ;;  %v5224_v51 = vadd.f32 %v11528_v7, %v5020_v33 }
 0x566   : > { %5333 = vst [vmem:[%s11534_s15] sm:$0xff] %v5277_v4  ;;  %v5279_v41 = vmax.f32 %v5223_v36, 0.0 }
 0x567   : > { %5334 = vst.msk [vmem:[%s11534_s15 + $0x8] sm:$0xff] %vm3923_vm2, %v5278_v2  ;;  %v5280_v16 = vmax.f32 %v5224_v51, 0.0 }
 0x568   : > { %5335 = vst [vmem:[%s11534_s15 + $0x10] sm:$0xff] %v5279_v41  ;;  %v11543_v5 = vpack.c.bf16 %v5279_v41, %v5277_v4  ;;  %v9671_v41 = vld [vmem:[%s12462_s5 + $0x28] sm:$0xff]  }
 0x569   : > { %5336 = vst.msk [vmem:[%s11534_s15 + $0x18] sm:$0xff] %vm3923_vm2, %v5280_v16  ;;  %v5390_v57 = vpack.c.bf16 %v5280_v16, %v5278_v2  ;;  %v5024_v3 = vpop.f32.mrb[116].mxu0 }
 0x56a   : > { %v5225_v1 = vadd.f32 %v11523_v23, %v5024_v3  ;;  %v5026_v52 = vpop.f32.mrb[117].mxu0 }
 0x56b   : > { %v5226_v9 = vadd.f32 %v11528_v7, %v5026_v52  ;;  %v5028_v18 = vpop.f32.mrb[118].mxu0 }
 0x56c   : > { %v5281_v25 = vmax.f32 %v5225_v1, 0.0  ;;  %v5227_v54 = vadd.f32 %v11523_v23, %v5028_v18  ;;  %v5030_v49 = vpop.f32.mrb[119].mxu0 }
 0x56d   : > { %v5282_v59 = vmax.f32 %v5226_v9, 0.0  ;;  %v5228_v56 = vadd.f32 %v11528_v7, %v5030_v49  ;;  %v9673_v9 = vld [vmem:[%s12462_s5 + $0x30] sm:$0xff]  }
 0x56e   : > { %5337 = vst [vmem:[%s11534_s15 + $0x20] sm:$0xff] %v5281_v25  ;;  %v5283_v20 = vmax.f32 %v5227_v54, 0.0 }
 0x56f   : > { %5338 = vst.msk [vmem:[%s11534_s15 + $0x28] sm:$0xff] %vm3923_vm2, %v5282_v59  ;;  %v5284_v13 = vmax.f32 %v5228_v56, 0.0 }
 0x570   : > { %5339 = vst [vmem:[%s11534_s15 + $0x30] sm:$0xff] %v5283_v20  ;;  %v5391_v14 = vpack.c.bf16 %v5283_v20, %v5281_v25 }
 0x571   : > { %5340 = vst.msk [vmem:[%s11534_s15 + $0x38] sm:$0xff] %vm3923_vm2, %v5284_v13  ;;  %v5392_v63 = vpack.c.bf16 %v5284_v13, %v5282_v59  ;;  %v5034_v11 = vpop.f32.mrb[120].mxu0 }
 0x572   : > { %v5229_v40 = vadd.f32 %v11523_v23, %v5034_v11  ;;  %v5036_v26 = vpop.f32.mrb[121].mxu0 }
 0x573   : > { %v5230_v24 = vadd.f32 %v11528_v7, %v5036_v26  ;;  %v5038_v6 = vpop.f32.mrb[122].mxu0  ;;  %8279 = vmatprep.mubr.msk.bf16.mxu1 %vm3923_vm2, %v5392_v63  ;;  %v9675_v63 = vld [vmem:[%s12462_s5 + $0x38] sm:$0xff]  }
 0x574   : > { %v5285_v31 = vmax.f32 %v5229_v40, 0.0  ;;  %v5231_v30 = vadd.f32 %v11523_v23, %v5038_v6  ;;  %v5040_v60 = vpop.f32.mrb[123].mxu0  ;;  %5594 = vmatmul.mubr.bf16.vlgmr.msra.gmra.mrb[112].mxu1 %v5391_v14  ;;  %v9677_v6 = vld [vmem:[%s12462_s5 + $0x40] sm:$0xff]  }
 0x575   : > { %v5286_v44 = vmax.f32 %v5230_v24, 0.0  ;;  %v5232_v46 = vadd.f32 %v11528_v7, %v5040_v60  ;;  %5690 = vmatpush1.bf16.msra.mxu1 %v9661_v22  ;;  %8294 = vmatprep.mubr.msk.bf16.mxu1 %vm3923_vm2, %v5390_v57 }
 0x576   : > { %5341 = vst [vmem:[%s11534_s15 + $0x40] sm:$0xff] %v5285_v31  ;;  %v5287_v61 = vmax.f32 %v5231_v30, 0.0  ;;  %5691 = vmatprep.subr.bf16.mxu1 %v11336_v58 }
 0x577   : > { %5342 = vst.msk [vmem:[%s11534_s15 + $0x48] sm:$0xff] %vm3923_vm2, %v5286_v44  ;;  %v5288_v27 = vmax.f32 %v5232_v46, 0.0 }
 0x578   : > { %5343 = vst [vmem:[%s11534_s15 + $0x50] sm:$0xff] %v5287_v61  ;;  %v11574_v21 = vpack.c.bf16 %v5287_v61, %v5285_v31 }
 0x579   : > { %5344 = vst.msk [vmem:[%s11534_s15 + $0x58] sm:$0xff] %vm3923_vm2, %v5288_v27  ;;  %v11578_v55 = vpack.c.bf16 %v5288_v27, %v5286_v44  ;;  %5692 = vmatpush1.bf16.msra.mxu1 %v9663_v62  ;;  %v5044_v53 = vpop.f32.mrb[124].mxu0 }
 0x57a   : > { %v5233_v50 = vadd.f32 %v11523_v23, %v5044_v53  ;;  %v5046_v0 = vpop.f32.mrb[125].mxu0  ;;  %5693 = vmatprep.subr.bf16.mxu1 %v11336_v58 }
 0x57b   : > { %v5234_v19 = vadd.f32 %v11528_v7, %v5046_v0  ;;  %v5048_v10 = vpop.f32.mrb[126].mxu0 }
 0x57c   : > { %v5289_v38 = vmax.f32 %v5233_v50, 0.0  ;;  %v5235_v17 = vadd.f32 %v11523_v23, %v5048_v10  ;;  %v5050_v12 = vpop.f32.mrb[127].mxu0 }
 0x57d   : > { %v5290_v29 = vmax.f32 %v5234_v19, 0.0  ;;  %v5236_v28 = vadd.f32 %v11528_v7, %v5050_v12  ;;  %5694 = vmatpush1.bf16.msra.mxu1 %v9665_v39  ;;  %v9679_v39 = vld [vmem:[%s12462_s5 + $0x48] sm:$0xff]   ;;  %v9682_v12 = vld [vmem:[%s12462_s5 + $0x380] sm:$0xff]  }
 0x57e   : > { %5345 = vst [vmem:[%s11534_s15 + $0x60] sm:$0xff] %v5289_v38  ;;  %v5291_v42 = vmax.f32 %v5235_v17, 0.0  ;;  %5695 = vmatprep.subr.bf16.mxu1 %v11336_v58  ;;  %v9681_v17 = vld [vmem:[%s12462_s5 + $0x50] sm:$0xff]  }
 0x57f   : > { %5346 = vst.msk [vmem:[%s11534_s15 + $0x68] sm:$0xff] %vm3923_vm2, %v5290_v29  ;;  %v5292_v47 = vmax.f32 %v5236_v28, 0.0 }
 0x580   : > { %5347 = vst [vmem:[%s11534_s15 + $0x70] sm:$0xff] %v5291_v42  ;;  %v11596_v32 = vpack.c.bf16 %v5291_v42, %v5289_v38 }
 0x581   : > { %5348 = vst.msk [vmem:[%s11534_s15 + $0x78] sm:$0xff] %vm3923_vm2, %v5292_v47  ;;  %v11600_v8 = vpack.c.bf16 %v5292_v47, %v5290_v29  ;;  %5696 = vmatpush1.bf16.msra.mxu1 %v9667_v15  ;;  %v5054_v34 = vpop.f32.mrb[128].mxu0 }
 0x582   : > { %v5237_v43 = vadd.f32 %v11523_v23, %v5054_v34  ;;  %v5056_v35 = vpop.f32.mrb[129].mxu0  ;;  %5697 = vmatprep.subr.bf16.mxu1 %v11336_v58 }
 0x583   : > { %v5238_v45 = vadd.f32 %v11528_v7, %v5056_v35  ;;  %v5058_v37 = vpop.f32.mrb[130].mxu0 }
 0x584   : > { %v5293_v4 = vmax.f32 %v5237_v43, 0.0  ;;  %v5239_v36 = vadd.f32 %v11523_v23, %v5058_v37  ;;  %v5060_v33 = vpop.f32.mrb[131].mxu0  ;;  %v9684_v37 = vld [vmem:[%s12462_s5 + $0x388] sm:$0xff]  }
 0x585   : > { %v5294_v2 = vmax.f32 %v5238_v45, 0.0  ;;  %v5240_v51 = vadd.f32 %v11528_v7, %v5060_v33  ;;  %5698 = vmatpush1.bf16.msra.mxu1 %v9669_v48  ;;  %v9683_v45 = vld [vmem:[%s12462_s5 + $0x58] sm:$0xff]  }
 0x586   : > { %5349 = vst [vmem:[%s11534_s15 + $0x80] sm:$0xff] %v5293_v4  ;;  %v5295_v16 = vmax.f32 %v5239_v36, 0.0  ;;  %5699 = vmatprep.subr.bf16.mxu1 %v11336_v58 }
 0x587   : > { %5350 = vst.msk [vmem:[%s11534_s15 + $0x88] sm:$0xff] %vm3923_vm2, %v5294_v2  ;;  %v5296_v57 = vmax.f32 %v5240_v51, 0.0 }
 0x588   : > { %5351 = vst [vmem:[%s11534_s15 + $0x90] sm:$0xff] %v5295_v16  ;;  %v11618_v3 = vpack.c.bf16 %v5295_v16, %v5293_v4  ;;  %v9686_v16 = vld [vmem:[%s12462_s5 + $0x390] sm:$0xff]  }
 0x589   : > { %5352 = vst.msk [vmem:[%s11534_s15 + $0x98] sm:$0xff] %vm3923_vm2, %v5296_v57  ;;  %v11622_v1 = vpack.c.bf16 %v5296_v57, %v5294_v2  ;;  %5700 = vmatpush1.bf16.msra.mxu1 %v9671_v41  ;;  %v5064_v52 = vpop.f32.mrb[132].mxu0  ;;  %v9685_v41 = vld [vmem:[%s12462_s5 + $0x60] sm:$0xff]  }
 0x58a   : > { %v5241_v18 = vadd.f32 %v11523_v23, %v5064_v52  ;;  %v5066_v25 = vpop.f32.mrb[133].mxu0  ;;  %5701 = vmatprep.subr.bf16.mxu1 %v11336_v58 }
 0x58b   : > { %v5242_v54 = vadd.f32 %v11528_v7, %v5066_v25  ;;  %v5068_v49 = vpop.f32.mrb[134].mxu0 }
 0x58c   : > { %v5297_v59 = vmax.f32 %v5241_v18, 0.0  ;;  %v5243_v56 = vadd.f32 %v11523_v23, %v5068_v49  ;;  %v5070_v20 = vpop.f32.mrb[135].mxu0 }
 0x58d   : > { %v5298_v13 = vmax.f32 %v5242_v54, 0.0  ;;  %v5244_v14 = vadd.f32 %v11528_v7, %v5070_v20  ;;  %5702 = vmatpush1.bf16.msra.mxu1 %v9673_v9  ;;  %v9687_v20 = vld [vmem:[%s12462_s5 + $0x68] sm:$0xff]  }
 0x58e   : > { %5353 = vst [vmem:[%s11534_s15 + $0xa0] sm:$0xff] %v5297_v59  ;;  %v5299_v11 = vmax.f32 %v5243_v56, 0.0  ;;  %5703 = vmatprep.subr.bf16.mxu1 %v11336_v58 }
 0x58f   : > { %5354 = vst.msk [vmem:[%s11534_s15 + $0xa8] sm:$0xff] %vm3923_vm2, %v5298_v13  ;;  %v5300_v22 = vmax.f32 %v5244_v14, 0.0 }
 0x590   : > { %5355 = vst [vmem:[%s11534_s15 + $0xb0] sm:$0xff] %v5299_v11  ;;  %v11640_v40 = vpack.c.bf16 %v5299_v11, %v5297_v59 }
 0x591   : > { %5356 = vst.msk [vmem:[%s11534_s15 + $0xb8] sm:$0xff] %vm3923_vm2, %v5300_v22  ;;  %v11644_v26 = vpack.c.bf16 %v5300_v22, %v5298_v13  ;;  %5704 = vmatpush1.bf16.msra.mxu1 %v9675_v63  ;;  %v5074_v24 = vpop.f32.mrb[136].mxu0  ;;  %v9688_v13 = vld [vmem:[%s12462_s5 + $0x398] sm:$0xff]  }
 0x592   : > { %v5245_v31 = vadd.f32 %v11523_v23, %v5074_v24  ;;  %v5076_v30 = vpop.f32.mrb[137].mxu0  ;;  %5705 = vmatprep.subr.bf16.mxu1 %v11336_v58 }
 0x593   : > { %v5246_v60 = vadd.f32 %v11528_v7, %v5076_v30  ;;  %v5078_v44 = vpop.f32.mrb[138].mxu0 }
 0x594   : > { %v5301_v46 = vmax.f32 %v5245_v31, 0.0  ;;  %v5247_v62 = vadd.f32 %v11523_v23, %v5078_v44  ;;  %v5080_v61 = vpop.f32.mrb[139].mxu0 }
 0x595   : > { %v5302_v27 = vmax.f32 %v5246_v60, 0.0  ;;  %v5248_v53 = vadd.f32 %v11528_v7, %v5080_v61  ;;  %5706 = vmatpush1.bf16.msra.mxu1 %v9677_v6  ;;  %v9689_v6 = vld [vmem:[%s12462_s5 + $0xe0] sm:$0xff]  }
 0x596   : > { %5357 = vst [vmem:[%s11534_s15 + $0xc0] sm:$0xff] %v5301_v46  ;;  %v5303_v50 = vmax.f32 %v5247_v62, 0.0  ;;  %5707 = vmatprep.subr.bf16.mxu1 %v11336_v58  ;;  %v9690_v60 = vld [vmem:[%s12462_s5 + $0x3a0] sm:$0xff]  }
 0x597   : > { %5358 = vst.msk [vmem:[%s11534_s15 + $0xc8] sm:$0xff] %vm3923_vm2, %v5302_v27  ;;  %v5304_v0 = vmax.f32 %v5248_v53, 0.0 }
 0x598   : > { %5359 = vst [vmem:[%s11534_s15 + $0xd0] sm:$0xff] %v5303_v50  ;;  %v5401_v19 = vpack.c.bf16 %v5303_v50, %v5301_v46  ;;  %v9691_v50 = vld [vmem:[%s12462_s5 + $0xe8] sm:$0xff]  }
 0x599   : > { %5360 = vst.msk [vmem:[%s11534_s15 + $0xd8] sm:$0xff] %vm3923_vm2, %v5304_v0  ;;  %v5402_v10 = vpack.c.bf16 %v5304_v0, %v5302_v27  ;;  %5708 = vmatpush1.bf16.msra.mxu1 %v9679_v39  ;;  %v5084_v38 = vpop.f32.mrb[140].mxu0 }
 0x59a   : > { %v5249_v29 = vadd.f32 %v11523_v23, %v5084_v38  ;;  %v5086_v28 = vpop.f32.mrb[141].mxu0  ;;  %5709 = vmatprep.subr.bf16.mxu1 %v11336_v58 }
 0x59b   : > { %v5250_v15 = vadd.f32 %v11528_v7, %v5086_v28  ;;  %v5088_v42 = vpop.f32.mrb[142].mxu0  ;;  %8509 = vmatprep.mubr.msk.bf16.mxu0 %vm3923_vm2, %v5402_v10  ;;  %v9694_v28 = vld [vmem:[%s12462_s5 + $0x3b0] sm:$0xff]  }
 0x59c   : > { %v5305_v47 = vmax.f32 %v5249_v29, 0.0  ;;  %v5251_v34 = vadd.f32 %v11523_v23, %v5088_v42  ;;  %v5090_v48 = vpop.f32.mrb[143].mxu0  ;;  %6515 = vmatmul.mubr.bf16.vlgmr.msra.gmra.mrb[168].mxu0 %v5401_v19 }
 0x59d   : > { %v5306_v43 = vmax.f32 %v5250_v15, 0.0  ;;  %v5252_v35 = vadd.f32 %v11528_v7, %v5090_v48  ;;  %5710 = vmatpush1.bf16.msra.mxu1 %v9681_v17  ;;  %6801 = vmatpush1.bf16.msra.mxu0 %v9682_v12  ;;  %v9693_v17 = vld [vmem:[%s12462_s5 + $0xf0] sm:$0xff]  }
 0x59e   : > { %5361 = vst [vmem:[%s11534_s15 + $0xe0] sm:$0xff] %v5305_v47  ;;  %v5307_v4 = vmax.f32 %v5251_v34, 0.0  ;;  %5711 = vmatprep.subr.bf16.mxu1 %v11336_v58  ;;  %6802 = vmatprep.subr.bf16.mxu0 %v11336_v58 }
 0x59f   : > { %5362 = vst.msk [vmem:[%s11534_s15 + $0xe8] sm:$0xff] %vm3923_vm2, %v5306_v43  ;;  %v5308_v36 = vmax.f32 %v5252_v35, 0.0 }
 0x5a0   : > { %5363 = vst [vmem:[%s11534_s15 + $0xf0] sm:$0xff] %v5307_v4  ;;  %v11688_v33 = vpack.c.bf16 %v5307_v4, %v5305_v47  ;;  %v9696_v4 = vld [vmem:[%s12462_s5 + $0x3b8] sm:$0xff]  }
 0x5a1   : > { %5364 = vst.msk [vmem:[%s11534_s15 + $0xf8] sm:$0xff] %vm3923_vm2, %v5308_v36  ;;  %v11692_v2 = vpack.c.bf16 %v5308_v36, %v5306_v43  ;;  %5712 = vmatpush1.bf16.msra.mxu1 %v9683_v45  ;;  %6803 = vmatpush1.bf16.msra.mxu0 %v9684_v37  ;;  %v5094_v51 = vpop.f32.mrb[144].mxu0  ;;  %v9695_v45 = vld [vmem:[%s12462_s5 + $0xf8] sm:$0xff]  }
 0x5a2   : > { %v5253_v57 = vadd.f32 %v11523_v23, %v5094_v51  ;;  %v5096_v52 = vpop.f32.mrb[145].mxu0  ;;  %5713 = vmatprep.subr.bf16.mxu1 %v11336_v58  ;;  %6804 = vmatprep.subr.bf16.mxu0 %v11336_v58 }
 0x5a3   : > { %v5254_v9 = vadd.f32 %v11528_v7, %v5096_v52  ;;  %v5098_v18 = vpop.f32.mrb[146].mxu0 }
 0x5a4   : > { %v5309_v25 = vmax.f32 %v5253_v57, 0.0  ;;  %v5255_v54 = vadd.f32 %v11523_v23, %v5098_v18  ;;  %v5100_v49 = vpop.f32.mrb[147].mxu0  ;;  %v9697_v57 = vld [vmem:[%s12462_s5 + $0x100] sm:$0xff]  }
 0x5a5   : > { %v5310_v59 = vmax.f32 %v5254_v9, 0.0  ;;  %v5256_v56 = vadd.f32 %v11528_v7, %v5100_v49  ;;  %5714 = vmatpush1.bf16.msra.mxu1 %v9685_v41  ;;  %6805 = vmatpush1.bf16.msra.mxu0 %v9686_v16  ;;  %v9698_v18 = vld [vmem:[%s12462_s5 + $0x3c0] sm:$0xff]  }
 0x5a6   : > { %5365 = vst [vmem:[%s11534_s15 + $0x100] sm:$0xff] %v5309_v25  ;;  %v5311_v14 = vmax.f32 %v5255_v54, 0.0  ;;  %5715 = vmatprep.subr.bf16.mxu1 %v11336_v58  ;;  %6806 = vmatprep.subr.bf16.mxu0 %v11336_v58 }
 0x5a7   : > { %5366 = vst.msk [vmem:[%s11534_s15 + $0x108] sm:$0xff] %vm3923_vm2, %v5310_v59  ;;  %v5312_v63 = vmax.f32 %v5256_v56, 0.0 }
 0x5a8   : > { %5367 = vst [vmem:[%s11534_s15 + $0x110] sm:$0xff] %v5311_v14  ;;  %v11718_v11 = vpack.c.bf16 %v5311_v14, %v5309_v25  ;;  %v9699_v14 = vld [vmem:[%s12462_s5 + $0x108] sm:$0xff]  }
 0x5a9   : > { %5368 = vst.msk [vmem:[%s11534_s15 + $0x118] sm:$0xff] %vm3923_vm2, %v5312_v63  ;;  %v5406_v22 = vpack.c.bf16 %v5312_v63, %v5310_v59  ;;  %5716 = vmatpush1.bf16.msra.mxu1 %v9687_v20  ;;  %6807 = vmatpush1.bf16.msra.mxu0 %v9688_v13  ;;  %v5104_v24 = vpop.f32.mrb[148].mxu0 }
 0x5aa   : > { %v5257_v31 = vadd.f32 %v11523_v23, %v5104_v24  ;;  %v5106_v30 = vpop.f32.mrb[149].mxu0  ;;  %5846 = vmatprep.subr.bf16.mxu1 %v11336_v58  ;;  %6808 = vmatprep.subr.bf16.mxu0 %v11336_v58 }
 0x5ab   : > { %v5258_v44 = vadd.f32 %v11528_v7, %v5106_v30  ;;  %v5108_v46 = vpop.f32.mrb[150].mxu0  ;;  %8595 = vmatprep.mubr.msk.bf16.mxu0 %vm3923_vm2, %v5406_v22  ;;  %v9700_v22 = vld [vmem:[%s12462_s5 + $0x3c8] sm:$0xff]  }
 0x5ac   : > { %v5313_v62 = vmax.f32 %v5257_v31, 0.0  ;;  %v5259_v61 = vadd.f32 %v11523_v23, %v5108_v46  ;;  %5722 = vmatmul.mubr.bf16.vlgmr.msra.gmra.mrb[116].mxu1 %v11543_v5  ;;  %v5110_v27 = vpop.f32.mrb[151].mxu0  ;;  %v9692_v5 = vld [vmem:[%s12462_s5 + $0x3a8] sm:$0xff]  }
 0x5ad   : > { %v5314_v53 = vmax.f32 %v5258_v44, 0.0  ;;  %v5260_v39 = vadd.f32 %v11528_v7, %v5110_v27  ;;  %5847 = vmatpush1.bf16.msra.mxu1 %v9689_v6  ;;  %8337 = vmatprep.mubr.msk.bf16.mxu1 %vm3923_vm2, %v11578_v55 }
 0x5ae   : > { %5369 = vst [vmem:[%s11534_s15 + $0x120] sm:$0xff] %v5313_v62  ;;  %v5315_v0 = vmax.f32 %v5259_v61, 0.0  ;;  %6809 = vmatpush1.bf16.msra.mxu0 %v9690_v60  ;;  %5848 = vmatprep.subr.bf16.mxu1 %v11336_v58  ;;  %v9701_v60 = vld [vmem:[%s12462_s5 + $0x110] sm:$0xff]  }
 0x5af   : > { %5370 = vst.msk [vmem:[%s11534_s15 + $0x128] sm:$0xff] %vm3923_vm2, %v5314_v53  ;;  %v5316_v19 = vmax.f32 %v5260_v39, 0.0  ;;  %6810 = vmatprep.subr.bf16.mxu0 %v11336_v58 }
 0x5b0   : > { %5371 = vst [vmem:[%s11534_s15 + $0x130] sm:$0xff] %v5315_v0  ;;  %v11750_v55 = vpack.c.bf16 %v5315_v0, %v5313_v62  ;;  %v11820_v62 = vld [vmem:[#allocation2] sm:$0xff] }
 0x5b1   : > { %5372 = vst.msk [vmem:[%s11534_s15 + $0x138] sm:$0xff] %vm3923_vm2, %v5316_v19  ;;  %v11754_v10 = vpack.c.bf16 %v5316_v19, %v5314_v53  ;;  %5849 = vmatpush1.bf16.msra.mxu1 %v9691_v50  ;;  %v5114_v38 = vpop.f32.mrb[152].mxu0  ;;  %v9703_v19 = vld [vmem:[%s12462_s5 + $0x118] sm:$0xff]  }
 0x5b2   : > { %6811 = vmatpush1.bf16.msra.mxu0 %v9692_v5  ;;  %v5261_v12 = vadd.f32 %v11523_v23, %v5114_v38  ;;  %v5116_v29 = vpop.f32.mrb[153].mxu0  ;;  %5850 = vmatprep.subr.bf16.mxu1 %v11336_v58 }
 0x5b3   : > { %v5262_v15 = vadd.f32 %v11528_v7, %v5116_v29  ;;  %v5118_v42 = vpop.f32.mrb[154].mxu0  ;;  %6812 = vmatprep.subr.bf16.mxu0 %v11336_v58 }
 0x5b4   : > { %v5317_v47 = vmax.f32 %v5261_v12, 0.0  ;;  %v5263_v34 = vadd.f32 %v11523_v23, %v5118_v42  ;;  %v5120_v48 = vpop.f32.mrb[155].mxu0  ;;  %v9705_v42 = vld [vmem:[%s12462_s5 + $0x120] sm:$0xff]  }
 0x5b5   : > { %v5318_v43 = vmax.f32 %v5262_v15, 0.0  ;;  %v5264_v35 = vadd.f32 %v11528_v7, %v5120_v48  ;;  %5851 = vmatpush1.bf16.msra.mxu1 %v9693_v17  ;;  %v9704_v17 = vld [vmem:[%s12462_s5 + $0x3d8] sm:$0xff]   ;;  %v9706_v48 = vld [vmem:[%s12462_s5 + $0x3e0] sm:$0xff]  }
 0x5b6   : > { %5373 = vst [vmem:[%s11534_s15 + $0x140] sm:$0xff] %v5317_v47  ;;  %v5319_v37 = vmax.f32 %v5263_v34, 0.0  ;;  %6813 = vmatpush1.bf16.msra.mxu0 %v9694_v28  ;;  %5852 = vmatprep.subr.bf16.mxu1 %v11336_v58 }
 0x5b7   : > { %5374 = vst.msk [vmem:[%s11534_s15 + $0x148] sm:$0xff] %vm3923_vm2, %v5318_v43  ;;  %v5320_v36 = vmax.f32 %v5264_v35, 0.0  ;;  %6814 = vmatprep.subr.bf16.mxu0 %v11336_v58 }
 0x5b8   : > { %5375 = vst [vmem:[%s11534_s15 + $0x150] sm:$0xff] %v5319_v37  ;;  %v11780_v51 = vpack.c.bf16 %v5319_v37, %v5317_v47 }
 0x5b9   : > { %5376 = vst.msk [vmem:[%s11534_s15 + $0x158] sm:$0xff] %vm3923_vm2, %v5320_v36  ;;  %v11784_v41 = vpack.c.bf16 %v5320_v36, %v5318_v43  ;;  %5853 = vmatpush1.bf16.msra.mxu1 %v9695_v45  ;;  %v5124_v16 = vpop.f32.mrb[156].mxu0 }
 0x5ba   : > { %6815 = vmatpush1.bf16.msra.mxu0 %v9696_v4  ;;  %v5265_v52 = vadd.f32 %v11523_v23, %v5124_v16  ;;  %v5126_v9 = vpop.f32.mrb[157].mxu0  ;;  %5854 = vmatprep.subr.bf16.mxu1 %v11336_v58 }
 0x5bb   : > { %v5266_v25 = vadd.f32 %v11528_v7, %v5126_v9  ;;  %v5128_v54 = vpop.f32.mrb[158].mxu0  ;;  %6816 = vmatprep.subr.bf16.mxu0 %v11336_v58  ;;  %v9708_v9 = vld [vmem:[%s12462_s5 + $0x3e8] sm:$0xff]  }
 0x5bc   : > { %v5321_v49 = vmax.f32 %v5265_v52, 0.0  ;;  %v5267_v59 = vadd.f32 %v11523_v23, %v5128_v54  ;;  %v5130_v56 = vpop.f32.mrb[159].mxu0  ;;  %v9710_v54 = vld [vmem:[%s12462_s5 + $0x460] sm:$0xff]  }
 0x5bd   : > { %v5322_v20 = vmax.f32 %v5266_v25, 0.0  ;;  %v5268_v13 = vadd.f32 %v11528_v7, %v5130_v56  ;;  %5855 = vmatpush1.bf16.msra.mxu1 %v9697_v57  ;;  %v9707_v57 = vld [vmem:[%s12462_s5 + $0x128] sm:$0xff]   ;;  %v9709_v25 = vld [vmem:[%s12462_s5 + $0x130] sm:$0xff]  }
 0x5be   : > { %5377 = vst [vmem:[%s11534_s15 + $0x160] sm:$0xff] %v5321_v49  ;;  %v5323_v63 = vmax.f32 %v5267_v59, 0.0  ;;  %6817 = vmatpush1.bf16.msra.mxu0 %v9698_v18  ;;  %5856 = vmatprep.subr.bf16.mxu1 %v11336_v58  ;;  %v9712_v59 = vld [vmem:[%s12462_s5 + $0x468] sm:$0xff]  }
 0x5bf   : > { %5378 = vst.msk [vmem:[%s11534_s15 + $0x168] sm:$0xff] %vm3923_vm2, %v5322_v20  ;;  %v5324_v24 = vmax.f32 %v5268_v13, 0.0  ;;  %6818 = vmatprep.subr.bf16.mxu0 %v11336_v58  ;;  %v9702_v58 = vld [vmem:[%s12462_s5 + $0x3d0] sm:$0xff]   ;;  %v9715_v56 = vld [vmem:[%s12462_s5 + $0x148] sm:$0xff]  }
 0x5c0   : > { %5379 = vst [vmem:[%s11534_s15 + $0x170] sm:$0xff] %v5323_v63  ;;  %v11810_v6 = vpack.c.bf16 %v5323_v63, %v5321_v49  ;;  %v9711_v49 = vld [vmem:[%s12462_s5 + $0x138] sm:$0xff]   ;;  %v9717_v13 = vld [vmem:[%s12462_s5 + $0x150] sm:$0xff]  }
 0x5c1   : > { %5380 = vst.msk [vmem:[%s11534_s15 + $0x178] sm:$0xff] %vm3923_vm2, %v5324_v24  ;;  %v11814_v31 = vpack.c.bf16 %v5324_v24, %v5322_v20  ;;  %5857 = vmatpush1.bf16.msra.mxu1 %v9699_v14  ;;  %v5134_v30 = vpop.f32.mrb[160].mxu0  ;;  %v9716_v20 = vld [vmem:[%s12462_s5 + $0x478] sm:$0xff]   ;;  %v9718_v14 = vld [vmem:[%s12462_s5 + $0x480] sm:$0xff]   ;;  %v9723_v24 = vld [vmem:[%s12462_s5 + $0x168] sm:$0xff]  }
 0x5c2   : > { %6819 = vmatpush1.bf16.msra.mxu0 %v9700_v22  ;;  %v5269_v44 = vadd.f32 %v11523_v23, %v5134_v30  ;;  %v5136_v46 = vpop.f32.mrb[161].mxu0  ;;  %5858 = vmatprep.subr.bf16.mxu1 %v11820_v62  ;;  %v9719_v63 = vld [vmem:[%s12462_s5 + $0x158] sm:$0xff]   ;;  %v9720_v22 = vld [vmem:[%s12462_s5 + $0x488] sm:$0xff]  }
 0x5c3   : > { %v5270_v61 = vadd.f32 %v11528_v7, %v5136_v46  ;;  %v5138_v27 = vpop.f32.mrb[162].mxu0  ;;  %6820 = vmatprep.subr.bf16.mxu0 %v11820_v62  ;;  %v9724_v30 = vld [vmem:[%s12462_s5 + $0x498] sm:$0xff]  }
 0x5c4   : > { %v5325_v53 = vmax.f32 %v5269_v44, 0.0  ;;  %v5271_v39 = vadd.f32 %v11523_v23, %v5138_v27  ;;  %v5140_v50 = vpop.f32.mrb[163].mxu0  ;;  %v9726_v44 = vld [vmem:[%s12462_s5 + $0x4a0] sm:$0xff]   ;;  %v9727_v46 = vld [vmem:[%s12462_s5 + $0x178] sm:$0xff]   ;;  %v9730_v27 = vld [vmem:[%s12462_s5 + $0x4b0] sm:$0xff]  }
 0x5c5   : > { %v5326_v0 = vmax.f32 %v5270_v61, 0.0  ;;  %v5272_v5 = vadd.f32 %v11528_v7, %v5140_v50  ;;  %5859 = vmatpush1.bf16.msra.mxu1 %v9701_v60  ;;  %v9725_v60 = vld [vmem:[%s12462_s5 + $0x170] sm:$0xff]   ;;  %v9729_v61 = vld [vmem:[%s12462_s5 + $0x180] sm:$0xff]  }
 0x5c6   : > { %5381 = vst [vmem:[%s11534_s15 + $0x180] sm:$0xff] %v5325_v53  ;;  %v5327_v38 = vmax.f32 %v5271_v39, 0.0  ;;  %6821 = vmatpush1.bf16.msra.mxu0 %v9702_v58  ;;  %5860 = vmatprep.subr.bf16.mxu1 %v11820_v62  ;;  %v9728_v58 = vld [vmem:[%s12462_s5 + $0x4a8] sm:$0xff]   ;;  %v9732_v39 = vld [vmem:[%s12462_s5 + $0x4b8] sm:$0xff]   ;;  %v9733_v50 = vld [vmem:[%s12462_s5 + $0x190] sm:$0xff]  }
 0x5c7   : > { %5382 = vst.msk [vmem:[%s11534_s15 + $0x188] sm:$0xff] %vm3923_vm2, %v5326_v0  ;;  %v5328_v12 = vmax.f32 %v5272_v5, 0.0  ;;  %6822 = vmatprep.subr.bf16.mxu0 %v11820_v62  ;;  %v9735_v5 = vld [vmem:[%s12462_s5 + $0x198] sm:$0xff]  }
 0x5c8   : > { %5383 = vst [vmem:[%s11534_s15 + $0x190] sm:$0xff] %v5327_v38  ;;  %v11842_v29 = vpack.c.bf16 %v5327_v38, %v5325_v53  ;;  %v9731_v53 = vld [vmem:[%s12462_s5 + $0x188] sm:$0xff]   ;;  %v9737_v38 = vld [vmem:[%s12462_s5 + $0x1a0] sm:$0xff]  }
 0x5c9   : > { %5384 = vst.msk [vmem:[%s11534_s15 + $0x198] sm:$0xff] %vm3923_vm2, %v5328_v12  ;;  %v11846_v28 = vpack.c.bf16 %v5328_v12, %v5326_v0  ;;  %5861 = vmatpush1.bf16.msra.mxu1 %v9703_v19  ;;  %v5144_v15 = vpop.f32.mrb[164].mxu0  ;;  %v9734_v0 = vld [vmem:[%s12462_s5 + $0x4c0] sm:$0xff]   ;;  %v9736_v19 = vld [vmem:[%s12462_s5 + $0x4c8] sm:$0xff]  }
 0x5ca   : > { %6823 = vmatpush1.bf16.msra.mxu0 %v9704_v17  ;;  %v5273_v47 = vadd.f32 %v11523_v23, %v5144_v15  ;;  %v5146_v34 = vpop.f32.mrb[165].mxu0  ;;  %5862 = vmatprep.subr.bf16.mxu1 %v11820_v62  ;;  %v9738_v17 = vld [vmem:[%s12462_s5 + $0x540] sm:$0xff]   ;;  %v9739_v12 = vld [vmem:[%s12462_s5 + $0x1a8] sm:$0xff]  }
 0x5cb   : > { %v5274_v43 = vadd.f32 %v11528_v7, %v5146_v34  ;;  %v5148_v35 = vpop.f32.mrb[166].mxu0  ;;  %6824 = vmatprep.subr.bf16.mxu0 %v11820_v62  ;;  %v9740_v15 = vld [vmem:[%s12462_s5 + $0x548] sm:$0xff]   ;;  %v9745_v34 = vld [vmem:[%s12462_s5 + $0x1c0] sm:$0xff]  }
 0x5cc   : > { %v5329_v45 = vmax.f32 %v5273_v47, 0.0  ;;  %v5275_v37 = vadd.f32 %v11523_v23, %v5148_v35  ;;  %v5150_v4 = vpop.f32.mrb[167].mxu0  ;;  %v9744_v47 = vld [vmem:[%s12462_s5 + $0x558] sm:$0xff]   ;;  %v9748_v35 = vld [vmem:[%s12462_s5 + $0x568] sm:$0xff]  }
 0x5cd   : > { %v5330_v36 = vmax.f32 %v5274_v43, 0.0  ;;  %v5276_v16 = vadd.f32 %v11528_v7, %v5150_v4  ;;  %5863 = vmatpush1.bf16.msra.mxu1 %v9705_v42  ;;  %v9743_v42 = vld [vmem:[%s12462_s5 + $0x1b8] sm:$0xff]   ;;  %v9747_v43 = vld [vmem:[%s12462_s5 + $0x1c8] sm:$0xff]   ;;  %v9753_v4 = vld [vmem:[%s12462_s5 + $0x1e0] sm:$0xff]  }
 0x5ce   : > { %5385 = vst [vmem:[%s11534_s15 + $0x1a0] sm:$0xff] %v5329_v45  ;;  %v5331_v52 = vmax.f32 %v5275_v37, 0.0  ;;  %6825 = vmatpush1.bf16.msra.mxu0 %v9706_v48  ;;  %5864 = vmatprep.subr.bf16.mxu1 %v11820_v62  ;;  %v9746_v48 = vld [vmem:[%s12462_s5 + $0x560] sm:$0xff]   ;;  %v9752_v37 = vld [vmem:[%s12462_s5 + $0x578] sm:$0xff]  }
 0x5cf   : > { %5386 = vst.msk [vmem:[%s11534_s15 + $0x1a8] sm:$0xff] %vm3923_vm2, %v5330_v36  ;;  %v5332_v23 = vmax.f32 %v5276_v16, 0.0  ;;  %6826 = vmatprep.subr.bf16.mxu0 %v11820_v62  ;;  %v9755_v16 = vld [vmem:[%s12462_s5 + $0x1e8] sm:$0xff]  }
 0x5d0   : > { %5387 = vst [vmem:[%s11534_s15 + $0x1b0] sm:$0xff] %v5331_v52  ;;  %v11872_v7 = vpack.c.bf16 %v5331_v52, %v5329_v45  ;;  %v9751_v45 = vld [vmem:[%s12462_s5 + $0x1d8] sm:$0xff]   ;;  %v9757_v52 = vld [vmem:[%s12462_s5 + $0x1f0] sm:$0xff]  }
 0x5d1   : > { %5388 = vst.msk [vmem:[%s11534_s15 + $0x1b8] sm:$0xff] %vm3923_vm2, %v5332_v23  ;;  %v11876_v18 = vpack.c.bf16 %v5332_v23, %v5330_v36  ;;  %5865 = vmatpush1.bf16.msra.mxu1 %v9707_v57  ;;  %v9754_v36 = vld [vmem:[%s12462_s5 + $0x580] sm:$0xff]   ;;  %v9756_v57 = vld [vmem:[%s12462_s5 + $0x588] sm:$0xff]   ;;  %v9759_v23 = vld [vmem:[%s12462_s5 + $0x1f8] sm:$0xff]   ;;  %s385_s15 = scalar_lea.vmem %s12465_s8, %s7807_s11 }
 0x5d2   : > { %6827 = vmatpush1.bf16.msra.mxu0 %v9708_v9  ;;  %5866 = vmatprep.subr.bf16.mxu1 %v11820_v62  ;;  %v9758_v9 = vld [vmem:[%s12462_s5 + $0x590] sm:$0xff]  }
 0x5d3   : > { %7118 = vmatprep.subr.bf16.mxu0 %v11820_v62 }
 0x5d5   : > { %6833 = vmatmul.mubr.bf16.vlgmr.msra.gmra.mrb[172].mxu0 %v11718_v11  ;;  %5867 = vmatpush1.bf16.msra.mxu1 %v9709_v25  ;;  %v9713_v11 = vld [vmem:[%s12462_s5 + $0x140] sm:$0xff]   ;;  %v9760_v25 = vld [vmem:[%s12462_s5 + $0x598] sm:$0xff]  }
 0x5d6   : > { %7119 = vmatpush1.bf16.msra.mxu0 %v9710_v54  ;;  %8681 = vmatprep.mubr.msk.bf16.mxu0 %vm3923_vm2, %v11784_v41  ;;  %v9714_v41 = vld [vmem:[%s12462_s5 + $0x470] sm:$0xff]   ;;  %v9761_v54 = vld [vmem:[%s12462_s5 + $0x200] sm:$0xff]  }
 0x5d7   : > { %5868 = vmatprep.subr.bf16.mxu1 %v11820_v62  ;;  %7120 = vmatprep.subr.bf16.mxu0 %v11820_v62 }
 0x5d9   : > { %5869 = vmatpush1.bf16.msra.mxu1 %v9711_v49  ;;  %v9762_v49 = vld [vmem:[%s12462_s5 + $0x5a0] sm:$0xff]  }
 0x5da   : > { %7121 = vmatpush1.bf16.msra.mxu0 %v9712_v59  ;;  %5870 = vmatprep.subr.bf16.mxu1 %v11820_v62  ;;  %v9763_v59 = vld [vmem:[%s12462_s5 + $0x208] sm:$0xff]  }
 0x5db   : > { %7122 = vmatprep.subr.bf16.mxu0 %v11820_v62 }
 0x5dd   : > { %5871 = vmatpush1.bf16.msra.mxu1 %v9713_v11  ;;  %v9764_v11 = vld [vmem:[%s12462_s5 + $0x5a8] sm:$0xff]  }
 0x5de   : > { %7123 = vmatpush1.bf16.msra.mxu0 %v9714_v41  ;;  %5872 = vmatprep.subr.bf16.mxu1 %v11820_v62  ;;  %v9765_v41 = vld [vmem:[%s12462_s5 + $0x210] sm:$0xff]  }
 0x5df   : > { %7124 = vmatprep.subr.bf16.mxu0 %v11820_v62 }
 0x5e1   : > { %5873 = vmatpush1.bf16.msra.mxu1 %v9715_v56  ;;  %v9766_v56 = vld [vmem:[%s12462_s5 + $0x218] sm:$0xff]  }
 0x5e2   : > { %7125 = vmatpush1.bf16.msra.mxu0 %v9716_v20  ;;  %6005 = vmatprep.subr.bf16.mxu1 %v11820_v62 }
 0x5e3   : > { %7126 = vmatprep.subr.bf16.mxu0 %v11820_v62 }
 0x5e4   : > { %5879 = vmatmul.mubr.bf16.vlgmr.msra.gmra.mrb[120].mxu1 %v11574_v21  ;;  %v9721_v21 = vld [vmem:[%s12462_s5 + $0x160] sm:$0xff]  }
 0x5e5   : > { %6006 = vmatpush1.bf16.msra.mxu1 %v9717_v13  ;;  %8380 = vmatprep.mubr.msk.bf16.mxu1 %vm3923_vm2, %v11600_v8  ;;  %v9722_v8 = vld [vmem:[%s12462_s5 + $0x490] sm:$0xff]  }
 0x5e6   : > { %7127 = vmatpush1.bf16.msra.mxu0 %v9718_v14  ;;  %6007 = vmatprep.subr.bf16.mxu1 %v11820_v62 }
 0x5e7   : > { %7128 = vmatprep.subr.bf16.mxu0 %v11820_v62 }
 0x5e9   : > { %6008 = vmatpush1.bf16.msra.mxu1 %v9719_v63  ;;  %v9767_v63 = vld [vmem:[%s12462_s5 + $0x220] sm:$0xff]  }
 0x5ea   : > { %7129 = vmatpush1.bf16.msra.mxu0 %v9720_v22  ;;  %6009 = vmatprep.subr.bf16.mxu1 %v11820_v62 }
 0x5eb   : > { %7130 = vmatprep.subr.bf16.mxu0 %v11820_v62 }
 0x5ed   : > { %6010 = vmatpush1.bf16.msra.mxu1 %v9721_v21  ;;  %v9769_v21 = vld [vmem:[%s12462_s5 + $0x230] sm:$0xff]  }
 0x5ee   : > { %7131 = vmatpush1.bf16.msra.mxu0 %v9722_v8  ;;  %6011 = vmatprep.subr.bf16.mxu1 %v11820_v62  ;;  %v9770_v8 = vld [vmem:[%s12462_s5 + $0x238] sm:$0xff]  }
 0x5ef   : > { %7132 = vmatprep.subr.bf16.mxu0 %v11820_v62 }
 0x5f1   : > { %6012 = vmatpush1.bf16.msra.mxu1 %v9723_v24  ;;  %v9771_v24 = vld [vmem:[%s12462_s5 + $0x240] sm:$0xff]  }
 0x5f2   : > { %7133 = vmatpush1.bf16.msra.mxu0 %v9724_v30  ;;  %6013 = vmatprep.subr.bf16.mxu1 %v11820_v62  ;;  %v9774_v30 = vld [vmem:[%s12462_s5 + $0x258] sm:$0xff]  }
 0x5f3   : > { %7134 = vmatprep.subr.bf16.mxu0 %v11820_v62 }
 0x5f5   : > { %6014 = vmatpush1.bf16.msra.mxu1 %v9725_v60  ;;  %v9775_v60 = vld [vmem:[%s12462_s5 + $0x260] sm:$0xff]  }
 0x5f6   : > { %7135 = vmatpush1.bf16.msra.mxu0 %v9726_v44  ;;  %6015 = vmatprep.subr.bf16.mxu1 %v11820_v62  ;;  %v9776_v44 = vld [vmem:[%s12462_s5 + $0x268] sm:$0xff]  }
 0x5f7   : > { %7136 = vmatprep.subr.bf16.mxu0 %v11820_v62 }
 0x5f9   : > { %6016 = vmatpush1.bf16.msra.mxu1 %v9727_v46 }
 0x5fa   : > { %7137 = vmatpush1.bf16.msra.mxu0 %v9728_v58  ;;  %6017 = vmatprep.subr.bf16.mxu1 %v11820_v62 }
 0x5fb   : > { %7138 = vmatprep.subr.bf16.mxu0 %v11820_v62 }
 0x5fd   : > { %6018 = vmatpush1.bf16.msra.mxu1 %v9729_v61 }
 0x5fe   : > { %7139 = vmatpush1.bf16.msra.mxu0 %v9730_v27  ;;  %6019 = vmatprep.subr.bf16.mxu1 %v11820_v62  ;;  %v9777_v27 = vld [vmem:[%s12462_s5 + $0x270] sm:$0xff]  }
 0x5ff   : > { %7140 = vmatprep.subr.bf16.mxu0 %v11820_v62 }
 0x601   : > { %6020 = vmatpush1.bf16.msra.mxu1 %v9731_v53 }
 0x602   : > { %7141 = vmatpush1.bf16.msra.mxu0 %v9732_v39  ;;  %6021 = vmatprep.subr.bf16.mxu1 %v11820_v62  ;;  %v9778_v39 = vld [vmem:[%s12462_s5 + $0x278] sm:$0xff]  }
 0x603   : > { %7142 = vmatprep.subr.bf16.mxu0 %v11820_v62 }
 0x605   : > { %6022 = vmatpush1.bf16.msra.mxu1 %v9733_v50  ;;  %v9779_v50 = vld [vmem:[%s12462_s5 + $0x280] sm:$0xff]  }
 0x606   : > { %7143 = vmatpush1.bf16.msra.mxu0 %v9734_v0  ;;  %6023 = vmatprep.subr.bf16.mxu1 %v11820_v62  ;;  %v9780_v0 = vld [vmem:[%s12462_s5 + $0x288] sm:$0xff]  }
 0x607   : > { %7144 = vmatprep.subr.bf16.mxu0 %v11820_v62 }
 0x609   : > { %6024 = vmatpush1.bf16.msra.mxu1 %v9735_v5 }
 0x60a   : > { %7145 = vmatpush1.bf16.msra.mxu0 %v9736_v19  ;;  %6025 = vmatprep.subr.bf16.mxu1 %v11820_v62 }
 0x60b   : > { %7436 = vmatprep.subr.bf16.mxu0 %v11820_v62 }
 0x60d   : > { %7151 = vmatmul.mubr.bf16.vlgmr.msra.gmra.mrb[176].mxu0 %v11780_v51  ;;  %6026 = vmatpush1.bf16.msra.mxu1 %v9737_v38  ;;  %v9741_v51 = vld [vmem:[%s12462_s5 + $0x1b0] sm:$0xff]  }
 0x60e   : > { %7437 = vmatpush1.bf16.msra.mxu0 %v9738_v17  ;;  %8767 = vmatprep.mubr.msk.bf16.mxu0 %vm3923_vm2, %v11846_v28  ;;  %v9742_v28 = vld [vmem:[%s12462_s5 + $0x550] sm:$0xff]  }
 0x60f   : > { %6027 = vmatprep.subr.bf16.mxu1 %v11820_v62  ;;  %7438 = vmatprep.subr.bf16.mxu0 %v11820_v62 }
 0x611   : > { %6028 = vmatpush1.bf16.msra.mxu1 %v9739_v12  ;;  %v9781_v12 = vld [vmem:[%s12462_s5 + $0x290] sm:$0xff]  }
 0x612   : > { %7439 = vmatpush1.bf16.msra.mxu0 %v9740_v15  ;;  %6029 = vmatprep.subr.bf16.mxu1 %v11820_v62 }
 0x613   : > { %7440 = vmatprep.subr.bf16.mxu0 %v11820_v62 }
 0x615   : > { %6030 = vmatpush1.bf16.msra.mxu1 %v9741_v51 }
 0x616   : > { %7441 = vmatpush1.bf16.msra.mxu0 %v9742_v28  ;;  %6031 = vmatprep.subr.bf16.mxu1 %v11820_v62  ;;  %v9782_v28 = vld [vmem:[%s12462_s5 + $0x298] sm:$0xff]  }
 0x617   : > { %7442 = vmatprep.subr.bf16.mxu0 %v11820_v62 }
 0x619   : > { %6032 = vmatpush1.bf16.msra.mxu1 %v9743_v42  ;;  %v9783_v42 = vld [vmem:[%s12462_s5 + $0x310] sm:$0xff]  }
 0x61a   : > { %7443 = vmatpush1.bf16.msra.mxu0 %v9744_v47  ;;  %6164 = vmatprep.subr.bf16.mxu1 %v11820_v62  ;;  %v9784_v47 = vld [vmem:[%s12462_s5 + $0x318] sm:$0xff]  }
 0x61b   : > { %7444 = vmatprep.subr.bf16.mxu0 %v11820_v62 }
 0x61c   : > { %6038 = vmatmul.mubr.bf16.vlgmr.msra.gmra.mrb[124].mxu1 %v11596_v32  ;;  %v9749_v32 = vld [vmem:[%s12462_s5 + $0x1d0] sm:$0xff]  }
 0x61d   : > { %6165 = vmatpush1.bf16.msra.mxu1 %v9745_v34  ;;  %8423 = vmatprep.mubr.msk.bf16.mxu1 %vm3923_vm2, %v11622_v1  ;;  %v9750_v1 = vld [vmem:[%s12462_s5 + $0x570] sm:$0xff]   ;;  %v9785_v34 = vld [vmem:[%s12462_s5 + $0x320] sm:$0xff]  }
 0x61e   : > { %7445 = vmatpush1.bf16.msra.mxu0 %v9746_v48  ;;  %6166 = vmatprep.subr.bf16.mxu1 %v11820_v62  ;;  %v9788_v48 = vld [vmem:[%s12462_s5 + $0x338] sm:$0xff]  }
 0x61f   : > { %7446 = vmatprep.subr.bf16.mxu0 %v11820_v62 }
 0x621   : > { %6167 = vmatpush1.bf16.msra.mxu1 %v9747_v43  ;;  %v9789_v43 = vld [vmem:[%s12462_s5 + $0x340] sm:$0xff]  }
 0x622   : > { %7447 = vmatpush1.bf16.msra.mxu0 %v9748_v35  ;;  %6168 = vmatprep.subr.bf16.mxu1 %v11820_v62  ;;  %v9790_v35 = vld [vmem:[%s12462_s5 + $0x348] sm:$0xff]  }
 0x623   : > { %7448 = vmatprep.subr.bf16.mxu0 %v11820_v62 }
 0x625   : > { %6169 = vmatpush1.bf16.msra.mxu1 %v9749_v32 }
 0x626   : > { %7449 = vmatpush1.bf16.msra.mxu0 %v9750_v1  ;;  %6170 = vmatprep.subr.bf16.mxu1 %v11820_v62 }
 0x627   : > { %7450 = vmatprep.subr.bf16.mxu0 %v11820_v62 }
 0x629   : > { %6171 = vmatpush1.bf16.msra.mxu1 %v9751_v45  ;;  %v9791_v45 = vld [vmem:[%s12462_s5 + $0x350] sm:$0xff]  }
 0x62a   : > { %7451 = vmatpush1.bf16.msra.mxu0 %v9752_v37  ;;  %6172 = vmatprep.subr.bf16.mxu1 %v11820_v62 }
 0x62b   : > { %7452 = vmatprep.subr.bf16.mxu0 %v11820_v62 }
 0x62d   : > { %6173 = vmatpush1.bf16.msra.mxu1 %v9753_v4 }
 0x62e   : > { %7453 = vmatpush1.bf16.msra.mxu0 %v9754_v36  ;;  %6174 = vmatprep.subr.bf16.mxu1 %v11820_v62  ;;  %v9792_v36 = vld [vmem:[%s12462_s5 + $0x358] sm:$0xff]  }
 0x62f   : > { %7454 = vmatprep.subr.bf16.mxu0 %v11820_v62 }
 0x631   : > { %6175 = vmatpush1.bf16.msra.mxu1 %v9755_v16  ;;  %v9793_v16 = vld [vmem:[%s12462_s5 + $0x360] sm:$0xff]  }
 0x632   : > { %7455 = vmatpush1.bf16.msra.mxu0 %v9756_v57  ;;  %6176 = vmatprep.subr.bf16.mxu1 %v11820_v62  ;;  %v9794_v57 = vld [vmem:[%s12462_s5 + $0x368] sm:$0xff]  }
 0x633   : > { %7456 = vmatprep.subr.bf16.mxu0 %v11820_v62 }
 0x635   : > { %6177 = vmatpush1.bf16.msra.mxu1 %v9757_v52 }
 0x636   : > { %7457 = vmatpush1.bf16.msra.mxu0 %v9758_v9  ;;  %6178 = vmatprep.subr.bf16.mxu1 %v11820_v62 }
 0x637   : > { %7458 = vmatprep.subr.bf16.mxu0 %v11820_v62 }
 0x639   : > { %6179 = vmatpush1.bf16.msra.mxu1 %v9759_v23 }
 0x63a   : > { %7459 = vmatpush1.bf16.msra.mxu0 %v9760_v25  ;;  %6180 = vmatprep.subr.bf16.mxu1 %v11820_v62 }
 0x63b   : > { %7460 = vmatprep.subr.bf16.mxu0 %v11820_v62 }
 0x63d   : > { %6181 = vmatpush1.bf16.msra.mxu1 %v9761_v54  ;;  %v9795_v54 = vld [vmem:[%s12462_s5 + $0x370] sm:$0xff]  }
 0x63e   : > { %7461 = vmatpush1.bf16.msra.mxu0 %v9762_v49  ;;  %6182 = vmatprep.subr.bf16.mxu1 %v11820_v62 }
 0x63f   : > { %7462 = vmatprep.subr.bf16.mxu0 %v11820_v62 }
 0x641   : > { %6183 = vmatpush1.bf16.msra.mxu1 %v9763_v59 }
 0x642   : > { %7463 = vmatpush1.bf16.msra.mxu0 %v9764_v11  ;;  %6184 = vmatprep.subr.bf16.mxu1 %v11820_v62  ;;  %v9796_v11 = vld [vmem:[%s12462_s5 + $0x378] sm:$0xff]  }
 0x645   : > { %7469 = vmatmul.mubr.bf16.vlgmr.msra.gmra.mrb[180].mxu0 %v11842_v29  ;;  %6185 = vmatpush1.bf16.msra.mxu1 %v9765_v41  ;;  %v9768_v29 = vld [vmem:[%s12462_s5 + $0x228] sm:$0xff]   ;;  %v9797_v41 = vld [vmem:[%s12462_s5 + $0x3f0] sm:$0xff]  }
 0x646   : > { %6186 = vmatprep.subr.bf16.mxu1 %v11820_v62 }
 0x647   : > { %v5595_v20 = vpop.f32.mrb[112].mxu1 }
 0x648   : > { %v5597_v13 = vpop.f32.mrb[113].mxu1 }
 0x649   : > { %6187 = vmatpush1.bf16.msra.mxu1 %v9766_v56  ;;  %v5598_v14 = vpop.f32.mrb[114].mxu1  ;;  %v9798_v56 = vld [vmem:[%s12462_s5 + $0x3f8] sm:$0xff]  }
 0x64a   : > { %v5600_v22 = vpop.f32.mrb[115].mxu1  ;;  %6188 = vmatprep.subr.bf16.mxu1 %v11820_v62  ;;  %v9802_v13 = vld [vmem:[%s12462_s5 + $0x418] sm:$0xff]  }
 0x64d   : > { %6189 = vmatpush1.bf16.msra.mxu1 %v9767_v63  ;;  %v9804_v63 = vld [vmem:[%s12462_s5 + $0x428] sm:$0xff]  }
 0x64e   : > { %6190 = vmatprep.subr.bf16.mxu1 %v11820_v62 }
 0x651   : > { %6191 = vmatpush1.bf16.msra.mxu1 %v9768_v29 }
 0x652   : > { %6323 = vmatprep.subr.bf16.mxu1 %v11820_v62 }
 0x654   : > { %6197 = vmatmul.mubr.bf16.vlgmr.msra.gmra.mrb[128].mxu1 %v11618_v3  ;;  %v9772_v3 = vld [vmem:[%s12462_s5 + $0x248] sm:$0xff]  }
 0x655   : > { %6324 = vmatpush1.bf16.msra.mxu1 %v9769_v21  ;;  %8466 = vmatprep.mubr.msk.bf16.mxu1 %vm3923_vm2, %v11644_v26  ;;  %v9773_v26 = vld [vmem:[%s12462_s5 + $0x250] sm:$0xff]  }
 0x656   : > { %6325 = vmatprep.subr.bf16.mxu1 %v11820_v62  ;;  %v9805_v21 = vld [vmem:[%s12462_s5 + $0x430] sm:$0xff]  }
 0x659   : > { %6326 = vmatpush1.bf16.msra.mxu1 %v9770_v8 }
 0x65a   : > { %6327 = vmatprep.subr.bf16.mxu1 %v11820_v62 }
 0x65d   : > { %6328 = vmatpush1.bf16.msra.mxu1 %v9771_v24 }
 0x65e   : > { %6329 = vmatprep.subr.bf16.mxu1 %v11820_v62 }
 0x661   : > { %6330 = vmatpush1.bf16.msra.mxu1 %v9772_v3  ;;  %v9806_v3 = vld [vmem:[%s12462_s5 + $0x438] sm:$0xff]  }
 0x662   : > { %6331 = vmatprep.subr.bf16.mxu1 %v11820_v62 }
 0x665   : > { %6332 = vmatpush1.bf16.msra.mxu1 %v9773_v26  ;;  %v9807_v26 = vld [vmem:[%s12462_s5 + $0x440] sm:$0xff]  }
 0x666   : > { %6333 = vmatprep.subr.bf16.mxu1 %v11820_v62 }
 0x669   : > { %6334 = vmatpush1.bf16.msra.mxu1 %v9774_v30  ;;  %v9808_v30 = vld [vmem:[%s12462_s5 + $0x448] sm:$0xff]  }
 0x66a   : > { %6335 = vmatprep.subr.bf16.mxu1 %v11820_v62 }
 0x66d   : > { %6336 = vmatpush1.bf16.msra.mxu1 %v9775_v60 }
 0x66e   : > { %6337 = vmatprep.subr.bf16.mxu1 %v11820_v62 }
 0x66f   : > { %v12166_v46 = vpop.f32.mrb[168].mxu0 }
 0x670   : > { %v6518_v58 = vpop.f32.mrb[169].mxu0 }
 0x671   : > { %6338 = vmatpush1.bf16.msra.mxu1 %v9776_v44  ;;  %v12168_v61 = vpop.f32.mrb[170].mxu0 }
 0x672   : > { %v6521_v53 = vpop.f32.mrb[171].mxu0  ;;  %6339 = vmatprep.subr.bf16.mxu1 %v11820_v62 }
 0x673   : > { %v9809_v53 = vld [vmem:[%s12462_s5 + $0x450] sm:$0xff]  }
 0x675   : > { %6340 = vmatpush1.bf16.msra.mxu1 %v9777_v27 }
 0x676   : > { %6341 = vmatprep.subr.bf16.mxu1 %v11820_v62 }
 0x679   : > { %6342 = vmatpush1.bf16.msra.mxu1 %v9778_v39 }
 0x67a   : > { %6343 = vmatprep.subr.bf16.mxu1 %v11820_v62 }
 0x67d   : > { %6344 = vmatpush1.bf16.msra.mxu1 %v9779_v50 }
 0x67e   : > { %6345 = vmatprep.subr.bf16.mxu1 %v11820_v62 }
 0x67f   : > { %v5723_v5 = vpop.f32.mrb[116].mxu1 }
 0x680   : > { %v5724_v19 = vadd.f32 %v5723_v5, %v5595_v20  ;;  %v5725_v38 = vpop.f32.mrb[117].mxu1  ;;  %v9799_v20 = vld [vmem:[%s12462_s5 + $0x400] sm:$0xff]   ;;  %v9811_v5 = vld [vmem:[%s12462_s5 + $0x4d0] sm:$0xff]  }
 0x681   : > { %v5726_v17 = vpop.f32.mrb[118].mxu1  ;;  %6346 = vmatpush1.bf16.msra.mxu1 %v9780_v0  ;;  %v9810_v0 = vld [vmem:[%s12462_s5 + $0x458] sm:$0xff]   ;;  %v9813_v38 = vld [vmem:[%s12462_s5 + $0x4e0] sm:$0xff]  }
 0x682   : > { %v5727_v15 = vadd.f32 %v5726_v17, %v5598_v14  ;;  %v5728_v51 = vpop.f32.mrb[119].mxu1  ;;  %6347 = vmatprep.subr.bf16.mxu1 %v11820_v62  ;;  %v9803_v14 = vld [vmem:[%s12462_s5 + $0x420] sm:$0xff]   ;;  %v9816_v17 = vld [vmem:[%s12462_s5 + $0x4f8] sm:$0xff]  }
 0x685   : > { %6348 = vmatpush1.bf16.msra.mxu1 %v9781_v12  ;;  %v9817_v12 = vld [vmem:[%s12462_s5 + $0x500] sm:$0xff]  }
 0x686   : > { %6349 = vmatprep.subr.bf16.mxu1 %v11820_v62 }
 0x689   : > { %6350 = vmatpush1.bf16.msra.mxu1 %v9782_v28 }
 0x68a   : > { %6641 = vmatprep.subr.bf16.mxu1 %v11820_v62 }
 0x68c   : > { %6356 = vmatmul.mubr.bf16.vlgmr.msra.gmra.mrb[132].mxu1 %v11640_v40  ;;  %v9786_v40 = vld [vmem:[%s12462_s5 + $0x328] sm:$0xff]  }
 0x68d   : > { %6642 = vmatpush1.bf16.msra.mxu1 %v9783_v42  ;;  %8552 = vmatprep.mubr.msk.bf16.mxu1 %vm3923_vm2, %v11692_v2  ;;  %v9787_v2 = vld [vmem:[%s12462_s5 + $0x330] sm:$0xff]  }
 0x68e   : > { %6643 = vmatprep.subr.bf16.mxu1 %v11820_v62  ;;  %v9819_v42 = vld [vmem:[%s12462_s5 + $0x510] sm:$0xff]  }
 0x691   : > { %6644 = vmatpush1.bf16.msra.mxu1 %v9784_v47 }
 0x692   : > { %6645 = vmatprep.subr.bf16.mxu1 %v11820_v62 }
 0x695   : > { %6646 = vmatpush1.bf16.msra.mxu1 %v9785_v34 }
 0x696   : > { %6647 = vmatprep.subr.bf16.mxu1 %v11820_v62 }
 0x699   : > { %6648 = vmatpush1.bf16.msra.mxu1 %v9786_v40  ;;  %v9820_v40 = vld [vmem:[%s12462_s5 + $0x518] sm:$0xff]  }
 0x69a   : > { %6649 = vmatprep.subr.bf16.mxu1 %v11820_v62 }
 0x69d   : > { %6650 = vmatpush1.bf16.msra.mxu1 %v9787_v2  ;;  %v9821_v2 = vld [vmem:[%s12462_s5 + $0x520] sm:$0xff]  }
 0x69e   : > { %6651 = vmatprep.subr.bf16.mxu1 %v11820_v62 }
 0x6a1   : > { %6652 = vmatpush1.bf16.msra.mxu1 %v9788_v48  ;;  %v9822_v48 = vld [vmem:[%s12462_s5 + $0x528] sm:$0xff]  }
 0x6a2   : > { %6653 = vmatprep.subr.bf16.mxu1 %v11820_v62 }
 0x6a5   : > { %6654 = vmatpush1.bf16.msra.mxu1 %v9789_v43 }
 0x6a6   : > { %6655 = vmatprep.subr.bf16.mxu1 %v11820_v62 }
 0x6a8   : > { %v12229_v32 = vpop.f32.mrb[172].mxu0 }
 0x6a9   : > { %v6836_v1 = vpop.f32.mrb[173].mxu0  ;;  %6656 = vmatpush1.bf16.msra.mxu1 %v9790_v35 }
 0x6aa   : > { %v12234_v37 = vpop.f32.mrb[174].mxu0  ;;  %6657 = vmatprep.subr.bf16.mxu1 %v11820_v62 }
 0x6ab   : > { %v6839_v4 = vpop.f32.mrb[175].mxu0 }
 0x6ac   : > { %v9823_v4 = vld [vmem:[%s12462_s5 + $0x530] sm:$0xff]  }
 0x6ad   : > { %6658 = vmatpush1.bf16.msra.mxu1 %v9791_v45 }
 0x6ae   : > { %6659 = vmatprep.subr.bf16.mxu1 %v11820_v62 }
 0x6b1   : > { %6660 = vmatpush1.bf16.msra.mxu1 %v9792_v36 }
 0x6b2   : > { %6661 = vmatprep.subr.bf16.mxu1 %v11820_v62 }
 0x6b5   : > { %6662 = vmatpush1.bf16.msra.mxu1 %v9793_v16 }
 0x6b6   : > { %6663 = vmatprep.subr.bf16.mxu1 %v11820_v62 }
 0x6b7   : > { %v5880_v52 = vpop.f32.mrb[120].mxu1 }
 0x6b8   : > { %v5887_v9 = vadd.f32 %v5880_v52, %v5724_v19  ;;  %v5882_v23 = vpop.f32.mrb[121].mxu1  ;;  %v9812_v19 = vld [vmem:[%s12462_s5 + $0x4d8] sm:$0xff]   ;;  %v9825_v52 = vld [vmem:[%s12462_s5 + $0x5b0] sm:$0xff]  }
 0x6b9   : > { %v5883_v25 = vpop.f32.mrb[122].mxu1  ;;  %6664 = vmatpush1.bf16.msra.mxu1 %v9794_v57  ;;  %v9824_v57 = vld [vmem:[%s12462_s5 + $0x538] sm:$0xff]   ;;  %v9827_v23 = vld [vmem:[%s12462_s5 + $0x5c0] sm:$0xff]  }
 0x6ba   : > { %v5888_v49 = vadd.f32 %v5883_v25, %v5727_v15  ;;  %v5885_v59 = vpop.f32.mrb[123].mxu1  ;;  %6665 = vmatprep.subr.bf16.mxu1 %v11820_v62  ;;  %v9818_v15 = vld [vmem:[%s12462_s5 + $0x508] sm:$0xff]   ;;  %v9830_v25 = vld [vmem:[%s12462_s5 + $0x5d8] sm:$0xff]  }
 0x6bb   : > { %v9833_v59 = vld [vmem:[%s12462_s5 + $0x5f0] sm:$0xff]  }
 0x6bd   : > { %6666 = vmatpush1.bf16.msra.mxu1 %v9795_v54  ;;  %v9831_v54 = vld [vmem:[%s12462_s5 + $0x5e0] sm:$0xff]  }
 0x6be   : > { %6667 = vmatprep.subr.bf16.mxu1 %v11820_v62 }
 0x6c1   : > { %6668 = vmatpush1.bf16.msra.mxu1 %v9796_v11  ;;  %v9834_v11 = vld [vmem:[%s12462_s5 + $0x5f8] sm:$0xff]  }
 0x6c2   : > { %6959 = vmatprep.subr.bf16.mxu1 %v11820_v62 }
 0x6c4   : > { %6674 = vmatmul.mubr.bf16.vlgmr.msra.gmra.mrb[136].mxu1 %v11688_v33  ;;  %v9800_v33 = vld [vmem:[%s12462_s5 + $0x408] sm:$0xff]  }
 0x6c5   : > { %6960 = vmatpush1.bf16.msra.mxu1 %v9797_v41  ;;  %8638 = vmatprep.mubr.msk.bf16.mxu1 %vm3923_vm2, %v11754_v10  ;;  %v9801_v10 = vld [vmem:[%s12462_s5 + $0x410] sm:$0xff]   ;;  %v9835_v41 = vld [vmem:[%s12462_s5 + $0x600] sm:$0xff]  }
 0x6c6   : > { %6961 = vmatprep.subr.bf16.mxu1 %v11820_v62 }
 0x6c9   : > { %6962 = vmatpush1.bf16.msra.mxu1 %v9798_v56  ;;  %v9836_v56 = vld [vmem:[%s12462_s5 + $0x608] sm:$0xff]  }
 0x6ca   : > { %6963 = vmatprep.subr.bf16.mxu1 %v11820_v62 }
 0x6cd   : > { %6964 = vmatpush1.bf16.msra.mxu1 %v9799_v20 }
 0x6ce   : > { %6965 = vmatprep.subr.bf16.mxu1 %v11820_v62 }
 0x6d1   : > { %6966 = vmatpush1.bf16.msra.mxu1 %v9800_v33 }
 0x6d2   : > { %6967 = vmatprep.subr.bf16.mxu1 %v11820_v62 }
 0x6d5   : > { %6968 = vmatpush1.bf16.msra.mxu1 %v9801_v10 }
 0x6d6   : > { %6969 = vmatprep.subr.bf16.mxu1 %v11820_v62 }
 0x6d9   : > { %6970 = vmatpush1.bf16.msra.mxu1 %v9802_v13 }
 0x6da   : > { %6971 = vmatprep.subr.bf16.mxu1 %v11820_v62 }
 0x6dd   : > { %6972 = vmatpush1.bf16.msra.mxu1 %v9803_v14  ;;  %v9837_v14 = vld [vmem:[%s12462_s5 + $0x610] sm:$0xff]  }
 0x6de   : > { %6973 = vmatprep.subr.bf16.mxu1 %v11820_v62 }
 0x6e0   : > { %v12292_v22 = vpop.f32.mrb[176].mxu0 }
 0x6e1   : > { %v7154_v29 = vpop.f32.mrb[177].mxu0  ;;  %6974 = vmatpush1.bf16.msra.mxu1 %v9804_v63 }
 0x6e2   : > { %v12297_v8 = vpop.f32.mrb[178].mxu0  ;;  %6975 = vmatprep.subr.bf16.mxu1 %v11820_v62 }
 0x6e3   : > { %v7157_v24 = vpop.f32.mrb[179].mxu0 }
 0x6e5   : > { %6976 = vmatpush1.bf16.msra.mxu1 %v9805_v21 }
 0x6e6   : > { %6977 = vmatprep.subr.bf16.mxu1 %v11820_v62 }
 0x6e9   : > { %6978 = vmatpush1.bf16.msra.mxu1 %v9806_v3  ;;  %v9838_v3 = vld [vmem:[%s12462_s5 + $0x618] sm:$0xff]  }
 0x6ea   : > { %6979 = vmatprep.subr.bf16.mxu1 %v11820_v62 }
 0x6ed   : > { %6980 = vmatpush1.bf16.msra.mxu1 %v9807_v26  ;;  %v9876_v26 = vld [vmem:[#allocation2] sm:$0xff] }
 0x6ee   : > { %6981 = vmatprep.subr.bf16.mxu1 %v11820_v62 }
 0x6ef   : > { %v6039_v60 = vpop.f32.mrb[124].mxu1 }
 0x6f0   : > { %v6046_v44 = vadd.f32 %v6039_v60, %v5887_v9  ;;  %v6041_v58 = vpop.f32.mrb[125].mxu1  ;;  %v9826_v9 = vld [vmem:[%s12462_s5 + $0x5b8] sm:$0xff]  }
 0x6f1   : > { %v6042_v27 = vpop.f32.mrb[126].mxu1  ;;  %6982 = vmatpush1.bf16.msra.mxu1 %v9808_v30 }
 0x6f2   : > { %v6047_v39 = vadd.f32 %v6042_v27, %v5888_v49  ;;  %v6044_v50 = vpop.f32.mrb[127].mxu1  ;;  %6983 = vmatprep.subr.bf16.mxu1 %v11820_v62  ;;  %v9832_v49 = vld [vmem:[%s12462_s5 + $0x5e8] sm:$0xff]  }
 0x6f5   : > { %6984 = vmatpush1.bf16.msra.mxu1 %v9809_v53 }
 0x6f6   : > { %6985 = vmatprep.subr.bf16.mxu1 %v11820_v62 }
 0x6f9   : > { %6986 = vmatpush1.bf16.msra.mxu1 %v9810_v0 }
 0x6fa   : > { %7277 = vmatprep.subr.bf16.mxu1 %v11820_v62 }
 0x6fc   : > { %6992 = vmatmul.mubr.bf16.vlgmr.msra.gmra.mrb[140].mxu1 %v11750_v55  ;;  %v9814_v55 = vld [vmem:[%s12462_s5 + $0x4e8] sm:$0xff]  }
 0x6fd   : > { %7278 = vmatpush1.bf16.msra.mxu1 %v9811_v5  ;;  %8724 = vmatprep.mubr.msk.bf16.mxu1 %vm3923_vm2, %v11814_v31  ;;  %v9815_v31 = vld [vmem:[%s12462_s5 + $0x4f0] sm:$0xff]  }
 0x6fe   : > { %7279 = vmatprep.subr.bf16.mxu1 %v11820_v62 }
 0x701   : > { %7280 = vmatpush1.bf16.msra.mxu1 %v9812_v19 }
 0x702   : > { %7281 = vmatprep.subr.bf16.mxu1 %v11820_v62 }
 0x705   : > { %7282 = vmatpush1.bf16.msra.mxu1 %v9813_v38 }
 0x706   : > { %7283 = vmatprep.subr.bf16.mxu1 %v11820_v62 }
 0x709   : > { %7284 = vmatpush1.bf16.msra.mxu1 %v9814_v55 }
 0x70a   : > { %7285 = vmatprep.subr.bf16.mxu1 %v11820_v62 }
 0x70d   : > { %7286 = vmatpush1.bf16.msra.mxu1 %v9815_v31 }
 0x70e   : > { %7287 = vmatprep.subr.bf16.mxu1 %v11820_v62 }
 0x711   : > { %7288 = vmatpush1.bf16.msra.mxu1 %v9816_v17 }
 0x712   : > { %7289 = vmatprep.subr.bf16.mxu1 %v11820_v62 }
 0x715   : > { %7290 = vmatpush1.bf16.msra.mxu1 %v9817_v12 }
 0x716   : > { %7291 = vmatprep.subr.bf16.mxu1 %v11820_v62 }
 0x718   : > { %v12355_v51 = vpop.f32.mrb[180].mxu0 }
 0x719   : > { %v7472_v28 = vpop.f32.mrb[181].mxu0  ;;  %7292 = vmatpush1.bf16.msra.mxu1 %v9818_v15 }
 0x71a   : > { %v12360_v47 = vpop.f32.mrb[182].mxu0  ;;  %7293 = vmatprep.subr.bf16.mxu1 %v11820_v62 }
 0x71b   : > { %v7475_v34 = vpop.f32.mrb[183].mxu0 }
 0x71c   : > { %v8811_v34 = vld [vmem:[#allocation10] ss:$0 sm:$0xff] }
 0x71d   : > { %7294 = vmatpush1.bf16.msra.mxu1 %v9819_v42 }
 0x71e   : > { %7295 = vmatprep.subr.bf16.mxu1 %v11820_v62 }
 0x721   : > { %7296 = vmatpush1.bf16.msra.mxu1 %v9820_v40 }
 0x722   : > { %7297 = vmatprep.subr.bf16.mxu1 %v11820_v62 }
 0x725   : > { %7298 = vmatpush1.bf16.msra.mxu1 %v9821_v2 }
 0x726   : > { %7299 = vmatprep.subr.bf16.mxu1 %v11820_v62 }
 0x727   : > { %v6198_v43 = vpop.f32.mrb[128].mxu1 }
 0x728   : > { %v6205_v35 = vadd.f32 %v6198_v43, %v6046_v44  ;;  %v6200_v1 = vpop.f32.mrb[129].mxu1 }
 0x729   : > { %v6201_v45 = vpop.f32.mrb[130].mxu1  ;;  %7300 = vmatpush1.bf16.msra.mxu1 %v9822_v48 }
 0x72a   : > { %v6206_v36 = vadd.f32 %v6201_v45, %v6047_v39  ;;  %v6203_v16 = vpop.f32.mrb[131].mxu1  ;;  %7301 = vmatprep.subr.bf16.mxu1 %v11820_v62 }
 0x72d   : > { %7302 = vmatpush1.bf16.msra.mxu1 %v9823_v4 }
 0x72e   : > { %7303 = vmatprep.subr.bf16.mxu1 %v11820_v62 }
 0x731   : > { %7304 = vmatpush1.bf16.msra.mxu1 %v9824_v57 }
 0x732   : > { %7595 = vmatprep.subr.bf16.mxu1 %v11820_v62 }
 0x734   : > { %7310 = vmatmul.mubr.bf16.vlgmr.msra.gmra.mrb[144].mxu1 %v11810_v6  ;;  %v9828_v6 = vld [vmem:[%s12462_s5 + $0x5c8] sm:$0xff]  }
 0x735   : > { %7596 = vmatpush1.bf16.msra.mxu1 %v9825_v52  ;;  %8810 = vmatprep.mubr.msk.bf16.mxu1 %vm3923_vm2, %v11876_v18  ;;  %v9829_v18 = vld [vmem:[%s12462_s5 + $0x5d0] sm:$0xff]  }
 0x736   : > { %7597 = vmatprep.subr.bf16.mxu1 %v11820_v62 }
 0x739   : > { %7598 = vmatpush1.bf16.msra.mxu1 %v9826_v9 }
 0x73a   : > { %7599 = vmatprep.subr.bf16.mxu1 %v11820_v62 }
 0x73d   : > { %7600 = vmatpush1.bf16.msra.mxu1 %v9827_v23 }
 0x73e   : > { %7601 = vmatprep.subr.bf16.mxu1 %v11820_v62 }
 0x741   : > { %7602 = vmatpush1.bf16.msra.mxu1 %v9828_v6 }
 0x742   : > { %7603 = vmatprep.subr.bf16.mxu1 %v11820_v62 }
 0x745   : > { %7604 = vmatpush1.bf16.msra.mxu1 %v9829_v18 }
 0x746   : > { %7605 = vmatprep.subr.bf16.mxu1 %v11820_v62 }
 0x749   : > { %7606 = vmatpush1.bf16.msra.mxu1 %v9830_v25 }
 0x74a   : > { %7607 = vmatprep.subr.bf16.mxu1 %v11820_v62 }
 0x74d   : > { %7608 = vmatpush1.bf16.msra.mxu1 %v9831_v54 }
 0x74e   : > { %7609 = vmatprep.subr.bf16.mxu1 %v11820_v62 }
 0x751   : > { %7610 = vmatpush1.bf16.msra.mxu1 %v9832_v49 }
 0x752   : > { %7611 = vmatprep.subr.bf16.mxu1 %v11820_v62 }
 0x755   : > { %7612 = vmatpush1.bf16.msra.mxu1 %v9833_v59 }
 0x756   : > { %7613 = vmatprep.subr.bf16.mxu1 %v11820_v62 }
 0x759   : > { %7614 = vmatpush1.bf16.msra.mxu1 %v9834_v11 }
 0x75a   : > { %7615 = vmatprep.subr.bf16.mxu1 %v11820_v62 }
 0x75d   : > { %7616 = vmatpush1.bf16.msra.mxu1 %v9835_v41 }
 0x75e   : > { %7617 = vmatprep.subr.bf16.mxu1 %v11820_v62 }
 0x75f   : > { %v6357_v20 = vpop.f32.mrb[132].mxu1 }
 0x760   : > { %v6364_v33 = vadd.f32 %v6357_v20, %v6205_v35  ;;  %v6359_v10 = vpop.f32.mrb[133].mxu1 }
 0x761   : > { %v6360_v13 = vpop.f32.mrb[134].mxu1  ;;  %7618 = vmatpush1.bf16.msra.mxu1 %v9836_v56 }
 0x762   : > { %v6365_v63 = vadd.f32 %v6360_v13, %v6206_v36  ;;  %v6362_v29 = vpop.f32.mrb[135].mxu1  ;;  %7619 = vmatprep.subr.bf16.mxu1 %v11820_v62  ;;  %v6523_v21 = vadd.f32 %v12166_v46, %v6364_v33 }
 0x764   : > { %v6524_v24 = vadd.f32 %v12168_v61, %v6365_v63 }
 0x765   : > { %7620 = vmatpush1.bf16.msra.mxu1 %v9837_v14 }
 0x766   : > { %7621 = vmatprep.subr.bf16.mxu1 %v9876_v26 }
 0x769   : > { %7622 = vmatpush1.bf16.msra.mxu1 %v9838_v3 }
 0x76c   : > { %7628 = vmatmul.mubr.bf16.vlgmr.msra.gmra.mrb[148].mxu1 %v11872_v7 }
 0x797   : > { %v6675_v30 = vpop.f32.mrb[136].mxu1 }
 0x798   : > { %v6682_v60 = vadd.f32 %v6675_v30, %v6523_v21  ;;  %v6677_v44 = vpop.f32.mrb[137].mxu1 }
 0x799   : > { %v6678_v58 = vpop.f32.mrb[138].mxu1 }
 0x79a   : > { %v6683_v27 = vadd.f32 %v6678_v58, %v6524_v24  ;;  %v6680_v62 = vpop.f32.mrb[139].mxu1  ;;  %v6841_v46 = vadd.f32 %v12229_v32, %v6682_v60 }
 0x79c   : > { %v6842_v61 = vadd.f32 %v12234_v37, %v6683_v27 }
 0x7cf   : > { %v6993_v53 = vpop.f32.mrb[140].mxu1 }
 0x7d0   : > { %v7000_v39 = vadd.f32 %v6993_v53, %v6841_v46  ;;  %v6995_v50 = vpop.f32.mrb[141].mxu1 }
 0x7d1   : > { %v6996_v0 = vpop.f32.mrb[142].mxu1 }
 0x7d2   : > { %v7001_v5 = vadd.f32 %v6996_v0, %v6842_v61  ;;  %v6998_v19 = vpop.f32.mrb[143].mxu1  ;;  %v7159_v38 = vadd.f32 %v12292_v22, %v7000_v39 }
 0x7d4   : > { %v7160_v7 = vadd.f32 %v12297_v8, %v7001_v5 }
 0x807   : > { %v7311_v55 = vpop.f32.mrb[144].mxu1 }
 0x808   : > { %v7318_v31 = vadd.f32 %v7311_v55, %v7159_v38  ;;  %v7313_v17 = vpop.f32.mrb[145].mxu1 }
 0x809   : > { %v7314_v12 = vpop.f32.mrb[146].mxu1 }
 0x80a   : > { %v7319_v15 = vadd.f32 %v7314_v12, %v7160_v7  ;;  %v7316_v28 = vpop.f32.mrb[147].mxu1  ;;  %v7477_v32 = vadd.f32 %v12355_v51, %v7318_v31 }
 0x80c   : > { %v7478_v37 = vadd.f32 %v12360_v47, %v7319_v15 }
 0x83f   : > { %v7629_v42 = vpop.f32.mrb[148].mxu1 }
 0x840   : > { %v7636_v40 = vadd.f32 %v7629_v42, %v7477_v32  ;;  %v7631_v22 = vpop.f32.mrb[149].mxu1 }
 0x841   : > { %v7632_v8 = vpop.f32.mrb[150].mxu1 }
 0x842   : > { %v7645_v2 = vadd.f32 %v8811_v34, %v7636_v40  ;;  %v7637_v48 = vadd.f32 %v7632_v8, %v7478_v37  ;;  %v7634_v43 = vpop.f32.mrb[151].mxu1 }
 0x844   : > { %7648 = vst.msk [vmem:[%s385_s15] sm:$0xff] %vm7647_vm3, %v7645_v2  ;;  %v7646_v51 = vadd.f32 %v8811_v34, %v7637_v48 }
 0x846   : > { %7649 = vst.msk [vmem:[%s385_s15 + $0x8] sm:$0xff] %vm7647_vm3, %v7646_v51 }
 0x847 PF: > { %s22_s27 = sadd.s32 1, %s10035_s27  }
 0x848   : > { %p19_p8 = scmp.ge.s32.totalorder %s22_s27, 4  }
 0x84a   :  { %21 = sbr.rel (!%p19_p8) target bundleno = 3 (0x3), region = 132 }
 0x851   :  { %7688 = vsyncpa [#allocation4], 1 }
 0x852   :  { %7690 = vsyncpa [#allocation4 + $0x1], 1 }
 0x853   :  { %7691 = vsyncpa [#allocation6], 1 }
 0x854   :  { %7692 = vsyncpa [#allocation9], 1 }

</bundles_post_ra>
